<compile_context>
chip_gen: v7x
topology: tpu7x:2x2x1
jax: 0.10.0
libtpu: 0.0.40
codegen_flags: <defaults>
</compile_context>

<pallas_src>
import functools

import jax
import jax.numpy as jnp
from jax.experimental import pallas as pl
from jax.experimental.pallas import tpu as pltpu

LANE = 128


def _round_up(n, m):
    return ((n + m - 1) // m) * m


def _pad_to(a, shape):
    return jnp.pad(a, [(0, t - s) for s, t in zip(a.shape, shape)])


def _replicated_spec(shape):
    nd = len(shape)
    return pl.BlockSpec(shape, lambda b: (0,) * nd)


# ----------------------------------------------------------------------------
# Wrapper-side weight preparation.
# ----------------------------------------------------------------------------
def _band_conv_weight(w, w_in, w_out):
    """Torch conv weight (Co, Ci, kh, kw) -> banded matrices (kh, w_in*Ci, w_out*Co).

    band[di, j2*Ci + ci, j*Co + co] = w[co, ci, di, j2 - j]   if 0 <= j2-j < kw
                                      0                        otherwise
    so that  (rows of input row i+di, pixel-major) @ band[di]  accumulates the
    valid convolution output row i in (pixel, channel)-major order.
    """
    co, ci, kh, kw = w.shape
    wt = jnp.transpose(w, (2, 3, 1, 0))                 # (kh, kw, Ci, Co)
    j2 = jnp.arange(w_in)[:, None]                      # (w_in, 1)
    j = jnp.arange(w_out)[None, :]                      # (1, w_out)
    dj = j2 - j                                         # (w_in, w_out)
    valid = (dj >= 0) & (dj < kw)
    djc = jnp.clip(dj, 0, kw - 1)
    g = wt[:, djc]                                      # (kh, w_in, w_out, Ci, Co)
    g = jnp.where(valid[None, :, :, None, None], g, 0.0)
    band = jnp.transpose(g, (0, 1, 3, 2, 4))            # (kh, w_in, Ci, w_out, Co)
    return band.reshape(kh, w_in * ci, w_out * co).astype(jnp.bfloat16)


def _prepare_params(p, H, W):
    c1w, c2w = p["conv1_w"], p["conv2_w"]
    C1, Cin, k1, _ = c1w.shape
    C2, _, k2, _ = c2w.shape
    Ho1, Wo1 = H - k1 + 1, W - k1 + 1
    Ho2, Wo2 = Ho1 - k2 + 1, Wo1 - k2 + 1

    # Banded conv weights (column shifts folded into the weight matrix).
    w1b = _band_conv_weight(c1w, W, Wo1)                 # (k1, W*Cin,   Wo1*C1)
    w2b = _band_conv_weight(c2w, Wo1, Wo2)               # (k2, Wo1*C1,  Wo2*C2)
    # Biases tiled per output pixel (minor index = j*Cout + c).
    b1t = jnp.tile(p["conv1_b"].astype(jnp.float32), Wo1).reshape(1, Wo1 * C1)
    b2t = jnp.tile(p["conv2_b"].astype(jnp.float32), Wo2).reshape(1, Wo2 * C2)

    # fc1: torch weight (N1, CHW) with CHW index = c*Ho2*Wo2 + h*Wo2 + w (NCHW
    # flatten).  The kernel's activation layout is (h, (w, c)), so permute the
    # rows once here and split by spatial row h -> (Ho2, Wo2*C2, N1p).
    f1w = p["fc1_w"]
    N1, CHW = f1w.shape
    assert CHW == C2 * Ho2 * Wo2
    N1p = _round_up(N1, LANE)
    wf1 = jnp.transpose(f1w.reshape(N1, C2, Ho2, Wo2), (2, 3, 1, 0))  # (h, w, c, n)
    wf1 = wf1.reshape(Ho2, Wo2 * C2, N1)
    wf1 = _pad_to(wf1, (Ho2, Wo2 * C2, N1p)).astype(jnp.bfloat16)
    bf1 = _pad_to(p["fc1_b"].astype(jnp.float32), (N1p,)).reshape(1, N1p)

    N2 = p["fc2_w"].shape[0]
    N2p = _round_up(N2, LANE)
    wf2 = _pad_to(p["fc2_w"].T, (N1p, N2p)).astype(jnp.bfloat16)
    bf2 = _pad_to(p["fc2_b"].astype(jnp.float32), (N2p,)).reshape(1, N2p)

    N3 = p["fc3_w"].shape[0]
    N3p = _round_up(N3, LANE)
    wf3 = _pad_to(p["fc3_w"].T, (N2p, N3p)).astype(jnp.bfloat16)
    bf3 = _pad_to(p["fc3_b"].astype(jnp.float32), (N3p,)).reshape(1, N3p)

    return dict(w1b=w1b, b1t=b1t, w2b=w2b, b2t=b2t,
                wf1=wf1, bf1=bf1, wf2=wf2, bf2=bf2, wf3=wf3, bf3=bf3)


# ----------------------------------------------------------------------------
# Fused kernel: conv1+ReLU -> conv2+ReLU -> fc1+ReLU -> fc2+ReLU -> fc3.
# One batch block (Bt samples) per grid step; everything stays in VMEM/vregs.
# ----------------------------------------------------------------------------
def _boixnet_kernel(x_ref, w1_ref, b1_ref, w2_ref, b2_ref,
                    wf1_ref, bf1_ref, wf2_ref, bf2_ref, wf3_ref, bf3_ref,
                    o_ref, *, ho1, ho2):
    x = x_ref[...]                       # (Bt, H, W*Cin) bf16
    bt = x.shape[0]
    wc0 = x.shape[2]                     # W   * Cin
    k1 = w1_ref.shape[0]
    k2 = w2_ref.shape[0]
    wc1 = w1_ref.shape[2]                # Wo1 * C1
    wc2 = w2_ref.shape[2]                # Wo2 * C2

    # conv1 + ReLU: k1 matmuls, M = Bt*Ho1, K = W*Cin, N = Wo1*C1.
    acc1 = jnp.zeros((bt * ho1, wc1), jnp.float32)
    for di in range(k1):
        lhs = x[:, di:di + ho1, :].reshape(bt * ho1, wc0)
        acc1 = acc1 + jnp.dot(lhs, w1_ref[di], preferred_element_type=jnp.float32)
    a1 = jnp.maximum(acc1 + b1_ref[...], 0.0)
    a1 = a1.astype(jnp.bfloat16).reshape(bt, ho1, wc1)

    # conv2 + ReLU: k2 matmuls, M = Bt*Ho2, K = Wo1*C1, N = Wo2*C2.
    acc2 = jnp.zeros((bt * ho2, wc2), jnp.float32)
    for di in range(k2):
        lhs = a1[:, di:di + ho2, :].reshape(bt * ho2, wc1)
        acc2 = acc2 + jnp.dot(lhs, w2_ref[di], preferred_element_type=jnp.float32)
    a2 = jnp.maximum(acc2 + b2_ref[...], 0.0)
    a2 = a2.astype(jnp.bfloat16).reshape(bt, ho2, wc2)

    # fc1 + ReLU: contract (spatial row, spatial col, channel) as a sum of
    # per-spatial-row matmuls (K = Wo2*C2, N = 128) -- no lane-merge needed.
    n1p = wf1_ref.shape[2]
    h1 = jnp.zeros((bt, n1p), jnp.float32)
    for i in range(ho2):
        h1 = h1 + jnp.dot(a2[:, i, :], wf1_ref[i], preferred_element_type=jnp.float32)
    h1 = jnp.maximum(h1 + bf1_ref[...], 0.0).astype(jnp.bfloat16)

    # fc2 + ReLU, fc3 (lane-dense 128-wide).
    h2 = jnp.dot(h1, wf2_ref[...], preferred_element_type=jnp.float32) + bf2_ref[...]
    h2 = jnp.maximum(h2, 0.0).astype(jnp.bfloat16)
    out = jnp.dot(h2, wf3_ref[...], preferred_element_type=jnp.float32) + bf3_ref[...]
    o_ref[...] = out.astype(o_ref.dtype)


def _boixnet_pallas(x_flat, prep, Bt):
    B_pad, H, WCin = x_flat.shape
    k1, _, WC1 = prep["w1b"].shape
    k2, _, WC2 = prep["w2b"].shape
    Ho2, _, N1p = prep["wf1"].shape
    Ho1 = Ho2 + k2 - 1
    N2p = prep["wf2"].shape[1]
    N3p = prep["wf3"].shape[1]

    flops = 2 * B_pad * (k1 * Ho1 * WCin * WC1
                         + k2 * Ho2 * WC1 * WC2
                         + Ho2 * WC2 * N1p + N1p * N2p + N2p * N3p)
    args = (x_flat, prep["w1b"], prep["b1t"], prep["w2b"], prep["b2t"],
            prep["wf1"], prep["bf1"], prep["wf2"], prep["bf2"],
            prep["wf3"], prep["bf3"])
    bytes_accessed = int(sum(a.size * a.dtype.itemsize for a in args)
                         + B_pad * N3p * 4)

    kernel = functools.partial(_boixnet_kernel, ho1=Ho1, ho2=Ho2)
    in_specs = [pl.BlockSpec((Bt, H, WCin), lambda b: (b, 0, 0))]
    in_specs += [_replicated_spec(a.shape) for a in args[1:]]

    return pl.pallas_call(
        kernel,
        out_shape=jax.ShapeDtypeStruct((B_pad, N3p), jnp.float32),
        grid=(B_pad // Bt,),
        in_specs=in_specs,
        out_specs=pl.BlockSpec((Bt, N3p), lambda b: (b, 0)),
        compiler_params=pltpu.CompilerParams(
            dimension_semantics=("parallel",)),
        cost_estimate=pl.CostEstimate(flops=flops, transcendentals=0,
                                      bytes_accessed=bytes_accessed),
    )(*args)


# ----------------------------------------------------------------------------
# BoixNet forward (do_bn=False path).
# ----------------------------------------------------------------------------
def boixnet_forward(x_nchw, params):
    B, Cin, H, W = x_nchw.shape
    n_out = params["fc3_w"].shape[0]
    prep = _prepare_params(params, H, W)

    # Batch block: >=8 (sublane friendly), <=32, and >=2 grid steps for larger
    # batches so both v7x TensorCores get work.
    Bt = min(32, max(8, _round_up(_round_up(B, 8) // 2, 8)))
    B_pad = _round_up(B, Bt)

    # NCHW -> NHWC -> (B, H, W*Cin) pixel-major rows (free trailing collapse).
    x_rows = jnp.transpose(x_nchw, (0, 2, 3, 1)).reshape(B, H, W * Cin)
    x_rows = jnp.pad(x_rows, ((0, B_pad - B), (0, 0), (0, 0))).astype(jnp.bfloat16)

    outp = _boixnet_pallas(x_rows, prep, Bt)
    return outp[:B, :n_out]


def init_params(key, *, nb_filters1, nb_filters2, k1, k2,
                chw, nb_fc1, nb_fc2, nb_fc3):
    keys = jax.random.split(key, 10)
    s = 0.1
    return {
        "conv1_w": s * jax.random.normal(keys[0], (nb_filters1, 3, k1, k1), jnp.float32),
        "conv1_b": s * jax.random.normal(keys[1], (nb_filters1,), jnp.float32),
        "conv2_w": s * jax.random.normal(keys[2], (nb_filters2, nb_filters1, k2, k2), jnp.float32),
        "conv2_b": s * jax.random.normal(keys[3], (nb_filters2,), jnp.float32),
        # torch nn.Linear layout: weight is (out_features, in_features)
        "fc1_w": s * jax.random.normal(keys[4], (nb_fc1, chw), jnp.float32),
        "fc1_b": s * jax.random.normal(keys[5], (nb_fc1,), jnp.float32),
        "fc2_w": s * jax.random.normal(keys[6], (nb_fc2, nb_fc1), jnp.float32),
        "fc2_b": s * jax.random.normal(keys[7], (nb_fc2,), jnp.float32),
        "fc3_w": s * jax.random.normal(keys[8], (nb_fc3, nb_fc2), jnp.float32),
        "fc3_b": s * jax.random.normal(keys[9], (nb_fc3,), jnp.float32),
    }


# ----------------------------------------------------------------------------
# Pure-JAX references (f32 and bf16-operand variants) for the sanity check.
# ----------------------------------------------------------------------------
def boixnet_reference(x, p, compute_dtype=jnp.float32):
    cd = compute_dtype

    def conv(x, w, b):
        y = jax.lax.conv_general_dilated(
            x.astype(cd), w.astype(cd), window_strides=(1, 1), padding="VALID",
            dimension_numbers=("NCHW", "OIHW", "NCHW"),
            preferred_element_type=jnp.float32)
        return jax.nn.relu(y + b[None, :, None, None])

    def fc(x, w, b):
        return jnp.dot(x.astype(cd), w.T.astype(cd),
                       preferred_element_type=jnp.float32) + b

    a1 = conv(x, p["conv1_w"], p["conv1_b"])
    a2 = conv(a1, p["conv2_w"], p["conv2_b"])
    flat = a2.reshape(a2.shape[0], -1)
    h1 = jax.nn.relu(fc(flat, p["fc1_w"], p["fc1_b"]))
    h2 = jax.nn.relu(fc(h1, p["fc2_w"], p["fc2_b"]))
    return fc(h2, p["fc3_w"], p["fc3_b"])


if __name__ == "__main__":
    # Small config: C=3 (fixed by the module), H=W=16, k1=k2=3,
    # nb_filters1=4, nb_filters2=8, fc sizes 32/16/10.
    C, H, W = 3, 16, 16
    k1, k2 = 3, 3
    nf1, nf2 = 4, 8
    nb_fc1, nb_fc2, nb_fc3 = 32, 16, 10
    Ho2 = H - k1 + 1 - k2 + 1
    Wo2 = W - k1 + 1 - k2 + 1
    CHW = Ho2 * Wo2 * nf2

    key = jax.random.PRNGKey(0)
    kx, kp = jax.random.split(key)
    params = init_params(kp, nb_filters1=nf1, nb_filters2=nf2, k1=k1, k2=k2,
                         chw=CHW, nb_fc1=nb_fc1, nb_fc2=nb_fc2, nb_fc3=nb_fc3)

    fwd = jax.jit(boixnet_forward)

    # Case 1: tiny batch (single grid step).  Case 2: batch with a remainder
    # (padded batch, multi-step parallel grid) to exercise the blocking path.
    for B in (2, 20):
        x = jax.random.normal(kx, (B, C, H, W), jnp.float32)
        out = jax.block_until_ready(fwd(x, params))
        assert out.shape == (B, nb_fc3), out.shape

        # Tight check vs a reference that casts matmul operands to bf16 exactly
        # like the kernel (f32 accumulation), looser check vs pure f32.
        ref_bf16 = boixnet_reference(x, params, compute_dtype=jnp.bfloat16)
        ref_f32 = boixnet_reference(x, params, compute_dtype=jnp.float32)
        assert jnp.allclose(out, ref_bf16, atol=2e-3, rtol=2e-3), \
            f"mismatch vs bf16 reference (B={B})"
        assert jnp.allclose(out, ref_f32, atol=2e-2, rtol=2e-2), \
            f"mismatch vs f32 reference (B={B})"

    print("KERNEL_OK")
</pallas_src>

<mosaic_0001>
module attributes {stable_mosaic.version = 11 : i64} {
  func.func @_boixnet_kernel(%arg0: i32, %arg1: memref<8x16x48xbf16, #tpu.memory_space<vmem>>, %arg2: memref<3x48x56xbf16, #tpu.memory_space<vmem>>, %arg3: memref<1x56xf32, #tpu.memory_space<vmem>>, %arg4: memref<3x56x96xbf16, #tpu.memory_space<vmem>>, %arg5: memref<1x96xf32, #tpu.memory_space<vmem>>, %arg6: memref<12x96x128xbf16, #tpu.memory_space<vmem>>, %arg7: memref<1x128xf32, #tpu.memory_space<vmem>>, %arg8: memref<128x128xbf16, #tpu.memory_space<vmem>>, %arg9: memref<1x128xf32, #tpu.memory_space<vmem>>, %arg10: memref<128x128xbf16, #tpu.memory_space<vmem>>, %arg11: memref<1x128xf32, #tpu.memory_space<vmem>>, %arg12: memref<8x128xf32, #tpu.memory_space<vmem>>) attributes {dimension_semantics = [#tpu.dimension_semantics<parallel>], iteration_bounds = array<i64: 1>, scalar_prefetch = 0 : i64, scratch_operands = 0 : i64, tpu.core_type = #tpu.core_type<tc>, window_params = [{transform_indices = @transform_0, window_bounds = array<i64: 8, 16, 48>}, {pipeline_mode = #tpu.pipeline_mode<synchronous>, transform_indices = @transform_1, window_bounds = array<i64: 3, 48, 56>}, {pipeline_mode = #tpu.pipeline_mode<synchronous>, transform_indices = @transform_2, window_bounds = array<i64: 1, 56>}, {pipeline_mode = #tpu.pipeline_mode<synchronous>, transform_indices = @transform_3, window_bounds = array<i64: 3, 56, 96>}, {pipeline_mode = #tpu.pipeline_mode<synchronous>, transform_indices = @transform_4, window_bounds = array<i64: 1, 96>}, {pipeline_mode = #tpu.pipeline_mode<synchronous>, transform_indices = @transform_5, window_bounds = array<i64: 12, 96, 128>}, {pipeline_mode = #tpu.pipeline_mode<synchronous>, transform_indices = @transform_6, window_bounds = array<i64: 1, 128>}, {pipeline_mode = #tpu.pipeline_mode<synchronous>, transform_indices = @transform_7, window_bounds = array<i64: 128, 128>}, {pipeline_mode = #tpu.pipeline_mode<synchronous>, transform_indices = @transform_8, window_bounds = array<i64: 1, 128>}, {pipeline_mode = #tpu.pipeline_mode<synchronous>, transform_indices = @transform_9, window_bounds = array<i64: 128, 128>}, {pipeline_mode = #tpu.pipeline_mode<synchronous>, transform_indices = @transform_10, window_bounds = array<i64: 1, 128>}, {transform_indices = @transform_11, window_bounds = array<i64: 8, 128>}]} {
    %c0 = arith.constant 0 : index
    %c0_0 = arith.constant 0 : index
    %c0_1 = arith.constant 0 : index
    %0 = vector.load %arg1[%c0, %c0_0, %c0_1] : memref<8x16x48xbf16, #tpu.memory_space<vmem>>, vector<8x16x48xbf16>
    %cst = arith.constant 0.000000e+00 : f32
    %1 = vector.broadcast %cst : f32 to vector<112x56xf32>
    %2 = vector.extract_strided_slice %0 {offsets = [0, 0, 0], sizes = [8, 14, 48], strides = [1, 1, 1]} : vector<8x16x48xbf16> to vector<8x14x48xbf16>
    %3 = vector.shape_cast %2 : vector<8x14x48xbf16> to vector<112x48xbf16>
    %c0_2 = arith.constant 0 : index
    %c0_3 = arith.constant 0 : index
    %c0_4 = arith.constant 0 : index
    %4 = vector.load %arg2[%c0_2, %c0_3, %c0_4] : memref<3x48x56xbf16, #tpu.memory_space<vmem>>, vector<1x48x56xbf16>
    %5 = vector.shape_cast %4 : vector<1x48x56xbf16> to vector<48x56xbf16>
    %cst_5 = arith.constant dense<0.000000e+00> : vector<112x56xf32>
    %6 = tpu.matmul %3, %5, %cst_5 {dimension_numbers = #tpu.dot_dimension_numbers<[1], [0], [0], [1], [0, 0, 1, 1], [], []>} : vector<112x48xbf16>, vector<48x56xbf16>, vector<112x56xf32> -> vector<112x56xf32>
    %7 = arith.addf %1, %6 : vector<112x56xf32>
    %8 = vector.extract_strided_slice %0 {offsets = [0, 1, 0], sizes = [8, 14, 48], strides = [1, 1, 1]} : vector<8x16x48xbf16> to vector<8x14x48xbf16>
    %9 = vector.shape_cast %8 : vector<8x14x48xbf16> to vector<112x48xbf16>
    %c1 = arith.constant 1 : index
    %c0_6 = arith.constant 0 : index
    %c0_7 = arith.constant 0 : index
    %10 = vector.load %arg2[%c1, %c0_6, %c0_7] : memref<3x48x56xbf16, #tpu.memory_space<vmem>>, vector<1x48x56xbf16>
    %11 = vector.shape_cast %10 : vector<1x48x56xbf16> to vector<48x56xbf16>
    %cst_8 = arith.constant dense<0.000000e+00> : vector<112x56xf32>
    %12 = tpu.matmul %9, %11, %cst_8 {dimension_numbers = #tpu.dot_dimension_numbers<[1], [0], [0], [1], [0, 0, 1, 1], [], []>} : vector<112x48xbf16>, vector<48x56xbf16>, vector<112x56xf32> -> vector<112x56xf32>
    %13 = arith.addf %7, %12 : vector<112x56xf32>
    %14 = vector.extract_strided_slice %0 {offsets = [0, 2, 0], sizes = [8, 14, 48], strides = [1, 1, 1]} : vector<8x16x48xbf16> to vector<8x14x48xbf16>
    %15 = vector.shape_cast %14 : vector<8x14x48xbf16> to vector<112x48xbf16>
    %c2 = arith.constant 2 : index
    %c0_9 = arith.constant 0 : index
    %c0_10 = arith.constant 0 : index
    %16 = vector.load %arg2[%c2, %c0_9, %c0_10] : memref<3x48x56xbf16, #tpu.memory_space<vmem>>, vector<1x48x56xbf16>
    %17 = vector.shape_cast %16 : vector<1x48x56xbf16> to vector<48x56xbf16>
    %cst_11 = arith.constant dense<0.000000e+00> : vector<112x56xf32>
    %18 = tpu.matmul %15, %17, %cst_11 {dimension_numbers = #tpu.dot_dimension_numbers<[1], [0], [0], [1], [0, 0, 1, 1], [], []>} : vector<112x48xbf16>, vector<48x56xbf16>, vector<112x56xf32> -> vector<112x56xf32>
    %19 = arith.addf %13, %18 : vector<112x56xf32>
    %c0_12 = arith.constant 0 : index
    %c0_13 = arith.constant 0 : index
    %20 = vector.load %arg3[%c0_12, %c0_13] : memref<1x56xf32, #tpu.memory_space<vmem>>, vector<1x56xf32>
    %21 = vector.broadcast %20 : vector<1x56xf32> to vector<112x56xf32>
    %22 = arith.addf %19, %21 : vector<112x56xf32>
    %cst_14 = arith.constant 0.000000e+00 : f32
    %23 = vector.broadcast %cst_14 : f32 to vector<112x56xf32>
    %24 = arith.maximumf %22, %23 : vector<112x56xf32>
    %25 = arith.truncf %24 : vector<112x56xf32> to vector<112x56xbf16>
    %26 = vector.shape_cast %25 : vector<112x56xbf16> to vector<8x14x56xbf16>
    %cst_15 = arith.constant 0.000000e+00 : f32
    %27 = vector.broadcast %cst_15 : f32 to vector<96x96xf32>
    %28 = vector.extract_strided_slice %26 {offsets = [0, 0, 0], sizes = [8, 12, 56], strides = [1, 1, 1]} : vector<8x14x56xbf16> to vector<8x12x56xbf16>
    %29 = vector.shape_cast %28 : vector<8x12x56xbf16> to vector<96x56xbf16>
    %c0_16 = arith.constant 0 : index
    %c0_17 = arith.constant 0 : index
    %c0_18 = arith.constant 0 : index
    %30 = vector.load %arg4[%c0_16, %c0_17, %c0_18] : memref<3x56x96xbf16, #tpu.memory_space<vmem>>, vector<1x56x96xbf16>
    %31 = vector.shape_cast %30 : vector<1x56x96xbf16> to vector<56x96xbf16>
    %cst_19 = arith.constant dense<0.000000e+00> : vector<96x96xf32>
    %32 = tpu.matmul %29, %31, %cst_19 {dimension_numbers = #tpu.dot_dimension_numbers<[1], [0], [0], [1], [0, 0, 1, 1], [], []>} : vector<96x56xbf16>, vector<56x96xbf16>, vector<96x96xf32> -> vector<96x96xf32>
    %33 = arith.addf %27, %32 : vector<96x96xf32>
    %34 = vector.extract_strided_slice %26 {offsets = [0, 1, 0], sizes = [8, 12, 56], strides = [1, 1, 1]} : vector<8x14x56xbf16> to vector<8x12x56xbf16>
    %35 = vector.shape_cast %34 : vector<8x12x56xbf16> to vector<96x56xbf16>
    %c1_20 = arith.constant 1 : index
    %c0_21 = arith.constant 0 : index
    %c0_22 = arith.constant 0 : index
    %36 = vector.load %arg4[%c1_20, %c0_21, %c0_22] : memref<3x56x96xbf16, #tpu.memory_space<vmem>>, vector<1x56x96xbf16>
    %37 = vector.shape_cast %36 : vector<1x56x96xbf16> to vector<56x96xbf16>
    %cst_23 = arith.constant dense<0.000000e+00> : vector<96x96xf32>
    %38 = tpu.matmul %35, %37, %cst_23 {dimension_numbers = #tpu.dot_dimension_numbers<[1], [0], [0], [1], [0, 0, 1, 1], [], []>} : vector<96x56xbf16>, vector<56x96xbf16>, vector<96x96xf32> -> vector<96x96xf32>
    %39 = arith.addf %33, %38 : vector<96x96xf32>
    %40 = vector.extract_strided_slice %26 {offsets = [0, 2, 0], sizes = [8, 12, 56], strides = [1, 1, 1]} : vector<8x14x56xbf16> to vector<8x12x56xbf16>
    %41 = vector.shape_cast %40 : vector<8x12x56xbf16> to vector<96x56xbf16>
    %c2_24 = arith.constant 2 : index
    %c0_25 = arith.constant 0 : index
    %c0_26 = arith.constant 0 : index
    %42 = vector.load %arg4[%c2_24, %c0_25, %c0_26] : memref<3x56x96xbf16, #tpu.memory_space<vmem>>, vector<1x56x96xbf16>
    %43 = vector.shape_cast %42 : vector<1x56x96xbf16> to vector<56x96xbf16>
    %cst_27 = arith.constant dense<0.000000e+00> : vector<96x96xf32>
    %44 = tpu.matmul %41, %43, %cst_27 {dimension_numbers = #tpu.dot_dimension_numbers<[1], [0], [0], [1], [0, 0, 1, 1], [], []>} : vector<96x56xbf16>, vector<56x96xbf16>, vector<96x96xf32> -> vector<96x96xf32>
    %45 = arith.addf %39, %44 : vector<96x96xf32>
    %c0_28 = arith.constant 0 : index
    %c0_29 = arith.constant 0 : index
    %46 = vector.load %arg5[%c0_28, %c0_29] : memref<1x96xf32, #tpu.memory_space<vmem>>, vector<1x96xf32>
    %47 = vector.broadcast %46 : vector<1x96xf32> to vector<96x96xf32>
    %48 = arith.addf %45, %47 : vector<96x96xf32>
    %cst_30 = arith.constant 0.000000e+00 : f32
    %49 = vector.broadcast %cst_30 : f32 to vector<96x96xf32>
    %50 = arith.maximumf %48, %49 : vector<96x96xf32>
    %51 = arith.truncf %50 : vector<96x96xf32> to vector<96x96xbf16>
    %52 = vector.shape_cast %51 : vector<96x96xbf16> to vector<8x12x96xbf16>
    %cst_31 = arith.constant 0.000000e+00 : f32
    %53 = vector.broadcast %cst_31 : f32 to vector<8x128xf32>
    %54 = vector.extract_strided_slice %52 {offsets = [0, 0, 0], sizes = [8, 1, 96], strides = [1, 1, 1]} : vector<8x12x96xbf16> to vector<8x1x96xbf16>
    %55 = vector.shape_cast %54 : vector<8x1x96xbf16> to vector<8x96xbf16>
    %c0_32 = arith.constant 0 : index
    %c0_33 = arith.constant 0 : index
    %c0_34 = arith.constant 0 : index
    %56 = vector.load %arg6[%c0_32, %c0_33, %c0_34] : memref<12x96x128xbf16, #tpu.memory_space<vmem>>, vector<1x96x128xbf16>
    %57 = vector.shape_cast %56 : vector<1x96x128xbf16> to vector<96x128xbf16>
    %cst_35 = arith.constant dense<0.000000e+00> : vector<8x128xf32>
    %58 = tpu.matmul %55, %57, %cst_35 {dimension_numbers = #tpu.dot_dimension_numbers<[1], [0], [0], [1], [0, 0, 1, 1], [], []>} : vector<8x96xbf16>, vector<96x128xbf16>, vector<8x128xf32> -> vector<8x128xf32>
    %59 = arith.addf %53, %58 : vector<8x128xf32>
    %60 = vector.extract_strided_slice %52 {offsets = [0, 1, 0], sizes = [8, 1, 96], strides = [1, 1, 1]} : vector<8x12x96xbf16> to vector<8x1x96xbf16>
    %61 = vector.shape_cast %60 : vector<8x1x96xbf16> to vector<8x96xbf16>
    %c1_36 = arith.constant 1 : index
    %c0_37 = arith.constant 0 : index
    %c0_38 = arith.constant 0 : index
    %62 = vector.load %arg6[%c1_36, %c0_37, %c0_38] : memref<12x96x128xbf16, #tpu.memory_space<vmem>>, vector<1x96x128xbf16>
    %63 = vector.shape_cast %62 : vector<1x96x128xbf16> to vector<96x128xbf16>
    %cst_39 = arith.constant dense<0.000000e+00> : vector<8x128xf32>
    %64 = tpu.matmul %61, %63, %cst_39 {dimension_numbers = #tpu.dot_dimension_numbers<[1], [0], [0], [1], [0, 0, 1, 1], [], []>} : vector<8x96xbf16>, vector<96x128xbf16>, vector<8x128xf32> -> vector<8x128xf32>
    %65 = arith.addf %59, %64 : vector<8x128xf32>
    %66 = vector.extract_strided_slice %52 {offsets = [0, 2, 0], sizes = [8, 1, 96], strides = [1, 1, 1]} : vector<8x12x96xbf16> to vector<8x1x96xbf16>
    %67 = vector.shape_cast %66 : vector<8x1x96xbf16> to vector<8x96xbf16>
    %c2_40 = arith.constant 2 : index
    %c0_41 = arith.constant 0 : index
    %c0_42 = arith.constant 0 : index
    %68 = vector.load %arg6[%c2_40, %c0_41, %c0_42] : memref<12x96x128xbf16, #tpu.memory_space<vmem>>, vector<1x96x128xbf16>
    %69 = vector.shape_cast %68 : vector<1x96x128xbf16> to vector<96x128xbf16>
    %cst_43 = arith.constant dense<0.000000e+00> : vector<8x128xf32>
    %70 = tpu.matmul %67, %69, %cst_43 {dimension_numbers = #tpu.dot_dimension_numbers<[1], [0], [0], [1], [0, 0, 1, 1], [], []>} : vector<8x96xbf16>, vector<96x128xbf16>, vector<8x128xf32> -> vector<8x128xf32>
    %71 = arith.addf %65, %70 : vector<8x128xf32>
    %72 = vector.extract_strided_slice %52 {offsets = [0, 3, 0], sizes = [8, 1, 96], strides = [1, 1, 1]} : vector<8x12x96xbf16> to vector<8x1x96xbf16>
    %73 = vector.shape_cast %72 : vector<8x1x96xbf16> to vector<8x96xbf16>
    %c3 = arith.constant 3 : index
    %c0_44 = arith.constant 0 : index
    %c0_45 = arith.constant 0 : index
    %74 = vector.load %arg6[%c3, %c0_44, %c0_45] : memref<12x96x128xbf16, #tpu.memory_space<vmem>>, vector<1x96x128xbf16>
    %75 = vector.shape_cast %74 : vector<1x96x128xbf16> to vector<96x128xbf16>
    %cst_46 = arith.constant dense<0.000000e+00> : vector<8x128xf32>
    %76 = tpu.matmul %73, %75, %cst_46 {dimension_numbers = #tpu.dot_dimension_numbers<[1], [0], [0], [1], [0, 0, 1, 1], [], []>} : vector<8x96xbf16>, vector<96x128xbf16>, vector<8x128xf32> -> vector<8x128xf32>
    %77 = arith.addf %71, %76 : vector<8x128xf32>
    %78 = vector.extract_strided_slice %52 {offsets = [0, 4, 0], sizes = [8, 1, 96], strides = [1, 1, 1]} : vector<8x12x96xbf16> to vector<8x1x96xbf16>
    %79 = vector.shape_cast %78 : vector<8x1x96xbf16> to vector<8x96xbf16>
    %c4 = arith.constant 4 : index
    %c0_47 = arith.constant 0 : index
    %c0_48 = arith.constant 0 : index
    %80 = vector.load %arg6[%c4, %c0_47, %c0_48] : memref<12x96x128xbf16, #tpu.memory_space<vmem>>, vector<1x96x128xbf16>
    %81 = vector.shape_cast %80 : vector<1x96x128xbf16> to vector<96x128xbf16>
    %cst_49 = arith.constant dense<0.000000e+00> : vector<8x128xf32>
    %82 = tpu.matmul %79, %81, %cst_49 {dimension_numbers = #tpu.dot_dimension_numbers<[1], [0], [0], [1], [0, 0, 1, 1], [], []>} : vector<8x96xbf16>, vector<96x128xbf16>, vector<8x128xf32> -> vector<8x128xf32>
    %83 = arith.addf %77, %82 : vector<8x128xf32>
    %84 = vector.extract_strided_slice %52 {offsets = [0, 5, 0], sizes = [8, 1, 96], strides = [1, 1, 1]} : vector<8x12x96xbf16> to vector<8x1x96xbf16>
    %85 = vector.shape_cast %84 : vector<8x1x96xbf16> to vector<8x96xbf16>
    %c5 = arith.constant 5 : index
    %c0_50 = arith.constant 0 : index
    %c0_51 = arith.constant 0 : index
    %86 = vector.load %arg6[%c5, %c0_50, %c0_51] : memref<12x96x128xbf16, #tpu.memory_space<vmem>>, vector<1x96x128xbf16>
    %87 = vector.shape_cast %86 : vector<1x96x128xbf16> to vector<96x128xbf16>
    %cst_52 = arith.constant dense<0.000000e+00> : vector<8x128xf32>
    %88 = tpu.matmul %85, %87, %cst_52 {dimension_numbers = #tpu.dot_dimension_numbers<[1], [0], [0], [1], [0, 0, 1, 1], [], []>} : vector<8x96xbf16>, vector<96x128xbf16>, vector<8x128xf32> -> vector<8x128xf32>
    %89 = arith.addf %83, %88 : vector<8x128xf32>
    %90 = vector.extract_strided_slice %52 {offsets = [0, 6, 0], sizes = [8, 1, 96], strides = [1, 1, 1]} : vector<8x12x96xbf16> to vector<8x1x96xbf16>
    %91 = vector.shape_cast %90 : vector<8x1x96xbf16> to vector<8x96xbf16>
    %c6 = arith.constant 6 : index
    %c0_53 = arith.constant 0 : index
    %c0_54 = arith.constant 0 : index
    %92 = vector.load %arg6[%c6, %c0_53, %c0_54] : memref<12x96x128xbf16, #tpu.memory_space<vmem>>, vector<1x96x128xbf16>
    %93 = vector.shape_cast %92 : vector<1x96x128xbf16> to vector<96x128xbf16>
    %cst_55 = arith.constant dense<0.000000e+00> : vector<8x128xf32>
    %94 = tpu.matmul %91, %93, %cst_55 {dimension_numbers = #tpu.dot_dimension_numbers<[1], [0], [0], [1], [0, 0, 1, 1], [], []>} : vector<8x96xbf16>, vector<96x128xbf16>, vector<8x128xf32> -> vector<8x128xf32>
    %95 = arith.addf %89, %94 : vector<8x128xf32>
    %96 = vector.extract_strided_slice %52 {offsets = [0, 7, 0], sizes = [8, 1, 96], strides = [1, 1, 1]} : vector<8x12x96xbf16> to vector<8x1x96xbf16>
    %97 = vector.shape_cast %96 : vector<8x1x96xbf16> to vector<8x96xbf16>
    %c7 = arith.constant 7 : index
    %c0_56 = arith.constant 0 : index
    %c0_57 = arith.constant 0 : index
    %98 = vector.load %arg6[%c7, %c0_56, %c0_57] : memref<12x96x128xbf16, #tpu.memory_space<vmem>>, vector<1x96x128xbf16>
    %99 = vector.shape_cast %98 : vector<1x96x128xbf16> to vector<96x128xbf16>
    %cst_58 = arith.constant dense<0.000000e+00> : vector<8x128xf32>
    %100 = tpu.matmul %97, %99, %cst_58 {dimension_numbers = #tpu.dot_dimension_numbers<[1], [0], [0], [1], [0, 0, 1, 1], [], []>} : vector<8x96xbf16>, vector<96x128xbf16>, vector<8x128xf32> -> vector<8x128xf32>
    %101 = arith.addf %95, %100 : vector<8x128xf32>
    %102 = vector.extract_strided_slice %52 {offsets = [0, 8, 0], sizes = [8, 1, 96], strides = [1, 1, 1]} : vector<8x12x96xbf16> to vector<8x1x96xbf16>
    %103 = vector.shape_cast %102 : vector<8x1x96xbf16> to vector<8x96xbf16>
    %c8 = arith.constant 8 : index
    %c0_59 = arith.constant 0 : index
    %c0_60 = arith.constant 0 : index
    %104 = vector.load %arg6[%c8, %c0_59, %c0_60] : memref<12x96x128xbf16, #tpu.memory_space<vmem>>, vector<1x96x128xbf16>
    %105 = vector.shape_cast %104 : vector<1x96x128xbf16> to vector<96x128xbf16>
    %cst_61 = arith.constant dense<0.000000e+00> : vector<8x128xf32>
    %106 = tpu.matmul %103, %105, %cst_61 {dimension_numbers = #tpu.dot_dimension_numbers<[1], [0], [0], [1], [0, 0, 1, 1], [], []>} : vector<8x96xbf16>, vector<96x128xbf16>, vector<8x128xf32> -> vector<8x128xf32>
    %107 = arith.addf %101, %106 : vector<8x128xf32>
    %108 = vector.extract_strided_slice %52 {offsets = [0, 9, 0], sizes = [8, 1, 96], strides = [1, 1, 1]} : vector<8x12x96xbf16> to vector<8x1x96xbf16>
    %109 = vector.shape_cast %108 : vector<8x1x96xbf16> to vector<8x96xbf16>
    %c9 = arith.constant 9 : index
    %c0_62 = arith.constant 0 : index
    %c0_63 = arith.constant 0 : index
    %110 = vector.load %arg6[%c9, %c0_62, %c0_63] : memref<12x96x128xbf16, #tpu.memory_space<vmem>>, vector<1x96x128xbf16>
    %111 = vector.shape_cast %110 : vector<1x96x128xbf16> to vector<96x128xbf16>
    %cst_64 = arith.constant dense<0.000000e+00> : vector<8x128xf32>
    %112 = tpu.matmul %109, %111, %cst_64 {dimension_numbers = #tpu.dot_dimension_numbers<[1], [0], [0], [1], [0, 0, 1, 1], [], []>} : vector<8x96xbf16>, vector<96x128xbf16>, vector<8x128xf32> -> vector<8x128xf32>
    %113 = arith.addf %107, %112 : vector<8x128xf32>
    %114 = vector.extract_strided_slice %52 {offsets = [0, 10, 0], sizes = [8, 1, 96], strides = [1, 1, 1]} : vector<8x12x96xbf16> to vector<8x1x96xbf16>
    %115 = vector.shape_cast %114 : vector<8x1x96xbf16> to vector<8x96xbf16>
    %c10 = arith.constant 10 : index
    %c0_65 = arith.constant 0 : index
    %c0_66 = arith.constant 0 : index
    %116 = vector.load %arg6[%c10, %c0_65, %c0_66] : memref<12x96x128xbf16, #tpu.memory_space<vmem>>, vector<1x96x128xbf16>
    %117 = vector.shape_cast %116 : vector<1x96x128xbf16> to vector<96x128xbf16>
    %cst_67 = arith.constant dense<0.000000e+00> : vector<8x128xf32>
    %118 = tpu.matmul %115, %117, %cst_67 {dimension_numbers = #tpu.dot_dimension_numbers<[1], [0], [0], [1], [0, 0, 1, 1], [], []>} : vector<8x96xbf16>, vector<96x128xbf16>, vector<8x128xf32> -> vector<8x128xf32>
    %119 = arith.addf %113, %118 : vector<8x128xf32>
    %120 = vector.extract_strided_slice %52 {offsets = [0, 11, 0], sizes = [8, 1, 96], strides = [1, 1, 1]} : vector<8x12x96xbf16> to vector<8x1x96xbf16>
    %121 = vector.shape_cast %120 : vector<8x1x96xbf16> to vector<8x96xbf16>
    %c11 = arith.constant 11 : index
    %c0_68 = arith.constant 0 : index
    %c0_69 = arith.constant 0 : index
    %122 = vector.load %arg6[%c11, %c0_68, %c0_69] : memref<12x96x128xbf16, #tpu.memory_space<vmem>>, vector<1x96x128xbf16>
    %123 = vector.shape_cast %122 : vector<1x96x128xbf16> to vector<96x128xbf16>
    %cst_70 = arith.constant dense<0.000000e+00> : vector<8x128xf32>
    %124 = tpu.matmul %121, %123, %cst_70 {dimension_numbers = #tpu.dot_dimension_numbers<[1], [0], [0], [1], [0, 0, 1, 1], [], []>} : vector<8x96xbf16>, vector<96x128xbf16>, vector<8x128xf32> -> vector<8x128xf32>
    %125 = arith.addf %119, %124 : vector<8x128xf32>
    %c0_71 = arith.constant 0 : index
    %c0_72 = arith.constant 0 : index
    %126 = vector.load %arg7[%c0_71, %c0_72] : memref<1x128xf32, #tpu.memory_space<vmem>>, vector<1x128xf32>
    %127 = vector.broadcast %126 : vector<1x128xf32> to vector<8x128xf32>
    %128 = arith.addf %125, %127 : vector<8x128xf32>
    %cst_73 = arith.constant 0.000000e+00 : f32
    %129 = vector.broadcast %cst_73 : f32 to vector<8x128xf32>
    %130 = arith.maximumf %128, %129 : vector<8x128xf32>
    %131 = arith.truncf %130 : vector<8x128xf32> to vector<8x128xbf16>
    %c0_74 = arith.constant 0 : index
    %c0_75 = arith.constant 0 : index
    %132 = vector.load %arg8[%c0_74, %c0_75] : memref<128x128xbf16, #tpu.memory_space<vmem>>, vector<128x128xbf16>
    %cst_76 = arith.constant dense<0.000000e+00> : vector<8x128xf32>
    %133 = tpu.matmul %131, %132, %cst_76 {dimension_numbers = #tpu.dot_dimension_numbers<[1], [0], [0], [1], [0, 0, 1, 1], [], []>} : vector<8x128xbf16>, vector<128x128xbf16>, vector<8x128xf32> -> vector<8x128xf32>
    %c0_77 = arith.constant 0 : index
    %c0_78 = arith.constant 0 : index
    %134 = vector.load %arg9[%c0_77, %c0_78] : memref<1x128xf32, #tpu.memory_space<vmem>>, vector<1x128xf32>
    %135 = vector.broadcast %134 : vector<1x128xf32> to vector<8x128xf32>
    %136 = arith.addf %133, %135 : vector<8x128xf32>
    %cst_79 = arith.constant 0.000000e+00 : f32
    %137 = vector.broadcast %cst_79 : f32 to vector<8x128xf32>
    %138 = arith.maximumf %136, %137 : vector<8x128xf32>
    %139 = arith.truncf %138 : vector<8x128xf32> to vector<8x128xbf16>
    %c0_80 = arith.constant 0 : index
    %c0_81 = arith.constant 0 : index
    %140 = vector.load %arg10[%c0_80, %c0_81] : memref<128x128xbf16, #tpu.memory_space<vmem>>, vector<128x128xbf16>
    %cst_82 = arith.constant dense<0.000000e+00> : vector<8x128xf32>
    %141 = tpu.matmul %139, %140, %cst_82 {dimension_numbers = #tpu.dot_dimension_numbers<[1], [0], [0], [1], [0, 0, 1, 1], [], []>} : vector<8x128xbf16>, vector<128x128xbf16>, vector<8x128xf32> -> vector<8x128xf32>
    %c0_83 = arith.constant 0 : index
    %c0_84 = arith.constant 0 : index
    %142 = vector.load %arg11[%c0_83, %c0_84] : memref<1x128xf32, #tpu.memory_space<vmem>>, vector<1x128xf32>
    %143 = vector.broadcast %142 : vector<1x128xf32> to vector<8x128xf32>
    %144 = arith.addf %141, %143 : vector<8x128xf32>
    %c0_85 = arith.constant 0 : index
    %c0_86 = arith.constant 0 : index
    %145 = vector.load %arg12[%c0_85, %c0_86] : memref<8x128xf32, #tpu.memory_space<vmem>>, vector<8x128xf32>
    tpu.vector_store %arg12[%c0_85, %c0_86], %144 {strides = array<i32>} : memref<8x128xf32, #tpu.memory_space<vmem>>, vector<8x128xf32>,
    return
  }
  func.func @transform_0(%arg0: i32) -> (i32, i32, i32) {
    %c0_i32 = arith.constant 0 : i32
    %c0_i32_0 = arith.constant 0 : i32
    %c0_i32_1 = arith.constant 0 : i32
    return %arg0, %c0_i32, %c0_i32_0 : i32, i32, i32
  }
  func.func @transform_1(%arg0: i32) -> (i32, i32, i32) {
    %c0_i32 = arith.constant 0 : i32
    %c0_i32_0 = arith.constant 0 : i32
    %c0_i32_1 = arith.constant 0 : i32
    %c0_i32_2 = arith.constant 0 : i32
    return %c0_i32, %c0_i32_0, %c0_i32_1 : i32, i32, i32
  }
  func.func @transform_2(%arg0: i32) -> (i32, i32) {
    %c0_i32 = arith.constant 0 : i32
    %c0_i32_0 = arith.constant 0 : i32
    %c0_i32_1 = arith.constant 0 : i32
    return %c0_i32, %c0_i32_0 : i32, i32
  }
  func.func @transform_3(%arg0: i32) -> (i32, i32, i32) {
    %c0_i32 = arith.constant 0 : i32
    %c0_i32_0 = arith.constant 0 : i32
    %c0_i32_1 = arith.constant 0 : i32
    %c0_i32_2 = arith.constant 0 : i32
    return %c0_i32, %c0_i32_0, %c0_i32_1 : i32, i32, i32
  }
  func.func @transform_4(%arg0: i32) -> (i32, i32) {
    %c0_i32 = arith.constant 0 : i32
    %c0_i32_0 = arith.constant 0 : i32
    %c0_i32_1 = arith.constant 0 : i32
    return %c0_i32, %c0_i32_0 : i32, i32
  }
  func.func @transform_5(%arg0: i32) -> (i32, i32, i32) {
    %c0_i32 = arith.constant 0 : i32
    %c0_i32_0 = arith.constant 0 : i32
    %c0_i32_1 = arith.constant 0 : i32
    %c0_i32_2 = arith.constant 0 : i32
    return %c0_i32, %c0_i32_0, %c0_i32_1 : i32, i32, i32
  }
  func.func @transform_6(%arg0: i32) -> (i32, i32) {
    %c0_i32 = arith.constant 0 : i32
    %c0_i32_0 = arith.constant 0 : i32
    %c0_i32_1 = arith.constant 0 : i32
    return %c0_i32, %c0_i32_0 : i32, i32
  }
  func.func @transform_7(%arg0: i32) -> (i32, i32) {
    %c0_i32 = arith.constant 0 : i32
    %c0_i32_0 = arith.constant 0 : i32
    %c0_i32_1 = arith.constant 0 : i32
    return %c0_i32, %c0_i32_0 : i32, i32
  }
  func.func @transform_8(%arg0: i32) -> (i32, i32) {
    %c0_i32 = arith.constant 0 : i32
    %c0_i32_0 = arith.constant 0 : i32
    %c0_i32_1 = arith.constant 0 : i32
    return %c0_i32, %c0_i32_0 : i32, i32
  }
  func.func @transform_9(%arg0: i32) -> (i32, i32) {
    %c0_i32 = arith.constant 0 : i32
    %c0_i32_0 = arith.constant 0 : i32
    %c0_i32_1 = arith.constant 0 : i32
    return %c0_i32, %c0_i32_0 : i32, i32
  }
  func.func @transform_10(%arg0: i32) -> (i32, i32) {
    %c0_i32 = arith.constant 0 : i32
    %c0_i32_0 = arith.constant 0 : i32
    %c0_i32_1 = arith.constant 0 : i32
    return %c0_i32, %c0_i32_0 : i32, i32
  }
  func.func @transform_11(%arg0: i32) -> (i32, i32) {
    %c0_i32 = arith.constant 0 : i32
    %c0_i32_0 = arith.constant 0 : i32
    return %arg0, %c0_i32 : i32, i32
  }
}

</mosaic_0001>

<bundles_post_ra>
// kernel: tile.13
= control target key start
LH: loop header
LB: loop body
LE: loop exit
PB: predicated region body
PF: predicated region fallthrough
CT: control target
= control target key end

     0   :  { %s28_s0 = inlined_call_operand.vmem [shape: f32[4], index: 0, kind: input, shape index: {}]   ;;  %s29_s1 = inlined_call_operand.vmem [shape: f32[14,4], index: 1, kind: output, shape index: {}]  }
   0x1   :  { %v4_v0 = vld [vmem:[%s28_s0] ss:$0 sm:$0xff] }
   0x2   :  { %5 = vst [vmem:[%s29_s1] sm:$0xff] %v4_v0  ;;  %8 = vst [vmem:[%s29_s1 + $0x8] sm:$0xff] %v4_v0 }

// kernel: tile.14
= control target key start
LH: loop header
LB: loop body
LE: loop exit
PB: predicated region body
PF: predicated region fallthrough
CT: control target
= control target key end

     0   :  { %s115_s10 = smov 52   ;;  %s116_s11 = smov 44   ;;  %vm3_vm0 = vcmask 31744   ;;  %vm9_vm1 = vcmask 458144   ;;  %vm15_vm2 = vcmask 425344   ;;  %vm21_vm3 = vcmask 392544   ;;  %s183_s0 = inlined_call_operand.vmem [shape: f32[14,4], index: 0, kind: input, shape index: {}]   ;;  %s184_s1 = inlined_call_operand.vmem [shape: f32[1,56], index: 1, kind: output, shape index: {}]  }
   0x1   :  { %v89_v0 = vld [vmem:[%s183_s0 + $0xd] sm:$0x1]   ;;  %v91_v1 = vld [vmem:[%s183_s0 + $0xb] sm:$0x1]   ;;  %v90_v2 = vld [vmem:[%s183_s0 + $0xc] sm:$0x1]  }
   0x2   :  { %7 = vrot.lane.b32.xlu0 %v89_v0, %s115_s10  ;;  %19 = vrot.lane.b32.xlu1 %v91_v1, %s116_s11  ;;  %v92_v3 = vld [vmem:[%s183_s0 + $0xa] sm:$0x1]   ;;  %s117_s16 = smov 48   ;;  %s118_s17 = smov 40   ;;  %v93_v4 = vld [vmem:[%s183_s0 + $0x9] sm:$0x1]  }
   0x3   :  { %v94_v5 = vld [vmem:[%s183_s0 + $0x8] sm:$0x1]   ;;  %v2_v6 = vld [vmem:[%s183_s0] sm:$0x1]   ;;  %s119_s24 = smov 36   ;;  %s120_s25 = smov 32  }
   0x4   :  { %4 = vst.msk [vmem:[#allocation0] sm:$0x1] %vm3_vm0, %v2_v6   ;;  %v95_v7 = vld [vmem:[%s183_s0 + $0x7] sm:$0x1]   ;;  %v96_v8 = vld [vmem:[%s183_s0 + $0x6] sm:$0x1]  }
   0x5   :  { %s121_s30 = smov 28   ;;  %s122_s2 = smov 24   ;;  %v97_v9 = vld [vmem:[%s183_s0 + $0x5] sm:$0x1]   ;;  %v98_v10 = vld [vmem:[%s183_s0 + $0x4] sm:$0x1]  }
   0x6   :  { %13 = vrot.lane.b32.xlu0 %v90_v2, %s117_s16  ;;  %25 = vrot.lane.b32.xlu1 %v92_v3, %s118_s17  ;;  %s123_s7 = smov 20   ;;  %s124_s8 = smov 16   ;;  %v99_v11 = vld [vmem:[%s183_s0 + $0x3] sm:$0x1]   ;;  %v100_v12 = vld [vmem:[%s183_s0 + $0x2] sm:$0x1]  }
   0x7   :  { %s125_s13 = smov 12   ;;  %s126_s14 = smov 8   ;;  %v101_v13 = vld [vmem:[%s183_s0 + $0x1] sm:$0x1]   ;;  %vm27_vm4 = vcmask 359744   ;;  %vm33_vm5 = vcmask 326944  }
   0x8   :  { %s127_s0 = smov 4   ;;  %vm39_vm6 = vcmask 294144   ;;  %vm45_vm7 = vcmask 261344   ;;  %vm51_vm8 = vcmask 228544   ;;  %vm57_vm9 = vcmask 195744  }
   0x9   :  { %vm63_vm10 = vcmask 162944   ;;  %vm69_vm11 = vcmask 130144   ;;  %vm75_vm12 = vcmask 97344   ;;  %vm81_vm13 = vcmask 64544  }
   0xa   :  { %31 = vrot.lane.b32.xlu0 %v93_v4, %s119_s24  ;;  %37 = vrot.lane.b32.xlu1 %v94_v5, %s120_s25 }
   0xe   :  { %43 = vrot.lane.b32.xlu0 %v95_v7, %s121_s30  ;;  %49 = vrot.lane.b32.xlu1 %v96_v8, %s122_s2 }
  0x12   :  { %55 = vrot.lane.b32.xlu0 %v97_v9, %s123_s7  ;;  %61 = vrot.lane.b32.xlu1 %v98_v10, %s124_s8 }
  0x16   :  { %67 = vrot.lane.b32.xlu0 %v99_v11, %s125_s13  ;;  %73 = vrot.lane.b32.xlu1 %v100_v12, %s126_s14 }
  0x1a   :  { %79 = vrot.lane.b32.xlu0 %v101_v13, %s127_s0 }
  0x74   :  { %v8_v14 = vpop.permute.xlu0 %7   ;;  %v20_v15 = vpop.permute.xlu1 %19  }
  0x75   :  { %10 = vst.msk [vmem:[#allocation0] sm:$0x1] %vm9_vm1, %v8_v14  }
  0x78   :  { %v14_v16 = vpop.permute.xlu0 %13   ;;  %v26_v17 = vpop.permute.xlu1 %25  }
  0x79   :  { %16 = vst.msk [vmem:[#allocation0] sm:$0x1] %vm15_vm2, %v14_v16  }
  0x7a   :  { %22 = vst.msk [vmem:[#allocation0] sm:$0x1] %vm21_vm3, %v20_v15  }
  0x7b   :  { %28 = vst.msk [vmem:[#allocation0] sm:$0x1] %vm27_vm4, %v26_v17  }
  0x7c   :  { %v32_v18 = vpop.permute.xlu0 %31   ;;  %v38_v19 = vpop.permute.xlu1 %37  }
  0x7d   :  { %34 = vst.msk [vmem:[#allocation0] sm:$0x1] %vm33_vm5, %v32_v18  }
  0x7e   :  { %40 = vst.msk [vmem:[#allocation0] sm:$0x1] %vm39_vm6, %v38_v19  }
  0x80   :  { %v44_v20 = vpop.permute.xlu0 %43   ;;  %v50_v21 = vpop.permute.xlu1 %49  }
  0x81   :  { %46 = vst.msk [vmem:[#allocation0] sm:$0x1] %vm45_vm7, %v44_v20  }
  0x82   :  { %52 = vst.msk [vmem:[#allocation0] sm:$0x1] %vm51_vm8, %v50_v21  }
  0x84   :  { %v56_v22 = vpop.permute.xlu0 %55   ;;  %v62_v23 = vpop.permute.xlu1 %61  }
  0x85   :  { %58 = vst.msk [vmem:[#allocation0] sm:$0x1] %vm57_vm9, %v56_v22  }
  0x86   :  { %64 = vst.msk [vmem:[#allocation0] sm:$0x1] %vm63_vm10, %v62_v23  }
  0x88   :  { %v68_v24 = vpop.permute.xlu0 %67   ;;  %v74_v25 = vpop.permute.xlu1 %73  }
  0x89   :  { %70 = vst.msk [vmem:[#allocation0] sm:$0x1] %vm69_vm11, %v68_v24  }
  0x8a   :  { %76 = vst.msk [vmem:[#allocation0] sm:$0x1] %vm75_vm12, %v74_v25  }
  0x8c   :  { %v80_v26 = vpop.permute.xlu0 %79  }
  0x8d   :  { %82 = vst.msk [vmem:[#allocation0] sm:$0x1] %vm81_vm13, %v80_v26  }
  0x94   :  { %v86_v27 = vld [vmem:[#allocation0] sm:$0x1] }
  0x95   :  { %88 = vst [vmem:[%s184_s1] sm:$0x1] %v86_v27 }

// kernel: tile.18
= control target key start
LH: loop header
LB: loop body
LE: loop exit
PB: predicated region body
PF: predicated region fallthrough
CT: control target
= control target key end

     0   :  { %s28_s0 = inlined_call_operand.vmem [shape: f32[8], index: 0, kind: input, shape index: {}]   ;;  %s29_s1 = inlined_call_operand.vmem [shape: f32[12,8], index: 1, kind: output, shape index: {}]  }
   0x1   :  { %v4_v0 = vld [vmem:[%s28_s0] ss:$0 sm:$0xff] }
   0x2   :  { %5 = vst [vmem:[%s29_s1] sm:$0xff] %v4_v0  ;;  %8 = vst [vmem:[%s29_s1 + $0x8] sm:$0xff] %v4_v0 }

// kernel: tile.19
= control target key start
LH: loop header
LB: loop body
LE: loop exit
PB: predicated region body
PF: predicated region fallthrough
CT: control target
= control target key end

     0   :  { %s99_s10 = smov 88   ;;  %s100_s11 = smov 72   ;;  %vm3_vm0 = vcmask 64512   ;;  %vm9_vm1 = vcmask 786112   ;;  %vm15_vm2 = vcmask 720512   ;;  %vm21_vm3 = vcmask 654912   ;;  %s159_s0 = inlined_call_operand.vmem [shape: f32[12,8], index: 0, kind: input, shape index: {}]   ;;  %s160_s1 = inlined_call_operand.vmem [shape: f32[1,96], index: 1, kind: output, shape index: {}]  }
   0x1   :  { %v77_v0 = vld [vmem:[%s159_s0 + $0xb] sm:$0x1]   ;;  %v79_v1 = vld [vmem:[%s159_s0 + $0x9] sm:$0x1]   ;;  %v78_v2 = vld [vmem:[%s159_s0 + $0xa] sm:$0x1]  }
   0x2   :  { %7 = vrot.lane.b32.xlu0 %v77_v0, %s99_s10  ;;  %19 = vrot.lane.b32.xlu1 %v79_v1, %s100_s11  ;;  %v80_v3 = vld [vmem:[%s159_s0 + $0x8] sm:$0x1]   ;;  %s101_s16 = smov 80   ;;  %s102_s17 = smov 64   ;;  %v81_v4 = vld [vmem:[%s159_s0 + $0x7] sm:$0x1]  }
   0x3   :  { %v2_v5 = vld [vmem:[%s159_s0] sm:$0x1]   ;;  %v82_v6 = vld [vmem:[%s159_s0 + $0x6] sm:$0x1]   ;;  %s103_s24 = smov 56   ;;  %s104_s25 = smov 48  }
   0x4   :  { %4 = vst.msk [vmem:[#allocation0] sm:$0x1] %vm3_vm0, %v2_v5   ;;  %v83_v7 = vld [vmem:[%s159_s0 + $0x5] sm:$0x1]   ;;  %v84_v8 = vld [vmem:[%s159_s0 + $0x4] sm:$0x1]  }
   0x5   :  { %s105_s30 = smov 40   ;;  %s106_s2 = smov 32   ;;  %v85_v9 = vld [vmem:[%s159_s0 + $0x3] sm:$0x1]   ;;  %v86_v10 = vld [vmem:[%s159_s0 + $0x2] sm:$0x1]  }
   0x6   :  { %13 = vrot.lane.b32.xlu0 %v78_v2, %s101_s16  ;;  %25 = vrot.lane.b32.xlu1 %v80_v3, %s102_s17  ;;  %s107_s7 = smov 24   ;;  %s108_s8 = smov 16   ;;  %v87_v11 = vld [vmem:[%s159_s0 + $0x1] sm:$0x1]   ;;  %vm27_vm4 = vcmask 589312   ;;  %vm33_vm5 = vcmask 523712  }
   0x7   :  { %s109_s0 = smov 8   ;;  %vm39_vm6 = vcmask 458112   ;;  %vm45_vm7 = vcmask 392512   ;;  %vm51_vm8 = vcmask 326912   ;;  %vm57_vm9 = vcmask 261312  }
   0x8   :  { %vm63_vm10 = vcmask 195712   ;;  %vm69_vm11 = vcmask 130112  }
   0xa   :  { %31 = vrot.lane.b32.xlu0 %v81_v4, %s103_s24  ;;  %37 = vrot.lane.b32.xlu1 %v82_v6, %s104_s25 }
   0xe   :  { %43 = vrot.lane.b32.xlu0 %v83_v7, %s105_s30  ;;  %49 = vrot.lane.b32.xlu1 %v84_v8, %s106_s2 }
  0x12   :  { %55 = vrot.lane.b32.xlu0 %v85_v9, %s107_s7  ;;  %61 = vrot.lane.b32.xlu1 %v86_v10, %s108_s8 }
  0x16   :  { %67 = vrot.lane.b32.xlu0 %v87_v11, %s109_s0 }
  0x74   :  { %v8_v12 = vpop.permute.xlu0 %7   ;;  %v20_v13 = vpop.permute.xlu1 %19  }
  0x75   :  { %10 = vst.msk [vmem:[#allocation0] sm:$0x1] %vm9_vm1, %v8_v12  }
  0x78   :  { %v14_v14 = vpop.permute.xlu0 %13   ;;  %v26_v15 = vpop.permute.xlu1 %25  }
  0x79   :  { %16 = vst.msk [vmem:[#allocation0] sm:$0x1] %vm15_vm2, %v14_v14  }
  0x7a   :  { %22 = vst.msk [vmem:[#allocation0] sm:$0x1] %vm21_vm3, %v20_v13  }
  0x7b   :  { %28 = vst.msk [vmem:[#allocation0] sm:$0x1] %vm27_vm4, %v26_v15  }
  0x7c   :  { %v32_v16 = vpop.permute.xlu0 %31   ;;  %v38_v17 = vpop.permute.xlu1 %37  }
  0x7d   :  { %34 = vst.msk [vmem:[#allocation0] sm:$0x1] %vm33_vm5, %v32_v16  }
  0x7e   :  { %40 = vst.msk [vmem:[#allocation0] sm:$0x1] %vm39_vm6, %v38_v17  }
  0x80   :  { %v44_v18 = vpop.permute.xlu0 %43   ;;  %v50_v19 = vpop.permute.xlu1 %49  }
  0x81   :  { %46 = vst.msk [vmem:[#allocation0] sm:$0x1] %vm45_vm7, %v44_v18  }
  0x82   :  { %52 = vst.msk [vmem:[#allocation0] sm:$0x1] %vm51_vm8, %v50_v19  }
  0x84   :  { %v56_v20 = vpop.permute.xlu0 %55   ;;  %v62_v21 = vpop.permute.xlu1 %61  }
  0x85   :  { %58 = vst.msk [vmem:[#allocation0] sm:$0x1] %vm57_vm9, %v56_v20  }
  0x86   :  { %64 = vst.msk [vmem:[#allocation0] sm:$0x1] %vm63_vm10, %v62_v21  }
  0x88   :  { %v68_v22 = vpop.permute.xlu0 %67  }
  0x89   :  { %70 = vst.msk [vmem:[#allocation0] sm:$0x1] %vm69_vm11, %v68_v22  }
  0x90   :  { %v74_v23 = vld [vmem:[#allocation0] sm:$0x1] }
  0x91   :  { %76 = vst [vmem:[%s160_s1] sm:$0x1] %v74_v23 }

// kernel: boixnet_forward.1
= control target key start
LH: loop header
LB: loop body
LE: loop exit
PB: predicated region body
PF: predicated region fallthrough
CT: control target
= control target key end

     0   :  { %v82_v0 = vlaneseq  ;;  %v9884_v1 = vmov 0.0   ;;  %v7500_v3 = vmov 1966171168   ;;  %vm7501_vm0 = vmmov 0   ;;  %s9872_s1 = inlined_call_operand.vmem [shape: bf16[3,48,56], index: 1, kind: input, shape index: {}]   ;;  %s9873_s0 = inlined_call_operand.vmem [shape: bf16[8,16,48], index: 0, kind: input, shape index: {}]   ;;  %s9874_s3 = inlined_call_operand.vmem [shape: bf16[3,56,96], index: 3, kind: input, shape index: {}]   ;;  %s9875_s2 = inlined_call_operand.vmem [shape: f32[1,56], index: 2, kind: input, shape index: {}]   ;;  %s9876_s5 = inlined_call_operand.vmem [shape: bf16[12,96,128], index: 5, kind: input, shape index: {}]   ;;  %s9877_s4 = inlined_call_operand.vmem [shape: f32[1,96], index: 4, kind: input, shape index: {}]   ;;  %s9878_s7 = inlined_call_operand.vmem [shape: bf16[128,128], index: 7, kind: input, shape index: {}]   ;;  %s9879_s9 = inlined_call_operand.vmem [shape: bf16[128,128], index: 9, kind: input, shape index: {}]   ;;  %s9880_s6 = inlined_call_operand.vmem [shape: f32[1,128], index: 6, kind: input, shape index: {}]   ;;  %s9881_s8 = inlined_call_operand.vmem [shape: f32[1,128], index: 8, kind: input, shape index: {}]   ;;  %s9882_s10 = inlined_call_operand.vmem [shape: f32[1,128], index: 10, kind: input, shape index: {}]   ;;  %s9883_s11 = inlined_call_operand.vmem [shape: f32[8,128], index: 11, kind: output, shape index: {}]  }
   0x1   :  { %6965 = vmatprep.subr.bf16.mxu0 %v9884_v1  ;;  %v7390_v2 = vld [vmem:[%s9872_s1 + $0x18] sm:$0xff]   ;;  %6999 = vmatprep.subr.bf16.mxu1 %v9884_v1  ;;  %v80_v4 = vunpack.c.l.s4 %v7500_v3  ;;  %v7391_v5 = vld [vmem:[%s9872_s1] sm:$0xff]   ;;  %v7393_v9 = vld [vmem:[%s9872_s1 + $0x8] sm:$0xff]   ;;  %vm461_vm1 = vsmask.f32 256 }
   0x2   :  { %6971 = vmatprep.mubr.msk.bf16.mxu0 %vm7501_vm0, %v9884_v1  ;;  %7005 = vmatprep.mubr.msk.bf16.mxu1 %vm7501_vm0, %v9884_v1  ;;  %v7575_v6 = vshrl.u32 %v82_v0, 7  ;;  %v7392_v7 = vld [vmem:[%s9872_s1 + $0x20] sm:$0xff]   ;;  %v7394_v10 = vld [vmem:[%s9872_s1 + $0x28] sm:$0xff]   ;;  %v7395_v12 = vld [vmem:[%s9872_s1 + $0x10] sm:$0xff]   ;;  %vm462_vm2 = vsmask.f32 1284 }
   0x3   :  { %6966 = vmatpush3.bf16.msra.mxu0 %v7390_v2  ;;  %v81_v8 = vunpack.c.0.s8 %v80_v4  ;;  %7000 = vmatpush3.bf16.msra.mxu1 %v7391_v5  ;;  %v6323_v13 = vld.sshfl [vmem:[%s9873_s0] sm:$0x33 pattern:$0x75316420]  ;;  %vm463_vm3 = vmor %vm461_vm1, %vm462_vm2  ;;  %vm464_vm4 = vsmask.f32 2312 }
   0x4   :  { %9918 = vst [vmem:[#allocation2_spill] sm:$0xff] %v7575_v6  ;;  %6967 = vmatprep.subr.bf16.mxu0 %v9884_v1  ;;  %7001 = vmatprep.subr.bf16.mxu1 %v9884_v1  ;;  %v6324_v14 = vld.sshfl [vmem:[%s9873_s0 + $0x4] sm:$0x33 pattern:$0x75316420]  ;;  %v78_v15 = vcombine.high %v6323_v13, %v6323_v13  ;;  %vm465_vm5 = vmor %vm463_vm3, %vm464_vm4  ;;  %vm1300_vm1 = vcmask 392192  }
   0x5   :  { %v7589_v11 = vsub.s32 %v81_v8, %v7575_v6  ;;  %v6325_v17 = vld.sshfl [vmem:[%s9873_s0 + $0x8] sm:$0x33 pattern:$0x75316420]  ;;  %v102_v18 = vcombine.high %v6324_v14, %v6324_v14  ;;  %vm466_vm6 = vsmask.f32 3340 }
   0x6   :  { %v125_v22 = vcombine.high %v6325_v17, %v6325_v17  ;;  %vm468_vm7 = vsmask.f32 4368  ;;  %vm467_vm8 = vmor %vm465_vm5, %vm466_vm6  ;;  %vm470_vm9 = vsmask.f32 5396  ;;  %vm472_vm10 = vsmask.f32 6424 }
   0x7   :  { %6968 = vmatpush3.bf16.msra.mxu0 %v7392_v7  ;;  %7002 = vmatpush3.bf16.msra.mxu1 %v7393_v9  ;;  %v7602_v16 = vrot.slane %v6323_v13, %v7589_v11  ;;  %v7609_v19 = vrot.slane %v6324_v14, %v7589_v11  ;;  %v7612_v20 = vrot.slane %v78_v15, %v7589_v11  ;;  %vm469_vm11 = vmor %vm467_vm8, %vm468_vm7  ;;  %vm474_vm12 = vsmask.f32 7452  ;;  %v6326_v0 = vld.sshfl [vmem:[%s9873_s0 + $0xc] sm:$0x33 pattern:$0x75316420] }
   0x8   :  { %6969 = vmatprep.subr.bf16.mxu0 %v9884_v1  ;;  %7003 = vmatprep.subr.bf16.mxu1 %v9884_v1  ;;  %v7619_v23 = vrot.slane %v6325_v17, %v7589_v11  ;;  %v7622_v24 = vrot.slane %v102_v18, %v7589_v11  ;;  %v7634_v27 = vrot.slane %v125_v22, %v7589_v11  ;;  %vm471_vm13 = vmor %vm469_vm11, %vm470_vm9  ;;  %v6327_v7 = vld.sshfl [vmem:[%s9873_s0 + $0x10] sm:$0x33 pattern:$0x75316420]  ;;  %vm3507_vm2 = vcmask 1043456  }
   0x9   :  { %v7616_v21 = vcombine.high %v7602_v16, %v7602_v16  ;;  %v7626_v25 = vcombine.high %v7609_v19, %v7609_v19  ;;  %v7631_v26 = vcombine.high %v7612_v20, %v7612_v20  ;;  %v477_v29 = vshrl.u32 %v7602_v16, 16  ;;  %vm473_vm14 = vmor %vm471_vm13, %vm472_vm10 }
   0xa   :  { %v7638_v28 = vcombine.high %v7622_v24, %v7622_v24  ;;  %v482_v30 = vshll.u32 %v7612_v20, 16  ;;  %v485_v31 = vshrl.u32 %v7612_v20, 16  ;;  %v506_v36 = vshll.u32 %v7609_v19, 16  ;;  %vm7650_vm15 = vmor %vm473_vm14, %vm474_vm12 }
   0xb   :  { %6970 = vmatpush3.bf16.msra.mxu0 %v7394_v10  ;;  %7004 = vmatpush3.bf16.msra.mxu1 %v7395_v12  ;;  %v490_v32 = vshll.u32 %v7616_v21, 16  ;;  %v493_v33 = vshrl.u32 %v7616_v21, 16  ;;  %v498_v34 = vshll.u32 %v7631_v26, 16  ;;  %v501_v35 = vshrl.u32 %v7631_v26, 16 }
   0xc   :  { %7033 = vmatprep.subr.bf16.mxu0 %v9884_v1  ;;  %v509_v37 = vshrl.u32 %v7609_v19, 16  ;;  %v514_v38 = vshll.u32 %v7622_v24, 16  ;;  %v517_v40 = vshrl.u32 %v7622_v24, 16  ;;  %v522_v41 = vshll.u32 %v7626_v25, 16 }
   0xd   :  { %v525_v42 = vshrl.u32 %v7626_v25, 16  ;;  %v530_v43 = vshll.u32 %v7638_v28, 16  ;;  %v484_v44 = vsel %vm7650_vm15, %v477_v29, %v482_v30  ;;  %v492_v45 = vsel %vm7650_vm15, %v485_v31, %v490_v32 }
   0xe   :  { %v500_v46 = vsel %vm7650_vm15, %v493_v33, %v498_v34  ;;  %v508_v47 = vsel %vm7650_vm15, %v501_v35, %v506_v36  ;;  %v516_v48 = vsel %vm7650_vm15, %v509_v37, %v514_v38  ;;  %v524_v49 = vsel %vm7650_vm15, %v517_v40, %v522_v41 }
   0xf   :  { %v532_v50 = vsel %vm7650_vm15, %v525_v42, %v530_v43  ;;  %v534_v51 = vshrl.u32 %v7619_v23, 16  ;;  %v539_v52 = vshll.u32 %v7634_v27, 16  ;;  %v939_v53 = vcombine.low %v484_v44, %v492_v45  ;;  %v7396_v43 = vld [vmem:[%s9872_s1 + $0x30] sm:$0xff]  }
  0x10   :  { %v940_v54 = vcombine.low %v500_v46, %v508_v47  ;;  %v941_v55 = vcombine.low %v516_v48, %v524_v49  ;;  %v1411_v57 = vcombine.low %v7602_v16, %v7612_v20  ;;  %v6411_v58 = vcombine.high %v7602_v16, %v7612_v20 }
  0x11   :  { %v1413_v59 = vcombine.low %v7609_v19, %v7622_v24  ;;  %v541_v60 = vsel %vm7650_vm15, %v534_v51, %v539_v52  ;;  %v949_v61 = vrot.slane %v939_v53, %v7589_v11  ;;  %v1414_v3 = vcombine.low %v7626_v25, %v7619_v23 }
  0x12   :  { %v956_v62 = vrot.slane %v940_v54, %v7589_v11  ;;  %v963_v63 = vrot.slane %v941_v55, %v7589_v11  ;;  %v942_v2 = vcombine.low %v532_v50, %v541_v60  ;;  %v1421_v4 = vrot.slane %v1411_v57, %v7589_v11 }
  0x13   :  { %v1428_v5 = vrot.slane %v6411_v58, %v7589_v11  ;;  %v1435_v9 = vrot.slane %v1413_v59, %v7589_v11  ;;  %v7700_v10 = vcombine.high %v7619_v23, %v7619_v23  ;;  %v7704_v12 = vcombine.high %v7634_v27, %v7634_v27 }
  0x14   :  { %v971_v8 = vcombine.low %v949_v61, %v956_v62  ;;  %v970_v13 = vrot.slane %v942_v2, %v7589_v11  ;;  %v1442_v14 = vrot.slane %v1414_v3, %v7589_v11  ;;  %v149_v16 = vcombine.high %v6326_v0, %v6326_v0  ;;  %v7397_v2 = vld [vmem:[%s9872_s1 + $0x38] sm:$0xff]  }
  0x15   :  { %v1443_v15 = vcombine.low %v1421_v4, %v1428_v5  ;;  %v7710_v18 = vrot.slane %v6326_v0, %v7589_v11  ;;  %v172_v22 = vcombine.high %v6327_v7, %v6327_v7  ;;  %v7713_v29 = vrot.slane %v6327_v7, %v7589_v11 }
  0x16   :  { %v979_v17 = vrot.slane %v971_v8, %v7589_v11  ;;  %v972_v30 = vcombine.low %v963_v63, %v970_v13  ;;  %v1444_v31 = vcombine.low %v1435_v9, %v1442_v14  ;;  %v7717_v33 = vrot.slane %v149_v16, %v7589_v11 }
  0x17   :  { %v1451_v32 = vrot.slane %v1443_v15, %v7589_v11  ;;  %v164_v34 = vcombine.high %v7710_v18, %v7710_v18  ;;  %v7722_v35 = vrot.slane %v172_v22, %v7589_v11  ;;  %v7726_v36 = vcombine.high %v7713_v29, %v7713_v29 }
  0x18   :  { %v542_v37 = vshrl.u32 %v7634_v27, 16  ;;  %v986_v38 = vrot.slane %v972_v30, %v7589_v11  ;;  %v1458_v40 = vrot.slane %v1444_v31, %v7589_v11  ;;  %v454_v41 = vcombine.high %v7717_v33, %v7717_v33  ;;  %v6328_v30 = vld.sshfl [vmem:[%s9873_s0 + $0x14] sm:$0x33 pattern:$0x75316420] }
  0x19   :  { %v547_v42 = vshll.u32 %v7700_v10, 16  ;;  %v550_v44 = vshrl.u32 %v7700_v10, 16  ;;  %v555_v45 = vshll.u32 %v7704_v12, 16  ;;  %v558_v46 = vshrl.u32 %v7704_v12, 16 }
  0x1a   :  { %v563_v47 = vshll.u32 %v7710_v18, 16  ;;  %v987_v48 = vcombine.low %v979_v17, %v986_v38  ;;  %v1459_v49 = vcombine.low %v1451_v32, %v1458_v40  ;;  %v566_v51 = vshrl.u32 %v7710_v18, 16  ;;  %v6329_v38 = vld.sshfl [vmem:[%s9873_s0 + $0x18] sm:$0x33 pattern:$0x75316420] }
  0x1b   :  { %v549_v50 = vsel %vm7650_vm15, %v542_v37, %v547_v42  ;;  %v557_v52 = vsel %vm7650_vm15, %v550_v44, %v555_v45  ;;  %v571_v54 = vshll.u32 %v7717_v33, 16  ;;  %v574_v55 = vshrl.u32 %v7717_v33, 16 }
  0x1c   :  { %v565_v53 = vsel %vm7650_vm15, %v558_v46, %v563_v47  ;;  %6972 = vmatmul.mubr.msk.bf16.vlgmr.msra.gmra.mrb[0].mxu0 %vm1300_vm1, %v987_v48  ;;  %7006 = vmatmul.mubr.msk.bf16.vlgmr.msra.gmra.mrb[0].mxu1 %vm1300_vm1, %v1459_v49  ;;  %v579_v57 = vshll.u32 %v164_v34, 16  ;;  %v582_v58 = vshrl.u32 %v164_v34, 16  ;;  %v587_v59 = vshll.u32 %v454_v41, 16 }
  0x1d   :  { %v591_v60 = vshrl.u32 %v7713_v29, 16  ;;  %7034 = vmatpush3.bf16.msra.mxu0 %v7396_v43  ;;  %6975 = vmatprep.mubr.msk.bf16.mxu0 %vm7501_vm0, %v9884_v1  ;;  %v573_v61 = vsel %vm7650_vm15, %v566_v51, %v571_v54  ;;  %v596_v62 = vshll.u32 %v7722_v35, 16  ;;  %v599_v63 = vshrl.u32 %v7722_v35, 16 }
  0x1e   :  { %v604_v0 = vshll.u32 %v7726_v36, 16  ;;  %7009 = vmatprep.mubr.msk.bf16.mxu1 %vm7501_vm0, %v9884_v1  ;;  %v581_v3 = vsel %vm7650_vm15, %v574_v55, %v579_v57  ;;  %v589_v4 = vsel %vm7650_vm15, %v582_v58, %v587_v59  ;;  %v988_v5 = vcombine.low %v549_v50, %v557_v52  ;;  %7035 = vmatprep.subr.bf16.mxu0 %v9884_v1 }
  0x1f   :  { %v989_v7 = vcombine.low %v565_v53, %v573_v61  ;;  %v598_v8 = vsel %vm7650_vm15, %v591_v60, %v596_v62  ;;  %v990_v13 = vcombine.low %v581_v3, %v589_v4  ;;  %v1460_v14 = vcombine.low %v7634_v27, %v7700_v10 }
  0x20   :  { %v606_v9 = vsel %vm7650_vm15, %v599_v63, %v604_v0  ;;  %v998_v16 = vrot.slane %v988_v5, %v7589_v11  ;;  %v1461_v22 = vcombine.low %v7704_v12, %v7710_v18  ;;  %v1462_v32 = vcombine.low %v7717_v33, %v164_v34  ;;  %v7398_v12 = vld [vmem:[%s9872_s1 + $0x40] sm:$0xff]  }
  0x21   :  { %v991_v15 = vcombine.low %v598_v8, %v606_v9  ;;  %v1005_v17 = vrot.slane %v989_v7, %v7589_v11  ;;  %v1012_v31 = vrot.slane %v990_v13, %v7589_v11  ;;  %v1463_v10 = vcombine.low %v7713_v29, %v7722_v35  ;;  %7036 = vmatpush3.bf16.msra.mxu0 %v7397_v2 }
  0x22   :  { %v1470_v37 = vrot.slane %v1460_v14, %v7589_v11  ;;  %v1477_v42 = vrot.slane %v1461_v22, %v7589_v11  ;;  %v7798_v34 = vcombine.high %v7722_v35, %v7722_v35  ;;  %7037 = vmatprep.subr.bf16.mxu0 %v9884_v1  ;;  %v1484_v43 = vrot.slane %v1462_v32, %v7589_v11 }
  0x23   :  { %v1019_v40 = vrot.slane %v991_v15, %v7589_v11  ;;  %v1020_v41 = vcombine.low %v998_v16, %v1005_v17  ;;  %v1491_v44 = vrot.slane %v1463_v10, %v7589_v11  ;;  %v196_v45 = vcombine.high %v6328_v30, %v6328_v30 }
  0x24   :  { %v7804_v46 = vrot.slane %v6328_v30, %v7589_v11  ;;  %v1492_v49 = vcombine.low %v1470_v37, %v1477_v42  ;;  %v219_v50 = vcombine.high %v6329_v38, %v6329_v38  ;;  %v7815_v54 = vrot.slane %v6329_v38, %v7589_v11 }
  0x25   :  { %v1021_v47 = vcombine.low %v1012_v31, %v1019_v40  ;;  %v1028_v48 = vrot.slane %v1020_v41, %v7589_v11  ;;  %v1493_v51 = vcombine.low %v1484_v43, %v1491_v44  ;;  %v7808_v52 = vrot.slane %v196_v45, %v7589_v11  ;;  %7038 = vmatpush3.bf16.msra.mxu0 %v7398_v12 }
  0x26   :  { %v7812_v53 = vcombine.high %v7804_v46, %v7804_v46  ;;  %v1500_v57 = vrot.slane %v1492_v49, %v7589_v11  ;;  %v7820_v58 = vrot.slane %v219_v50, %v7589_v11  ;;  %v607_v59 = vshrl.u32 %v7726_v36, 16  ;;  %7127 = vmatprep.subr.bf16.mxu0 %v9884_v1 }
  0x27   :  { %v1035_v55 = vrot.slane %v1021_v47, %v7589_v11  ;;  %v1507_v60 = vrot.slane %v1493_v51, %v7589_v11  ;;  %v234_v61 = vcombine.high %v7815_v54, %v7815_v54  ;;  %v7829_v62 = vcombine.high %v7808_v52, %v7808_v52 }
  0x28   :  { %v612_v63 = vshll.u32 %v7798_v34, 16  ;;  %v7834_v2 = vcombine.high %v7820_v58, %v7820_v58  ;;  %v615_v3 = vshrl.u32 %v7798_v34, 16  ;;  %v620_v4 = vshll.u32 %v7804_v46, 16 }
  0x29   :  { %v1036_v0 = vcombine.low %v1028_v48, %v1035_v55  ;;  %v1508_v5 = vcombine.low %v1500_v57, %v1507_v60  ;;  %v623_v8 = vshrl.u32 %v7804_v46, 16  ;;  %v628_v9 = vshll.u32 %v7808_v52, 16  ;;  %v6330_v48 = vld.sshfl [vmem:[%s9873_s0 + $0x1c] sm:$0x33 pattern:$0x75316420] }
  0x2a   :  { %v614_v7 = vsel %vm7650_vm15, %v607_v59, %v612_v63  ;;  %v622_v13 = vsel %vm7650_vm15, %v615_v3, %v620_v4  ;;  %v631_v14 = vshrl.u32 %v7808_v52, 16  ;;  %v636_v15 = vshll.u32 %v7812_v53, 16  ;;  %v6331_v63 = vld.sshfl [vmem:[%s9873_s0 + $0x20] sm:$0x33 pattern:$0x75316420] }
  0x2b   :  { %6976 = vmatmul.mubr.msk.bf16.gmra.mrb[4].mxu0 %vm1300_vm1, %v1036_v0  ;;  %v639_v16 = vshrl.u32 %v7812_v53, 16  ;;  %7010 = vmatmul.mubr.msk.bf16.gmra.mrb[4].mxu1 %vm1300_vm1, %v1508_v5  ;;  %v630_v17 = vsel %vm7650_vm15, %v623_v8, %v628_v9  ;;  %v644_v22 = vshll.u32 %v7829_v62, 16  ;;  %v648_v30 = vshrl.u32 %v7815_v54, 16 }
  0x2c   :  { %6979 = vmatprep.mubr.msk.bf16.mxu0 %vm7501_vm0, %v9884_v1  ;;  %v653_v31 = vshll.u32 %v7820_v58, 16  ;;  %7013 = vmatprep.mubr.msk.bf16.mxu1 %vm7501_vm0, %v9884_v1  ;;  %v638_v32 = vsel %vm7650_vm15, %v631_v14, %v636_v15  ;;  %v656_v10 = vshrl.u32 %v7820_v58, 16  ;;  %v661_v37 = vshll.u32 %v234_v61, 16 }
  0x2d   :  { %v664_v38 = vshrl.u32 %v234_v61, 16  ;;  %v646_v12 = vsel %vm7650_vm15, %v639_v16, %v644_v22  ;;  %v669_v41 = vshll.u32 %v7834_v2, 16  ;;  %v1037_v42 = vcombine.low %v614_v7, %v622_v13 }
  0x2e   :  { %v655_v40 = vsel %vm7650_vm15, %v648_v30, %v653_v31  ;;  %v663_v43 = vsel %vm7650_vm15, %v656_v10, %v661_v37  ;;  %v1038_v44 = vcombine.low %v630_v17, %v638_v32  ;;  %v6412_v47 = vcombine.high %v7713_v29, %v7722_v35 }
  0x2f   :  { %v1039_v45 = vcombine.low %v646_v12, %v655_v40  ;;  %v671_v49 = vsel %vm7650_vm15, %v664_v38, %v669_v41  ;;  %v1047_v50 = vrot.slane %v1037_v42, %v7589_v11  ;;  %v1510_v51 = vcombine.low %v7804_v46, %v7808_v52 }
  0x30   :  { %v1511_v55 = vcombine.low %v7812_v53, %v7815_v54  ;;  %v1040_v57 = vcombine.low %v663_v43, %v671_v49  ;;  %v1054_v59 = vrot.slane %v1038_v44, %v7589_v11  ;;  %v1512_v60 = vcombine.low %v7820_v58, %v234_v61  ;;  %v7894_v61 = vld.sshfl [vmem:[%s9873_s0 + $0x24] sm:$0x33 pattern:$0x75316420] }
  0x31   :  { %v1061_v29 = vrot.slane %v1039_v45, %v7589_v11  ;;  %v1519_v0 = vrot.slane %v6412_v47, %v7589_v11  ;;  %v1526_v3 = vrot.slane %v1510_v51, %v7589_v11  ;;  %v243_v5 = vcombine.high %v6330_v48, %v6330_v48 }
  0x32   :  { %v1533_v4 = vrot.slane %v1511_v55, %v7589_v11  ;;  %v1068_v7 = vrot.slane %v1040_v57, %v7589_v11  ;;  %v1069_v8 = vcombine.low %v1047_v50, %v1054_v59  ;;  %v1540_v9 = vrot.slane %v1512_v60, %v7589_v11 }
  0x33   :  { %v7897_v13 = vrot.slane %v6330_v48, %v7589_v11  ;;  %v1541_v14 = vcombine.low %v1519_v0, %v1526_v3  ;;  %v7900_v15 = vrot.slane %v243_v5, %v7589_v11  ;;  %v266_v16 = vcombine.high %v6331_v63, %v6331_v63 }
  0x34   :  { %v273_v17 = vrot.slane %v6331_v63, %v7589_v11  ;;  %v1070_v22 = vcombine.low %v1061_v29, %v1068_v7  ;;  %v1077_v30 = vrot.slane %v1069_v8, %v7589_v11  ;;  %v1542_v31 = vcombine.low %v1533_v4, %v1540_v9 }
  0x35   :  { %9921 = vst [vmem:[#allocation3_spill] sm:$0xff] %v7897_v13  ;;  %9922 = vst [vmem:[#allocation4_spill] sm:$0xff] %v7900_v15  ;;  %v258_v32 = vcombine.high %v7897_v13, %v7897_v13  ;;  %v1549_v10 = vrot.slane %v1541_v14, %v7589_v11  ;;  %v7908_v37 = vrot.slane %v266_v16, %v7589_v11  ;;  %v672_v43 = vshrl.u32 %v7834_v2, 16 }
  0x36   :  { %v7910_v38 = vcombine.high %v273_v17, %v273_v17  ;;  %v7914_v12 = vrot.slane %v7894_v61, %v7589_v11  ;;  %v1084_v40 = vrot.slane %v1070_v22, %v7589_v11  ;;  %v1556_v41 = vrot.slane %v1542_v31, %v7589_v11 }
  0x37   :  { %v456_v42 = vcombine.high %v7900_v15, %v7900_v15  ;;  %v7923_v44 = vcombine.high %v7908_v37, %v7908_v37  ;;  %v677_v45 = vshll.u32 %v7897_v13, 16  ;;  %v680_v47 = vshrl.u32 %v7897_v13, 16 }
  0x38   :  { %v685_v48 = vshll.u32 %v7900_v15, 16  ;;  %v1085_v49 = vcombine.low %v1077_v30, %v1084_v40  ;;  %v1557_v50 = vcombine.low %v1549_v10, %v1556_v41  ;;  %v688_v51 = vshrl.u32 %v7900_v15, 16 }
  0x39   :  { %v693_v55 = vshll.u32 %v258_v32, 16  ;;  %v679_v57 = vsel %vm7650_vm15, %v672_v43, %v677_v45  ;;  %v696_v29 = vshrl.u32 %v258_v32, 16  ;;  %v701_v60 = vshll.u32 %v456_v42, 16 }
  0x3a   :  { %v687_v59 = vsel %vm7650_vm15, %v680_v47, %v685_v48  ;;  %6980 = vmatmul.mubr.msk.bf16.gmra.mrb[8].mxu0 %vm1300_vm1, %v1085_v49  ;;  %7014 = vmatmul.mubr.msk.bf16.gmra.mrb[8].mxu1 %vm1300_vm1, %v1557_v50  ;;  %v705_v0 = vshrl.u32 %v273_v17, 16  ;;  %v710_v3 = vshll.u32 %v7908_v37, 16  ;;  %v713_v4 = vshrl.u32 %v7908_v37, 16 }
  0x3b   :  { %v695_v63 = vsel %vm7650_vm15, %v688_v51, %v693_v55  ;;  %6983 = vmatprep.mubr.msk.bf16.mxu0 %vm7501_vm0, %v9884_v1  ;;  %7017 = vmatprep.mubr.msk.bf16.mxu1 %vm7501_vm0, %v9884_v1  ;;  %v703_v5 = vsel %vm7650_vm15, %v696_v29, %v701_v60  ;;  %v718_v7 = vshll.u32 %v7910_v38, 16  ;;  %v721_v8 = vshrl.u32 %v7910_v38, 16  ;;  %v6333_v55 = vld.sshfl [vmem:[%s9873_s0 + $0x28] sm:$0x33 pattern:$0x75316420] }
  0x3c   :  { %v726_v9 = vshll.u32 %v7923_v44, 16  ;;  %v712_v14 = vsel %vm7650_vm15, %v705_v0, %v710_v3  ;;  %v729_v16 = vshrl.u32 %v7923_v44, 16  ;;  %v734_v22 = vshll.u32 %v7914_v12, 16 }
  0x3d   :  { %v1086_v30 = vcombine.low %v679_v57, %v687_v59  ;;  %v720_v31 = vsel %vm7650_vm15, %v713_v4, %v718_v7  ;;  %v1087_v40 = vcombine.low %v695_v63, %v703_v5  ;;  %v1558_v41 = vcombine.low %v7834_v2, %v7897_v13  ;;  %v6334_v0 = vld.sshfl [vmem:[%s9873_s0 + $0x2c] sm:$0x33 pattern:$0x75316420] }
  0x3e   :  { %v728_v10 = vsel %vm7650_vm15, %v721_v8, %v726_v9  ;;  %v736_v42 = vsel %vm7650_vm15, %v729_v16, %v734_v22  ;;  %v1088_v43 = vcombine.low %v712_v14, %v720_v31  ;;  %v1559_v47 = vcombine.low %v7900_v15, %v258_v32 }
  0x3f   :  { %v1096_v45 = vrot.slane %v1086_v30, %v7589_v11  ;;  %v1089_v48 = vcombine.low %v728_v10, %v736_v42  ;;  %v1103_v49 = vrot.slane %v1087_v40, %v7589_v11  ;;  %v1560_v50 = vcombine.low %v273_v17, %v7908_v37 }
  0x40   :  { %v6413_v51 = vcombine.high %v273_v17, %v7908_v37  ;;  %v1110_v2 = vrot.slane %v1088_v43, %v7589_v11  ;;  %v1568_v57 = vrot.slane %v1558_v41, %v7589_v11  ;;  %v1575_v59 = vrot.slane %v1559_v47, %v7589_v11 }
  0x41   :  { %v290_v32 = vcombine.high %v7894_v61, %v7894_v61  ;;  %v1117_v29 = vrot.slane %v1089_v48, %v7589_v11  ;;  %v1118_v60 = vcombine.low %v1096_v45, %v1103_v49  ;;  %v1582_v63 = vrot.slane %v1560_v50, %v7589_v11 }
  0x42   :  { %v1589_v17 = vrot.slane %v6413_v51, %v7589_v11  ;;  %v1590_v3 = vcombine.low %v1568_v57, %v1575_v59  ;;  %v7984_v5 = vcombine.high %v7914_v12, %v7914_v12  ;;  %v313_v61 = vcombine.high %v6333_v55, %v6333_v55 }
  0x43   :  { %v7980_v4 = vrot.slane %v290_v32, %v7589_v11  ;;  %v1119_v7 = vcombine.low %v1110_v2, %v1117_v29  ;;  %v1126_v8 = vrot.slane %v1118_v60, %v7589_v11  ;;  %v7988_v14 = vrot.slane %v6333_v55, %v7589_v11 }
  0x44   :  { %v1591_v9 = vcombine.low %v1582_v63, %v1589_v17  ;;  %v1598_v16 = vrot.slane %v1590_v3, %v7589_v11  ;;  %v7992_v22 = vrot.slane %v313_v61, %v7589_v11  ;;  %v337_v30 = vcombine.high %v6334_v0, %v6334_v0 }
  0x45   :  { %v7995_v31 = vrot.slane %v6334_v0, %v7589_v11  ;;  %v1133_v10 = vrot.slane %v1119_v7, %v7589_v11  ;;  %v328_v41 = vcombine.high %v7988_v14, %v7988_v14  ;;  %v8003_v42 = vcombine.high %v7980_v4, %v7980_v4 }
  0x46   :  { %v1605_v40 = vrot.slane %v1591_v9, %v7589_v11  ;;  %v329_v43 = vcombine.high %v7992_v22, %v7992_v22  ;;  %v8008_v45 = vrot.slane %v337_v30, %v7589_v11  ;;  %v737_v47 = vshrl.u32 %v7914_v12, 16 }
  0x47   :  { %v742_v48 = vshll.u32 %v7980_v4, 16  ;;  %v1134_v49 = vcombine.low %v1126_v8, %v1133_v10  ;;  %v745_v51 = vshrl.u32 %v7980_v4, 16  ;;  %v750_v55 = vshll.u32 %v7984_v5, 16 }
  0x48   :  { %v1606_v50 = vcombine.low %v1598_v16, %v1605_v40  ;;  %v753_v57 = vshrl.u32 %v7984_v5, 16  ;;  %v758_v59 = vshll.u32 %v8003_v42, 16  ;;  %v762_v32 = vshrl.u32 %v7988_v14, 16 }
  0x49   :  { %v744_v2 = vsel %vm7650_vm15, %v737_v47, %v742_v48  ;;  %6984 = vmatmul.mubr.msk.bf16.gmra.mrb[12].mxu0 %vm1300_vm1, %v1134_v49  ;;  %v752_v29 = vsel %vm7650_vm15, %v745_v51, %v750_v55  ;;  %v767_v60 = vshll.u32 %v7992_v22, 16  ;;  %v770_v63 = vshrl.u32 %v7992_v22, 16 }
  0x4a   :  { %7018 = vmatmul.mubr.msk.bf16.gmra.mrb[12].mxu1 %vm1300_vm1, %v1606_v50  ;;  %v775_v17 = vshll.u32 %v328_v41, 16  ;;  %6987 = vmatprep.mubr.msk.bf16.mxu0 %vm7501_vm0, %v9884_v1  ;;  %v760_v0 = vsel %vm7650_vm15, %v753_v57, %v758_v59  ;;  %v778_v3 = vshrl.u32 %v328_v41, 16  ;;  %v783_v61 = vshll.u32 %v329_v43, 16 }
  0x4b   :  { %7021 = vmatprep.mubr.msk.bf16.mxu1 %vm7501_vm0, %v9884_v1  ;;  %v786_v7 = vshrl.u32 %v329_v43, 16  ;;  %v769_v8 = vsel %vm7650_vm15, %v762_v32, %v767_v60  ;;  %v791_v16 = vshll.u32 %v7995_v31, 16  ;;  %v794_v30 = vshrl.u32 %v7995_v31, 16 }
  0x4c   :  { %v777_v9 = vsel %vm7650_vm15, %v770_v63, %v775_v17  ;;  %v785_v10 = vsel %vm7650_vm15, %v778_v3, %v783_v61  ;;  %v799_v40 = vshll.u32 %v8008_v45, 16  ;;  %v1135_v47 = vcombine.low %v744_v2, %v752_v29  ;;  %v6335_v29 = vld.sshfl [vmem:[%s9873_s0 + $0x30] sm:$0x33 pattern:$0x75316420] }
  0x4d   :  { %v1136_v48 = vcombine.low %v760_v0, %v769_v8  ;;  %v793_v49 = vsel %vm7650_vm15, %v786_v7, %v791_v16  ;;  %v1137_v50 = vcombine.low %v777_v9, %v785_v10  ;;  %v1607_v51 = vcombine.low %v7914_v12, %v7980_v4  ;;  %v6336_v3 = vld.sshfl [vmem:[%s9873_s0 + $0x34] sm:$0x33 pattern:$0x75316420] }
  0x4e   :  { %v1608_v55 = vcombine.low %v7984_v5, %v7988_v14  ;;  %v801_v57 = vsel %vm7650_vm15, %v794_v30, %v799_v40  ;;  %v1145_v59 = vrot.slane %v1135_v47, %v7589_v11  ;;  %v1609_v2 = vcombine.low %v7992_v22, %v328_v41 }
  0x4f   :  { %v1152_v32 = vrot.slane %v1136_v48, %v7589_v11  ;;  %v1138_v60 = vcombine.low %v793_v49, %v801_v57  ;;  %v1159_v63 = vrot.slane %v1137_v50, %v7589_v11  ;;  %v1610_v17 = vcombine.low %v329_v43, %v7995_v31 }
  0x50   :  { %v1617_v0 = vrot.slane %v1607_v51, %v7589_v11  ;;  %v1624_v7 = vrot.slane %v1608_v55, %v7589_v11  ;;  %v1631_v41 = vrot.slane %v1609_v2, %v7589_v11  ;;  %v8064_v8 = vcombine.high %v7995_v31, %v7995_v31 }
  0x51   :  { %v1167_v61 = vcombine.low %v1145_v59, %v1152_v32  ;;  %v1166_v9 = vrot.slane %v1138_v60, %v7589_v11  ;;  %v1638_v16 = vrot.slane %v1610_v17, %v7589_v11  ;;  %v360_v43 = vcombine.high %v6335_v29, %v6335_v29 }
  0x52   :  { %v367_v30 = vrot.slane %v6335_v29, %v7589_v11  ;;  %v1639_v40 = vcombine.low %v1617_v0, %v1624_v7  ;;  %v384_v47 = vcombine.high %v6336_v3, %v6336_v3  ;;  %v8071_v48 = vrot.slane %v6336_v3, %v7589_v11 }
  0x53   :  { %v1175_v10 = vrot.slane %v1167_v61, %v7589_v11  ;;  %v1168_v49 = vcombine.low %v1159_v63, %v1166_v9  ;;  %v1640_v50 = vcombine.low %v1631_v41, %v1638_v16  ;;  %v8074_v51 = vrot.slane %v360_v43, %v7589_v11 }
  0x54   :  { %9923 = vst [vmem:[#allocation5_spill] sm:$0xff] %v8071_v48  ;;  %v8076_v55 = vcombine.high %v367_v30, %v367_v30  ;;  %v1647_v57 = vrot.slane %v1639_v40, %v7589_v11  ;;  %v8080_v59 = vrot.slane %v384_v47, %v7589_v11  ;;  %v8084_v32 = vcombine.high %v8071_v48, %v8071_v48 }
  0x55   :  { %9924 = vst [vmem:[#allocation6_spill] sm:$0xff] %v8074_v51  ;;  %v458_v2 = vcombine.high %v8008_v45, %v8008_v45  ;;  %v1182_v29 = vrot.slane %v1168_v49, %v7589_v11  ;;  %v1654_v60 = vrot.slane %v1640_v50, %v7589_v11  ;;  %v8092_v63 = vcombine.high %v8074_v51, %v8074_v51 }
  0x56   :  { %9925 = vst [vmem:[#allocation7_spill] sm:$0xff] %v8076_v55  ;;  %9926 = vst [vmem:[#allocation8_spill] sm:$0xff] %v8080_v59  ;;  %v802_v17 = vshrl.u32 %v8008_v45, 16  ;;  %v807_v0 = vshll.u32 %v8064_v8, 16  ;;  %v810_v3 = vshrl.u32 %v8064_v8, 16  ;;  %v819_v7 = vshrl.u32 %v367_v30, 16 }
  0x57   :  { %9927 = vst [vmem:[#allocation9_spill] sm:$0xff] %v8092_v63  ;;  %v815_v61 = vshll.u32 %v458_v2, 16  ;;  %v1183_v41 = vcombine.low %v1175_v10, %v1182_v29  ;;  %v1655_v9 = vcombine.low %v1647_v57, %v1654_v60  ;;  %v824_v16 = vshll.u32 %v8074_v51, 16 }
  0x58   :  { %v827_v43 = vshrl.u32 %v8074_v51, 16  ;;  %v809_v40 = vsel %vm7650_vm15, %v802_v17, %v807_v0  ;;  %v832_v49 = vshll.u32 %v8076_v55, 16  ;;  %v835_v50 = vshrl.u32 %v8076_v55, 16 }
  0x59   :  { %v817_v47 = vsel %vm7650_vm15, %v810_v3, %v815_v61  ;;  %6988 = vmatmul.mubr.msk.bf16.gmra.mrb[16].mxu0 %vm1300_vm1, %v1183_v41  ;;  %7022 = vmatmul.mubr.msk.bf16.gmra.mrb[16].mxu1 %vm1300_vm1, %v1655_v9  ;;  %v826_v10 = vsel %vm7650_vm15, %v819_v7, %v824_v16  ;;  %v840_v57 = vshll.u32 %v8092_v63, 16  ;;  %v843_v2 = vshrl.u32 %v8092_v63, 16 }
  0x5a   :  { %v848_v29 = vshll.u32 %v8071_v48, 16  ;;  %6991 = vmatprep.mubr.msk.bf16.mxu0 %vm7501_vm0, %v9884_v1  ;;  %7025 = vmatprep.mubr.msk.bf16.mxu1 %vm7501_vm0, %v9884_v1  ;;  %v834_v60 = vsel %vm7650_vm15, %v827_v43, %v832_v49  ;;  %v851_v17 = vshrl.u32 %v8071_v48, 16  ;;  %v856_v0 = vshll.u32 %v8080_v59, 16 }
  0x5b   :  { %v859_v3 = vshrl.u32 %v8080_v59, 16  ;;  %v842_v61 = vsel %vm7650_vm15, %v835_v50, %v840_v57  ;;  %v864_v41 = vshll.u32 %v8084_v32, 16  ;;  %v1184_v9 = vcombine.low %v809_v40, %v817_v47  ;;  %v6337_v1 = vld.sshfl [vmem:[%s9873_s0 + $0x38] sm:$0x33 pattern:$0x75316420] }
  0x5c   :  { %v850_v7 = vsel %vm7650_vm15, %v843_v2, %v848_v29  ;;  %v858_v16 = vsel %vm7650_vm15, %v851_v17, %v856_v0  ;;  %v1185_v56 = vcombine.low %v826_v10, %v834_v60  ;;  %v1656_v49 = vcombine.low %v8008_v45, %v8064_v8  ;;  %v6338_v60 = vld.sshfl [vmem:[%s9873_s0 + $0x3c] sm:$0x33 pattern:$0x75316420] }
  0x5d   :  { %v1186_v43 = vcombine.low %v842_v61, %v850_v7  ;;  %v866_v50 = vsel %vm7650_vm15, %v859_v3, %v864_v41  ;;  %v1194_v57 = vrot.slane %v1184_v9, %v7589_v11  ;;  %v1657_v2 = vcombine.low %v367_v30, %v8074_v51 }
  0x5e   :  { %v6414_v40 = vcombine.high %v367_v30, %v8074_v51  ;;  %v1187_v47 = vcombine.low %v858_v16, %v866_v50  ;;  %v1201_v10 = vrot.slane %v1185_v56, %v7589_v11  ;;  %v1659_v8 = vcombine.low %v8071_v48, %v8080_v59 }
  0x5f   :  { %v1208_v29 = vrot.slane %v1186_v43, %v7589_v11  ;;  %v1666_v17 = vrot.slane %v1656_v49, %v7589_v11  ;;  %v1673_v0 = vrot.slane %v1657_v2, %v7589_v11  ;;  %v407_v61 = vcombine.high %v6337_v1, %v6337_v1 }
  0x60   :  { %v1680_v3 = vrot.slane %v6414_v40, %v7589_v11  ;;  %v1215_v30 = vrot.slane %v1187_v47, %v7589_v11  ;;  %v1216_v7 = vcombine.low %v1194_v57, %v1201_v10  ;;  %v1687_v56 = vrot.slane %v1659_v8, %v7589_v11 }
  0x61   :  { %v8151_v41 = vrot.slane %v6337_v1, %v7589_v11  ;;  %v1688_v9 = vcombine.low %v1666_v17, %v1673_v0  ;;  %v8154_v16 = vrot.slane %v407_v61, %v7589_v11  ;;  %v431_v43 = vcombine.high %v6338_v60, %v6338_v60 }
  0x62   :  { %v8157_v49 = vrot.slane %v6338_v60, %v7589_v11  ;;  %v1217_v50 = vcombine.low %v1208_v29, %v1215_v30  ;;  %v1224_v2 = vrot.slane %v1216_v7, %v7589_v11  ;;  %v1689_v40 = vcombine.low %v1680_v3, %v1687_v56 }
  0x63   :  { %v422_v57 = vcombine.high %v8151_v41, %v8151_v41  ;;  %v1696_v47 = vrot.slane %v1688_v9, %v7589_v11  ;;  %v423_v1 = vcombine.high %v8154_v16, %v8154_v16  ;;  %v8166_v10 = vrot.slane %v431_v43, %v7589_v11 }
  0x64   :  { %v446_v8 = vcombine.high %v8157_v49, %v8157_v49  ;;  %v1231_v60 = vrot.slane %v1217_v50, %v7589_v11  ;;  %v1703_v29 = vrot.slane %v1689_v40, %v7589_v11  ;;  %v8174_v17 = vcombine.high %v8080_v59, %v8080_v59 }
  0x65   :  { %v867_v0 = vshrl.u32 %v8084_v32, 16  ;;  %v460_v3 = vcombine.high %v8166_v10, %v8166_v10  ;;  %v876_v61 = vshrl.u32 %v8151_v41, 16  ;;  %v881_v30 = vshll.u32 %v8154_v16, 16 }
  0x66   :  { %9928 = vst [vmem:[#allocation10_spill] sm:$0xff] %v8174_v17  ;;  %v884_v7 = vshrl.u32 %v8154_v16, 16  ;;  %v1232_v56 = vcombine.low %v1224_v2, %v1231_v60  ;;  %v1704_v9 = vcombine.low %v1696_v47, %v1703_v29  ;;  %v872_v43 = vshll.u32 %v8174_v17, 16 }
  0x67   :  { %v889_v50 = vshll.u32 %v422_v57, 16  ;;  %v883_v40 = vsel %vm7650_vm15, %v876_v61, %v881_v30  ;;  %v892_v6 = vshrl.u32 %v422_v57, 16  ;;  %v897_v59 = vshll.u32 %v423_v1, 16 }
  0x68   :  { %v900_v63 = vshrl.u32 %v423_v1, 16  ;;  %6992 = vmatmul.mubr.msk.bf16.gmra.mrb[20].mxu0 %vm1300_vm1, %v1232_v56  ;;  %7026 = vmatmul.mubr.msk.bf16.gmra.mrb[20].mxu1 %vm1300_vm1, %v1704_v9  ;;  %v874_v48 = vsel %vm7650_vm15, %v867_v0, %v872_v43  ;;  %v905_v47 = vshll.u32 %v8157_v49, 16  ;;  %v908_v60 = vshrl.u32 %v8157_v49, 16 }
  0x69   :  { %v891_v2 = vsel %vm7650_vm15, %v884_v7, %v889_v50  ;;  %v9929_v29 = vmov 0.0   ;;  %v899_v61 = vsel %vm7650_vm15, %v892_v6, %v897_v59  ;;  %v913_v30 = vshll.u32 %v8166_v10, 16 }
  0x6a   :  { %6995 = vmatprep.mubr.msk.bf16.mxu0 %vm7501_vm0, %v9929_v29  ;;  %7029 = vmatprep.mubr.msk.bf16.mxu1 %vm7501_vm0, %v9929_v29  ;;  %v916_v0 = vshrl.u32 %v8166_v10, 16  ;;  %v921_v56 = vshll.u32 %v446_v8, 16  ;;  %v907_v7 = vsel %vm7650_vm15, %v900_v63, %v905_v47  ;;  %v924_v9 = vshrl.u32 %v446_v8, 16 }
  0x6b   :  { %v929_v43 = vshll.u32 %v460_v3, 16  ;;  %v1233_v50 = vcombine.low %v874_v48, %v883_v40  ;;  %v915_v17 = vsel %vm7650_vm15, %v908_v60, %v913_v30  ;;  %v1234_v55 = vcombine.low %v891_v2, %v899_v61 }
  0x6c   :  { %v923_v51 = vsel %vm7650_vm15, %v916_v0, %v921_v56  ;;  %v1705_v6 = vcombine.low %v8084_v32, %v8151_v41  ;;  %v1235_v13 = vcombine.low %v907_v7, %v915_v17  ;;  %v1706_v63 = vcombine.low %v8154_v16, %v422_v57 }
  0x6d   :  { %v931_v59 = vsel %vm7650_vm15, %v924_v9, %v929_v43  ;;  %v1243_v15 = vrot.slane %v1233_v50, %v7589_v11  ;;  %v1250_v48 = vrot.slane %v1234_v55, %v7589_v11  ;;  %v1707_v40 = vcombine.low %v423_v1, %v8157_v49 }
  0x6e   :  { %v1236_v3 = vcombine.low %v923_v51, %v931_v59  ;;  %v1708_v47 = vcombine.low %v8166_v10, %v446_v8  ;;  %v1257_v2 = vrot.slane %v1235_v13, %v7589_v11  ;;  %v1715_v60 = vrot.slane %v1705_v6, %v7589_v11 }
  0x6f   :  { %v1722_v61 = vrot.slane %v1706_v63, %v7589_v11  ;;  %v1889_v17 = vcombine.low %v7612_v20, %v7616_v21  ;;  %v1265_v0 = vcombine.low %v1243_v15, %v1250_v48  ;;  %v1729_v51 = vrot.slane %v1707_v40, %v7589_v11 }
  0x70   :  { %v1264_v30 = vrot.slane %v1236_v3, %v7589_v11  ;;  %v1736_v55 = vrot.slane %v1708_v47, %v7589_v11  ;;  %v1890_v1 = vcombine.low %v7631_v26, %v7609_v19  ;;  %v1891_v13 = vcombine.low %v7622_v24, %v7626_v25 }
  0x71   :  { %v1737_v57 = vcombine.low %v1715_v60, %v1722_v61  ;;  %v1899_v8 = vrot.slane %v1889_v17, %v7589_v11  ;;  %v1273_v7 = vrot.slane %v1265_v0, %v7589_v11  ;;  %v9930_v21 = vcombine.low %v7638_v28, %v7634_v27 }
  0x72   :  { %v1266_v56 = vcombine.low %v1257_v2, %v1264_v30  ;;  %v1738_v20 = vcombine.low %v1729_v51, %v1736_v55  ;;  %v1906_v43 = vrot.slane %v1890_v1, %v7589_v11  ;;  %v1913_v19 = vrot.slane %v1891_v13, %v7589_v11 }
  0x73   :  { %v1920_v15 = vrot.slane %v9930_v21, %v7589_v11  ;;  %v1745_v9 = vrot.slane %v1737_v57, %v7589_v11  ;;  %v6431_v24 = vcombine.high %v7619_v23, %v7634_v27  ;;  %v1939_v50 = vcombine.low %v7710_v18, %v7717_v33 }
  0x74   :  { %v1280_v25 = vrot.slane %v1266_v56, %v7589_v11  ;;  %v1752_v26 = vrot.slane %v1738_v20, %v7589_v11  ;;  %v6432_v28 = vcombine.high %v7710_v18, %v7717_v33  ;;  %v1921_v6 = vcombine.low %v1899_v8, %v1906_v43  ;;  %v9934_v20 = vld [vmem:[#allocation6_spill] sm:$0xff]  ;;  %v9935_v43 = vld [vmem:[#allocation5_spill] sm:$0xff] }
  0x75   :  { %v1922_v59 = vcombine.low %v1913_v19, %v1920_v15  ;;  %v1941_v63 = vcombine.low %v7722_v35, %v7726_v36  ;;  %v1948_v3 = vrot.slane %v6431_v24, %v7589_v11  ;;  %v1955_v23 = vrot.slane %v1939_v50, %v7589_v11  ;;  %v9936_v19 = vld [vmem:[#allocation9_spill] sm:$0xff] }
  0x76   :  { %v1281_v48 = vcombine.low %v1273_v7, %v1280_v25  ;;  %v1753_v40 = vcombine.low %v1745_v9, %v1752_v26  ;;  %v1962_v27 = vrot.slane %v6432_v28, %v7589_v11  ;;  %v1929_v18 = vrot.slane %v1921_v6, %v7589_v11  ;;  %v9933_v7 = vld [vmem:[#allocation7_spill] sm:$0xff] }
  0x77   :  { %v1969_v47 = vrot.slane %v1941_v63, %v7589_v11  ;;  %v1936_v33 = vrot.slane %v1922_v59, %v7589_v11  ;;  %v1970_v35 = vcombine.low %v1948_v3, %v1955_v23  ;;  %v1987_v36 = vcombine.low %v7798_v34, %v7804_v46 }
  0x78   :  { %6996 = vmatmul.mubr.msk.bf16.gmra.mrb[24].mxu0 %vm1300_vm1, %v1281_v48  ;;  %7030 = vmatmul.mubr.msk.bf16.gmra.mrb[24].mxu1 %vm1300_vm1, %v1753_v40  ;;  %v1988_v2 = vcombine.low %v7808_v52, %v7812_v53  ;;  %v1989_v60 = vcombine.low %v7829_v62, %v7820_v58  ;;  %v6433_v17 = vcombine.high %v7815_v54, %v7820_v58  ;;  %vm3488_vm3 = vcmask 457728  }
  0x79   :  { %7039 = vmatprep.mubr.msk.bf16.mxu0 %vm7501_vm0, %v9929_v29  ;;  %v1971_v61 = vcombine.low %v1962_v27, %v1969_v47  ;;  %v2038_v30 = vcombine.low %v7908_v37, %v7910_v38  ;;  %v1937_v0 = vcombine.low %v1929_v18, %v1936_v33  ;;  %v2039_v51 = vcombine.low %v7923_v44, %v7914_v12 }
  0x7a   :  { %v2085_v34 = vcombine.low %v7980_v4, %v7984_v5  ;;  %v1978_v46 = vrot.slane %v1970_v35, %v7589_v11  ;;  %v1997_v52 = vrot.slane %v1987_v36, %v7589_v11  ;;  %v2004_v53 = vrot.slane %v1988_v2, %v7589_v11 }
  0x7b   :  { %v2060_v62 = vrot.slane %v2038_v30, %v7589_v11  ;;  %v2011_v54 = vrot.slane %v1989_v60, %v7589_v11  ;;  %v2067_v58 = vrot.slane %v2039_v51, %v7589_v11  ;;  %v2086_v37 = vcombine.low %v8003_v42, %v7992_v22  ;;  %v9938_v51 = vld [vmem:[#allocation10_spill] sm:$0xff] }
  0x7c   :  { %v6435_v38 = vcombine.high %v7988_v14, %v7992_v22  ;;  %v1985_v12 = vrot.slane %v1971_v61, %v7589_v11  ;;  %v2018_v44 = vrot.slane %v6433_v17, %v7589_v11  ;;  %v2088_v4 = vcombine.low %v7995_v31, %v8008_v45  ;;  %v9931_v14 = vld [vmem:[#allocation4_spill] sm:$0xff]  ;;  %v9932_v22 = vld [vmem:[#allocation3_spill] sm:$0xff] }
  0x7d   :  { %v2095_v5 = vrot.slane %v2085_v34, %v7589_v11  ;;  %v2069_v55 = vcombine.low %v2060_v62, %v2067_v58  ;;  %v2102_v57 = vrot.slane %v2086_v37, %v7589_v11  ;;  %v6436_v42 = vcombine.high %v7995_v31, %v8008_v45  ;;  %v9937_v31 = vld [vmem:[#allocation8_spill] sm:$0xff] }
  0x7e   :  { %v2109_v1 = vrot.slane %v6435_v38, %v7589_v11  ;;  %v2036_v13 = vcombine.low %v9932_v22, %v9931_v14  ;;  %v6434_v8 = vcombine.high %v9932_v22, %v9931_v14  ;;  %v2116_v56 = vrot.slane %v2088_v4, %v7589_v11 }
  0x7f   :  { %v2135_v21 = vcombine.low %v9934_v20, %v9933_v7  ;;  %v2019_v15 = vcombine.low %v1997_v52, %v2004_v53  ;;  %v2117_v9 = vcombine.low %v2095_v5, %v2102_v57  ;;  %v2136_v24 = vcombine.low %v9936_v19, %v9935_v43 }
  0x80   :  { %7040 = vmatmul.mubr.msk.bf16.vlgmr.msra.gmra.mrb[28].mxu0 %vm1300_vm1, %v1937_v0  ;;  %v2137_v45 = vcombine.low %v9937_v31, %v8084_v32  ;;  %v1986_v25 = vcombine.low %v1978_v46, %v1985_v12  ;;  %v2118_v26 = vcombine.low %v2109_v1, %v2116_v56  ;;  %v2144_v50 = vrot.slane %v6436_v42, %v7589_v11  ;;  %v7399_v12 = vld [vmem:[%s9874_s3 + $0x1c] sm:$0xff]   ;;  %v7401_v56 = vld [vmem:[%s9874_s3 + $0x2c] sm:$0xff]  }
  0x81   :  { %7043 = vmatprep.mubr.msk.bf16.mxu0 %vm7501_vm0, %v9929_v29  ;;  %v2151_v28 = vrot.slane %v2135_v21, %v7589_v11  ;;  %v2020_v6 = vcombine.low %v2011_v54, %v2018_v44  ;;  %v2125_v59 = vrot.slane %v2117_v9, %v7589_v11  ;;  %v2158_v63 = vrot.slane %v2136_v24, %v7589_v11 }
  0x82   :  { %v2165_v3 = vrot.slane %v2137_v45, %v7589_v11  ;;  %v2132_v48 = vrot.slane %v2118_v26, %v7589_v11  ;;  %v2046_v27 = vrot.slane %v2036_v13, %v7589_v11  ;;  %v2027_v18 = vrot.slane %v2019_v15, %v7589_v11  ;;  %7067 = vmatprep.subr.bf16.mxu1 %v7399_v12 }
  0x83   :  { %v2166_v40 = vcombine.low %v2144_v50, %v2151_v28  ;;  %v2034_v33 = vrot.slane %v2020_v6, %v7589_v11  ;;  %v2053_v35 = vrot.slane %v6434_v8, %v7589_v11  ;;  %v2083_v30 = vrot.slane %v2069_v55, %v7589_v11  ;;  %7068 = vmatpush3.bf16.msra.mxu1 %v7399_v12  ;;  %v7400_v8 = vld [vmem:[%s9874_s3 + $0x24] sm:$0xff]  }
  0x84   :  { %v2167_v23 = vcombine.low %v2158_v63, %v2165_v3  ;;  %v2133_v32 = vcombine.low %v2125_v59, %v2132_v48  ;;  %v2183_v34 = vcombine.low %v9938_v51, %v8154_v16  ;;  %v6437_v46 = vcombine.high %v8151_v41, %v8154_v16  ;;  %7069 = vmatprep.subr.bf16.mxu1 %v7400_v8  ;;  %v7402_v59 = vld [vmem:[%s9874_s3 + $0x34] ss:$0 sps:$4 sm:$0xff]  }
  0x85   :  { %v2174_v47 = vrot.slane %v2166_v40, %v7589_v11  ;;  %v2035_v60 = vcombine.low %v2027_v18, %v2034_v33  ;;  %v2068_v61 = vcombine.low %v2046_v27, %v2053_v35  ;;  %v2185_v52 = vcombine.low %v8157_v49, %v8166_v10 }
  0x86   :  { %v2181_v36 = vrot.slane %v2167_v23, %v7589_v11  ;;  %v6438_v53 = vcombine.high %v8157_v49, %v8166_v10  ;;  %v2193_v62 = vrot.slane %v2183_v34, %v7589_v11  ;;  %v2200_v54 = vrot.slane %v6437_v46, %v7589_v11 }
  0x87   :  { %v2076_v17 = vrot.slane %v2068_v61, %v7589_v11  ;;  %v2207_v58 = vrot.slane %v2185_v52, %v7589_v11  ;;  %7070 = vmatpush3.bf16.msra.mxu1 %v7400_v8  ;;  %v3509_v27 = vsel %vm3507_vm2, %v7402_v59, 0  ;;  %vm4681_vm4 = vcmask 1041409  }
  0x88   :  { %7044 = vmatmul.mubr.msk.bf16.gmra.mrb[32].mxu0 %vm1300_vm1, %v1986_v25  ;;  %v2182_v2 = vcombine.low %v2174_v47, %v2181_v36  ;;  %v2214_v37 = vrot.slane %v6438_v53, %v7589_v11  ;;  %v2215_v41 = vcombine.low %v2193_v62, %v2200_v54  ;;  %7071 = vmatprep.subr.bf16.mxu1 %v7401_v56  ;;  %vm4684_vm5 = vcmask 1042434  }
  0x89   :  { %7047 = vmatprep.mubr.msk.bf16.mxu0 %vm7501_vm0, %v9929_v29  ;;  %v2084_v0 = vcombine.low %v2076_v17, %v2083_v30  ;;  %v8383_v30 = vld [vmem:[%s9874_s3] sm:$0xff]   ;;  %vm4687_vm6 = vcmask 1043459   ;;  %vm4690_vm7 = vcmask 1044484   ;;  %vm4693_vm8 = vcmask 1045509  }
  0x8a   :  { %v2216_v16 = vcombine.low %v2207_v58, %v2214_v37  ;;  %v2223_v38 = vrot.slane %v2215_v41, %v7589_v11  ;;  %vm4696_vm9 = vcmask 1046534   ;;  %vm4699_vm10 = vcmask 1047559  }
  0x8b   :  { %7072 = vmatpush3.bf16.msra.mxu1 %v7401_v56  ;;  %vm4738_vm11 = vcmask 785408  }
  0x8c   :  { %v2230_v49 = vrot.slane %v2216_v16, %v7589_v11  ;;  %7383 = vmatprep.subr.msk.bf16.mxu1 %vm3507_vm2, %v7402_v59 }
  0x8e   :  { %v2231_v10 = vcombine.low %v2223_v38, %v2230_v49 }
  0x8f   :  { %7074 = vmatpush3.bf16.msra.mxu1 %v3509_v27 }
  0x90   :  { %7048 = vmatmul.mubr.msk.bf16.gmra.mrb[36].mxu0 %vm1300_vm1, %v2035_v60  ;;  %7087 = vmatprep.subr.bf16.mxu1 %v8383_v30 }
  0x91   :  { %7051 = vmatprep.mubr.msk.bf16.mxu0 %vm7501_vm0, %v9929_v29 }
  0x98   :  { %7052 = vmatmul.mubr.msk.bf16.gmra.mrb[40].mxu0 %vm1300_vm1, %v2084_v0 }
  0x99   :  { %7055 = vmatprep.mubr.msk.bf16.mxu0 %vm7501_vm0, %v9929_v29 }
  0xa0   :  { %7056 = vmatmul.mubr.msk.bf16.gmra.mrb[44].mxu0 %vm1300_vm1, %v2133_v32 }
  0xa1   :  { %7059 = vmatprep.mubr.msk.bf16.mxu0 %vm7501_vm0, %v9929_v29 }
  0xa8   :  { %7060 = vmatmul.mubr.msk.bf16.gmra.mrb[48].mxu0 %vm1300_vm1, %v2182_v2 }
  0xa9   :  { %7063 = vmatprep.mubr.msk.bf16.mxu0 %vm7501_vm0, %v9929_v29 }
  0xb0   :  { %7064 = vmatmul.mubr.msk.bf16.gmra.mrb[52].mxu0 %vm1300_vm1, %v2231_v10 }
  0xb1   :  { %7139 = vmatprep.mubr.msk.bf16.mxu0 %vm7501_vm0, %v9929_v29 }
  0xef   :  { %v1356_v44 = vpop.f32.mrb[0].mxu0  ;;  %v1827_v4 = vpop.f32.mrb[0].mxu1 }
  0xf0   :  { %v8353_v5 = vadd.f32 %v1827_v4, %v1356_v44  ;;  %v6973_v55 = vpop.f32.mrb[1].mxu0  ;;  %v7007_v57 = vpop.f32.mrb[1].mxu1 }
  0xf1   :  { %v1359_v1 = vpop.f32.mrb[2].mxu0  ;;  %v1830_v42 = vpop.f32.mrb[2].mxu1 }
  0xf2   :  { %v8355_v14 = vadd.f32 %v1830_v42, %v1359_v1  ;;  %v6974_v22 = vpop.f32.mrb[3].mxu0  ;;  %v7008_v13 = vpop.f32.mrb[3].mxu1 }
  0xfe   :  { %v1364_v7 = vpop.f32.mrb[4].mxu0  ;;  %v1835_v20 = vpop.f32.mrb[4].mxu1 }
  0xff   :  { %v6977_v21 = vpop.f32.mrb[5].mxu0  ;;  %v8363_v15 = vadd.f32 %v1835_v20, %v1364_v7  ;;  %v7011_v9 = vpop.f32.mrb[5].mxu1 }
 0x100   :  { %v1367_v43 = vpop.f32.mrb[6].mxu0  ;;  %v1838_v19 = vpop.f32.mrb[6].mxu1 }
 0x101   :  { %v6978_v24 = vpop.f32.mrb[7].mxu0  ;;  %v8365_v31 = vadd.f32 %v1838_v19, %v1367_v43  ;;  %v7012_v45 = vpop.f32.mrb[7].mxu1  ;;  %v8401_v19 = vld [vmem:[%s9875_s2] ss:$0 sm:$0xff] }
 0x10d   :  { %v1372_v25 = vpop.f32.mrb[8].mxu0  ;;  %v1843_v26 = vpop.f32.mrb[8].mxu1 }
 0x10e   :  { %v8367_v50 = vadd.f32 %v1843_v26, %v1372_v25  ;;  %v6981_v28 = vpop.f32.mrb[9].mxu0  ;;  %v7015_v6 = vpop.f32.mrb[9].mxu1 }
 0x10f   :  { %v1375_v63 = vpop.f32.mrb[10].mxu0  ;;  %v1846_v3 = vpop.f32.mrb[10].mxu1 }
 0x110   :  { %v8372_v48 = vadd.f32 %v1846_v3, %v1375_v63  ;;  %v6982_v40 = vpop.f32.mrb[11].mxu0  ;;  %v7016_v23 = vpop.f32.mrb[11].mxu1 }
 0x11c   :  { %v1380_v32 = vpop.f32.mrb[12].mxu0 }
 0x11d   :  { %v1851_v47 = vpop.f32.mrb[12].mxu1  ;;  %v6985_v33 = vpop.f32.mrb[13].mxu0 }
 0x11e   :  { %v8376_v18 = vadd.f32 %v1851_v47, %v1380_v32  ;;  %v7019_v35 = vpop.f32.mrb[13].mxu1  ;;  %v1383_v36 = vpop.f32.mrb[14].mxu0 }
 0x11f   :  { %v1854_v2 = vpop.f32.mrb[14].mxu1  ;;  %v6986_v61 = vpop.f32.mrb[15].mxu0 }
 0x120   :  { %v8378_v60 = vadd.f32 %v1854_v2, %v1383_v36  ;;  %v7020_v17 = vpop.f32.mrb[15].mxu1 }
 0x12c   :  { %v1388_v0 = vpop.f32.mrb[16].mxu0  ;;  %v1859_v51 = vpop.f32.mrb[16].mxu1 }
 0x12d   :  { %v8386_v34 = vadd.f32 %v1859_v51, %v1388_v0  ;;  %v6989_v46 = vpop.f32.mrb[17].mxu0  ;;  %v7023_v52 = vpop.f32.mrb[17].mxu1 }
 0x12e   :  { %v1391_v53 = vpop.f32.mrb[18].mxu0  ;;  %v1862_v62 = vpop.f32.mrb[18].mxu1 }
 0x12f   :  { %v8388_v54 = vadd.f32 %v1862_v62, %v1391_v53  ;;  %v6990_v58 = vpop.f32.mrb[19].mxu0  ;;  %v7024_v37 = vpop.f32.mrb[19].mxu1 }
 0x13b   :  { %v1396_v41 = vpop.f32.mrb[20].mxu0  ;;  %v1867_v16 = vpop.f32.mrb[20].mxu1 }
 0x13c   :  { %v8390_v38 = vadd.f32 %v1867_v16, %v1396_v41  ;;  %v6993_v49 = vpop.f32.mrb[21].mxu0  ;;  %v7027_v10 = vpop.f32.mrb[21].mxu1 }
 0x13d   :  { %v1399_v12 = vpop.f32.mrb[22].mxu0  ;;  %v1870_v44 = vpop.f32.mrb[22].mxu1 }
 0x13e   :  { %v8392_v4 = vadd.f32 %v1870_v44, %v1399_v12  ;;  %v6994_v55 = vpop.f32.mrb[23].mxu0  ;;  %v7028_v57 = vpop.f32.mrb[23].mxu1 }
 0x14b   :  { %v1404_v1 = vpop.f32.mrb[24].mxu0  ;;  %v1875_v42 = vpop.f32.mrb[24].mxu1 }
 0x14c   :  { %v8394_v22 = vadd.f32 %v1875_v42, %v1404_v1  ;;  %v6997_v13 = vpop.f32.mrb[25].mxu0  ;;  %v7031_v8 = vpop.f32.mrb[25].mxu1 }
 0x14d   :  { %v1407_v56 = vpop.f32.mrb[26].mxu0  ;;  %v1878_v7 = vpop.f32.mrb[26].mxu1 }
 0x14e   :  { %v8396_v20 = vadd.f32 %v1878_v7, %v1407_v56  ;;  %v6998_v21 = vpop.f32.mrb[27].mxu0  ;;  %v7032_v9 = vpop.f32.mrb[27].mxu1 }
 0x153   :  { %v2305_v43 = vpop.f32.mrb[28].mxu0 }
 0x154   :  { %v2360_v24 = vadd.f32 %v2305_v43, %v8353_v5  ;;  %v7041_v45 = vpop.f32.mrb[29].mxu0  ;;  %v8411_v5 = vld [vmem:[%s9874_s3 + $0x18] ss:$0 sps:$4 sm:$0xff]  }
 0x155   :  { %v2308_v25 = vpop.f32.mrb[30].mxu0  ;;  %v8426_v52 = vsel %vm3507_vm2, %v8411_v5, 0 }
 0x156   :  { %v2381_v26 = vadd.f32 %v8401_v19, %v2360_v24  ;;  %v2361_v28 = vadd.f32 %v2308_v25, %v8355_v14  ;;  %v7042_v6 = vpop.f32.mrb[31].mxu0 }
 0x158   :  { %v2382_v59 = vadd.f32 %v8401_v19, %v2361_v28  ;;  %v2395_v63 = vmax.f32 %v2381_v26, 0.0 }
 0x15a   :  { %v2396_v3 = vmax.f32 %v2382_v59, 0.0 }
 0x15b   :  { %v2313_v40 = vpop.f32.mrb[32].mxu0 }
 0x15c   :  { %v2409_v23 = vpack.c.bf16 %v2396_v3, %v2395_v63  ;;  %v6450_v27 = vpack.c.bf16 %v2396_v3, %v2396_v3  ;;  %v2362_v32 = vadd.f32 %v2313_v40, %v8363_v15  ;;  %v7045_v47 = vpop.f32.mrb[33].mxu0 }
 0x15d   :  { %v2316_v33 = vpop.f32.mrb[34].mxu0 }
 0x15e   :  { %v2430_v35 = vrot.slane %v2409_v23, %v7589_v11  ;;  %v2437_v14 = vrot.slane %v6450_v27, %v7589_v11  ;;  %v2383_v36 = vadd.f32 %v8401_v19, %v2362_v32  ;;  %v2363_v2 = vadd.f32 %v2316_v33, %v8365_v31  ;;  %v7046_v61 = vpop.f32.mrb[35].mxu0 }
 0x160   :  { %v2438_v17 = vcombine.high %v2430_v35, %v2430_v35  ;;  %v2439_v0 = vcombine.high %v2437_v14, %v2437_v14  ;;  %v8418_v15 = vrot.slane %v2430_v35, %v7589_v11  ;;  %v8421_v51 = vrot.slane %v2437_v14, %v7589_v11 }
 0x161   :  { %v2384_v46 = vadd.f32 %v8401_v19, %v2363_v2  ;;  %v2397_v58 = vmax.f32 %v2383_v36, 0.0 }
 0x162   :  { %v8429_v53 = vrot.slane %v2438_v17, %v7589_v11  ;;  %v8432_v31 = vrot.slane %v2439_v0, %v7589_v11  ;;  %v8436_v62 = vcombine.high %v8418_v15, %v8418_v15  ;;  %v8440_v37 = vcombine.high %v8421_v51, %v8421_v51 }
 0x163   :  { %v2774_v41 = vshrl.u32 %v8418_v15, 16  ;;  %v2398_v16 = vmax.f32 %v2384_v46, 0.0  ;;  %v2321_v49 = vpop.f32.mrb[36].mxu0  ;;  %v2803_v10 = vshll.u32 %v8421_v51, 16  ;;  %v2806_v1 = vshrl.u32 %v8421_v51, 16 }
 0x164   :  { %9939 = vst [vmem:[#allocation4_spill] sm:$0xff] %v8436_v62  ;;  %9940 = vst [vmem:[#allocation3_spill] sm:$0xff] %v8440_v37  ;;  %v2364_v12 = vadd.f32 %v2321_v49, %v8367_v50  ;;  %v7049_v44 = vpop.f32.mrb[37].mxu0  ;;  %v8447_v55 = vcombine.high %v8429_v53, %v8429_v53  ;;  %v2779_v57 = vshll.u32 %v8429_v53, 16  ;;  %v2782_v56 = vshrl.u32 %v8429_v53, 16 }
 0x165   :  { %v2410_v42 = vpack.c.bf16 %v2398_v16, %v2397_v58  ;;  %v6451_v13 = vpack.c.bf16 %v2398_v16, %v2398_v16  ;;  %v2324_v8 = vpop.f32.mrb[38].mxu0  ;;  %v2787_v7 = vshll.u32 %v8436_v62, 16  ;;  %v8457_v43 = vcombine.high %v8432_v31, %v8432_v31 }
 0x166   :  { %9941 = vst [vmem:[#allocation7_spill] sm:$0xff] %v8447_v55  ;;  %v2385_v21 = vadd.f32 %v8401_v19, %v2364_v12  ;;  %v2365_v50 = vadd.f32 %v2324_v8, %v8372_v48  ;;  %v7050_v9 = vpop.f32.mrb[39].mxu0  ;;  %v8461_v24 = vsel %vm7650_vm15, %v2774_v41, %v2779_v57  ;;  %v2790_v26 = vshrl.u32 %v8436_v62, 16 }
 0x167   :  { %v2479_v45 = vrot.slane %v2410_v42, %v7589_v11  ;;  %v2486_v25 = vrot.slane %v6451_v13, %v7589_v11  ;;  %v2795_v28 = vshll.u32 %v8447_v55, 16  ;;  %v8470_v48 = vsel %vm7650_vm15, %v2782_v56, %v2787_v7 }
 0x168   :  { %v2386_v6 = vadd.f32 %v8401_v19, %v2365_v50  ;;  %v2798_v59 = vshrl.u32 %v8447_v55, 16  ;;  %v2811_v63 = vshll.u32 %v8432_v31, 16  ;;  %v2399_v32 = vmax.f32 %v2385_v21, 0.0 }
 0x169   :  { %v2487_v3 = vcombine.high %v2479_v45, %v2479_v45  ;;  %v2488_v40 = vcombine.high %v2486_v25, %v2486_v25  ;;  %v8475_v23 = vrot.slane %v2479_v45, %v7589_v11  ;;  %v8478_v27 = vrot.slane %v2486_v25, %v7589_v11 }
 0x16a   :  { %v2400_v47 = vmax.f32 %v2386_v6, 0.0  ;;  %v8482_v33 = vsel %vm7650_vm15, %v2790_v26, %v2795_v28  ;;  %v8486_v35 = vsel %vm7650_vm15, %v2798_v59, %v2803_v10  ;;  %v8498_v17 = vsel %vm7650_vm15, %v2806_v1, %v2811_v63 }
 0x16b   :  { %v8489_v14 = vrot.slane %v2487_v3, %v7589_v11  ;;  %v8492_v36 = vrot.slane %v2488_v40, %v7589_v11  ;;  %v2518_v2 = vcombine.high %v8478_v27, %v8478_v27  ;;  %v2329_v61 = vpop.f32.mrb[40].mxu0  ;;  %v8502_v0 = vcombine.high %v8475_v23, %v8475_v23 }
 0x16c   :  { %v2860_v46 = vshll.u32 %v8478_v27, 16  ;;  %v2411_v58 = vpack.c.bf16 %v2400_v47, %v2399_v32  ;;  %v6452_v41 = vpack.c.bf16 %v2400_v47, %v2400_v47  ;;  %v7053_v16 = vpop.f32.mrb[41].mxu0  ;;  %v2863_v12 = vshrl.u32 %v8478_v27, 16 }
 0x16d   :  { %9942 = vst [vmem:[#allocation6_spill] sm:$0xff] %v8492_v36  ;;  %v8507_v49 = vcombine.high %v8489_v14, %v8489_v14  ;;  %v8511_v10 = vcombine.high %v8492_v36, %v8492_v36  ;;  %v2868_v44 = vshll.u32 %v8492_v36, 16  ;;  %v2332_v57 = vpop.f32.mrb[42].mxu0  ;;  %v2839_v1 = vshrl.u32 %v8489_v14, 16 }
 0x16e   :  { %v8516_v42 = vshrl.u32 %v2518_v2, 16  ;;  %v6523_v13 = vcombine.high %v8478_v27, %v8492_v36  ;;  %v2528_v8 = vrot.slane %v2411_v58, %v7589_v11  ;;  %v7054_v56 = vpop.f32.mrb[43].mxu0  ;;  %v2535_v26 = vrot.slane %v6452_v41, %v7589_v11 }
 0x16f   :  { %9943 = vst [vmem:[#allocation5_spill] sm:$0xff] %v8511_v10  ;;  %v2855_v7 = vshrl.u32 %v8507_v49, 16  ;;  %v8524_v21 = vsel %vm7650_vm15, %v2863_v12, %v2868_v44  ;;  %v2877_v50 = vshll.u32 %v8511_v10, 16  ;;  %v2366_v63 = vadd.f32 %v2329_v61, %v8376_v18 }
 0x170   :  { %v8531_v25 = vrot.slane %v6523_v13, %v7589_v11  ;;  %v2536_v28 = vcombine.high %v2528_v8, %v2528_v8  ;;  %v8539_v59 = vrot.slane %v2528_v8, %v7589_v11  ;;  %v2367_v3 = vadd.f32 %v2332_v57, %v8378_v60  ;;  %v7412_v8 = vld [vmem:[%s9876_s5 + $0x38] sm:$0xff]  }
 0x171   :  { %v8536_v6 = vsel %vm7650_vm15, %v2855_v7, %v2860_v46  ;;  %v2537_v32 = vcombine.high %v2535_v26, %v2535_v26  ;;  %v8546_v47 = vrot.slane %v2535_v26, %v7589_v11  ;;  %v7411_v46 = vld [vmem:[%s9876_s5 + $0x30] sm:$0xff]   ;;  %v2387_v61 = vadd.f32 %v8401_v19, %v2366_v63 }
 0x172   :  { %v8549_v2 = vrot.slane %v2536_v28, %v7589_v11  ;;  %v8556_v58 = vcombine.high %v8539_v59, %v8539_v59  ;;  %7128 = vmatpush3.bf16.msra.mxu0 %v7411_v46  ;;  %v2388_v26 = vadd.f32 %v8401_v19, %v2367_v3  ;;  %v2814_v40 = vshrl.u32 %v8432_v31, 16 }
 0x173   :  { %9944 = vst [vmem:[#allocation9_spill] sm:$0xff] %v8546_v47  ;;  %v2337_v41 = vpop.f32.mrb[44].mxu0  ;;  %v8562_v16 = vrot.slane %v2537_v32, %v7589_v11  ;;  %v8566_v12 = vcombine.high %v8546_v47, %v8546_v47  ;;  %v2401_v7 = vmax.f32 %v2387_v61, 0.0  ;;  %7129 = vmatprep.subr.bf16.mxu0 %v9929_v29  ;;  %v2819_v3 = vshll.u32 %v8440_v37, 16 }
 0x174   :  { %9945 = vst [vmem:[#allocation8_spill] sm:$0xff] %v8556_v58  ;;  %v7057_v13 = vpop.f32.mrb[45].mxu0  ;;  %v2368_v28 = vadd.f32 %v2337_v41, %v8386_v34  ;;  %v2402_v56 = vmax.f32 %v2388_v26, 0.0  ;;  %v2823_v34 = vshrl.u32 %v8457_v43, 16  ;;  %v2828_v57 = vshll.u32 %v8475_v23, 16 }
 0x175   :  { %v2340_v63 = vpop.f32.mrb[46].mxu0  ;;  %v8579_v32 = vcombine.high %v8562_v16, %v8562_v16  ;;  %v2831_v60 = vshrl.u32 %v8475_v23, 16  ;;  %v2836_v46 = vshll.u32 %v8489_v14, 16  ;;  %v2821_v26 = vsel %vm7650_vm15, %v2814_v40, %v2819_v3 }
 0x176   :  { %v2369_v13 = vadd.f32 %v2340_v63, %v8388_v54  ;;  %v7058_v9 = vpop.f32.mrb[47].mxu0  ;;  %v2389_v61 = vadd.f32 %v8401_v19, %v2368_v28  ;;  %7130 = vmatpush3.bf16.msra.mxu0 %v7412_v8  ;;  %v2412_v54 = vpack.c.bf16 %v2402_v56, %v2401_v7  ;;  %v2830_v44 = vsel %vm7650_vm15, %v2823_v34, %v2828_v57 }
 0x177   :  { %v6453_v9 = vpack.c.bf16 %v2402_v56, %v2402_v56  ;;  %7131 = vmatprep.subr.bf16.mxu0 %v9929_v29  ;;  %v3173_v45 = vcombine.low %v8461_v24, %v8470_v48  ;;  %v3174_v7 = vcombine.low %v8482_v33, %v8486_v35  ;;  %v3175_v40 = vcombine.low %v8498_v17, %v2821_v26 }
 0x178   :  { %v2390_v41 = vadd.f32 %v8401_v19, %v2369_v13  ;;  %v2403_v63 = vmax.f32 %v2389_v61, 0.0  ;;  %v2838_v13 = vsel %vm7650_vm15, %v2831_v60, %v2836_v46  ;;  %v2577_v8 = vrot.slane %v2412_v54, %v7589_v11 }
 0x179   :  { %v2584_v56 = vrot.slane %v6453_v9, %v7589_v11  ;;  %v3176_v18 = vcombine.low %v2830_v44, %v2838_v13  ;;  %v3183_v57 = vrot.slane %v3173_v45, %v7589_v11  ;;  %v3190_v17 = vrot.slane %v3174_v7, %v7589_v11 }
 0x17a   :  { %v2404_v28 = vmax.f32 %v2390_v41, 0.0  ;;  %v2585_v60 = vcombine.high %v2577_v8, %v2577_v8  ;;  %v8607_v24 = vrot.slane %v2577_v8, %v7589_v11  ;;  %v3197_v44 = vrot.slane %v3175_v40, %v7589_v11 }
 0x17b   :  { %v2345_v61 = vpop.f32.mrb[48].mxu0  ;;  %v2586_v46 = vcombine.high %v2584_v56, %v2584_v56  ;;  %v8610_v48 = vrot.slane %v2584_v56, %v7589_v11  ;;  %v3204_v40 = vrot.slane %v3176_v18, %v7589_v11  ;;  %v9950_v29 = vshll.u32 %v8549_v2, 16 }
 0x17c   :  { %v2413_v3 = vpack.c.bf16 %v2404_v28, %v2403_v63  ;;  %v6454_v41 = vpack.c.bf16 %v2404_v28, %v2404_v28  ;;  %v7061_v34 = vpop.f32.mrb[49].mxu0  ;;  %v8617_v9 = vrot.slane %v2585_v60, %v7589_v11  ;;  %v3595_v39 = vcombine.low %v8457_v43, %v8475_v23 }
 0x17d   :  { %v2348_v54 = vpop.f32.mrb[50].mxu0  ;;  %v8620_v63 = vrot.slane %v2586_v46, %v7589_v11  ;;  %v8624_v26 = vcombine.high %v8610_v48, %v8610_v48  ;;  %v3644_v43 = vcombine.low %v8539_v59, %v8549_v2 }
 0x17e   :  { %v2626_v33 = vrot.slane %v2413_v3, %v7589_v11  ;;  %v2633_v35 = vrot.slane %v6454_v41, %v7589_v11  ;;  %v7062_v45 = vpop.f32.mrb[51].mxu0  ;;  %v3205_v3 = vcombine.low %v3183_v57, %v3190_v17  ;;  %v2370_v41 = vadd.f32 %v2345_v61, %v8390_v38 }
 0x17f   :  { %9946 = vst [vmem:[#allocation10_spill] sm:$0xff] %v8624_v26  ;;  %v2371_v34 = vadd.f32 %v2348_v54, %v8392_v4  ;;  %v3206_v45 = vcombine.low %v3197_v44, %v3204_v40  ;;  %v2847_v54 = vshrl.u32 %v8502_v0, 16  ;;  %v2852_v17 = vshll.u32 %v8507_v49, 16 }
 0x180   :  { %v2634_v13 = vcombine.high %v2626_v33, %v2626_v33  ;;  %v2635_v8 = vcombine.high %v2633_v35, %v2633_v35  ;;  %v8628_v56 = vrot.slane %v2626_v33, %v7589_v11  ;;  %v8631_v7 = vrot.slane %v2633_v35, %v7589_v11 }
 0x181   :  { %v2844_v35 = vshll.u32 %v8502_v0, 16  ;;  %v3213_v18 = vrot.slane %v3205_v3, %v7589_v11  ;;  %v2391_v57 = vadd.f32 %v8401_v19, %v2370_v41  ;;  %v2392_v38 = vadd.f32 %v8401_v19, %v2371_v34 }
 0x182   :  { %v8637_v60 = vrot.slane %v2634_v13, %v7589_v11  ;;  %v8640_v46 = vrot.slane %v2635_v8, %v7589_v11  ;;  %v8644_v33 = vcombine.high %v8628_v56, %v8628_v56  ;;  %v2879_v44 = vsel %vm7650_vm15, %v8516_v42, %v2877_v50 }
 0x183   :  { %v2353_v4 = vpop.f32.mrb[52].mxu0  ;;  %v2846_v61 = vsel %vm7650_vm15, %v2839_v1, %v2844_v35  ;;  %v3220_v8 = vrot.slane %v3206_v45, %v7589_v11  ;;  %v2405_v40 = vmax.f32 %v2391_v57, 0.0  ;;  %v2406_v3 = vmax.f32 %v2392_v38, 0.0 }
 0x184   :  { %9947 = vst [vmem:[#allocation11_spill] sm:$0xff] %v8644_v33  ;;  %v7065_v13 = vpop.f32.mrb[53].mxu0  ;;  %v9948_v41 = vshll.u32 %v8539_v59, 16  ;;  %v9949_v34 = vshrl.u32 %v8511_v10, 16  ;;  %v2854_v28 = vsel %vm7650_vm15, %v2847_v54, %v2852_v17  ;;  %v9951_v42 = vshrl.u32 %v8539_v59, 16 }
 0x185   :  { %v2356_v35 = vpop.f32.mrb[54].mxu0  ;;  %v2901_v45 = vshll.u32 %v8556_v58, 16  ;;  %v3221_v13 = vcombine.low %v3213_v18, %v3220_v8  ;;  %v2414_v36 = vpack.c.bf16 %v2406_v3, %v2405_v40  ;;  %v6455_v10 = vpack.c.bf16 %v2406_v3, %v2406_v3 }
 0x186   :  { %v2887_v1 = vsel %vm7650_vm15, %v9949_v34, %v9948_v41  ;;  %v2895_v50 = vsel %vm7650_vm15, %v9951_v42, %v9950_v29  ;;  %v7066_v38 = vpop.f32.mrb[55].mxu0  ;;  %v3222_v37 = vcombine.low %v2846_v61, %v2854_v28  ;;  %v9952_v41 = vshrl.u32 %v8549_v2, 16 }
 0x187   :  { %v3224_v57 = vcombine.low %v2879_v44, %v2887_v1  ;;  %v9953_v17 = vcombine.low %v8536_v6, %v8524_v21  ;;  %v2372_v42 = vadd.f32 %v2353_v4, %v8394_v22  ;;  %7075 = vmatprep.mubr.msk.bf16.mxu1 %vm3488_vm3, %v3221_v13  ;;  %v2675_v18 = vrot.slane %v2414_v36, %v7589_v11 }
 0x188   :  { %v2903_v54 = vsel %vm7650_vm15, %v9952_v41, %v2901_v45  ;;  %v2682_v28 = vrot.slane %v6455_v10, %v7589_v11  ;;  %v3232_v44 = vrot.slane %v3222_v37, %v7589_v11  ;;  %v2373_v40 = vadd.f32 %v2356_v35, %v8396_v20 }
 0x189   :  { %v3239_v34 = vrot.slane %v9953_v17, %v7589_v11  ;;  %v3246_v29 = vrot.slane %v3224_v57, %v7589_v11  ;;  %v3225_v61 = vcombine.low %v2895_v50, %v2903_v54  ;;  %v2393_v8 = vadd.f32 %v8401_v19, %v2372_v42 }
 0x18a   :  { %v8695_v21 = vcombine.high %v8549_v2, %v8549_v2  ;;  %v8699_v22 = vcombine.high %v8607_v24, %v8607_v24  ;;  %v2683_v6 = vcombine.high %v2675_v18, %v2675_v18  ;;  %v2684_v4 = vcombine.high %v2682_v28, %v2682_v28 }
 0x18b   :  { %v8702_v36 = vrot.slane %v2675_v18, %v7589_v11  ;;  %v8705_v10 = vrot.slane %v2682_v28, %v7589_v11  ;;  %v3253_v37 = vrot.slane %v3225_v61, %v7589_v11  ;;  %v3254_v3 = vcombine.low %v3232_v44, %v3239_v34 }
 0x18c   :  { %9954 = vst [vmem:[#allocation12_spill] sm:$0xff] %v8695_v21  ;;  %v2407_v20 = vmax.f32 %v2393_v8, 0.0  ;;  %v2394_v1 = vadd.f32 %v8401_v19, %v2373_v40  ;;  %v8710_v35 = vrot.slane %v2683_v6, %v7589_v11  ;;  %v8713_v50 = vrot.slane %v2684_v4, %v7589_v11 }
 0x18d   :  { %v2617_v45 = vcombine.high %v8617_v9, %v8617_v9  ;;  %v2904_v57 = vshrl.u32 %v8556_v58, 16  ;;  %v3255_v38 = vcombine.low %v3246_v29, %v3253_v37  ;;  %v3262_v13 = vrot.slane %v3254_v3, %v7589_v11 }
 0x18e   :  { %v2408_v41 = vmax.f32 %v2394_v1, 0.0  ;;  %v2909_v54 = vshll.u32 %v8695_v21, 16  ;;  %v8722_v19 = vcombine.high %v8710_v35, %v8710_v35  ;;  %v2912_v34 = vshrl.u32 %v8695_v21, 16 }
 0x18f   :  { %v2926_v42 = vshll.u32 %v8566_v12, 16  ;;  %v3269_v18 = vrot.slane %v3255_v38, %v7589_v11  ;;  %v9956_v44 = vshll.u32 %v8546_v47, 16  ;;  %v9957_v40 = vshrl.u32 %v8562_v16, 16  ;;  %v7404_v38 = vld [vmem:[%s9874_s3 + $0x8] sm:$0xff]  }
 0x190   :  { %9955 = vst [vmem:[#allocation13_spill] sm:$0xff] %v8722_v19  ;;  %v2415_v28 = vpack.c.bf16 %v2408_v41, %v2407_v20  ;;  %v6456_v61 = vpack.c.bf16 %v2408_v41, %v2408_v41  ;;  %v2911_v29 = vsel %vm7650_vm15, %v2904_v57, %v2909_v54  ;;  %v2929_v4 = vshrl.u32 %v8566_v12, 16 }
 0x191   :  { %v2919_v8 = vsel %vm7650_vm15, %v2912_v34, %v9956_v44  ;;  %v2928_v6 = vsel %vm7650_vm15, %v9957_v40, %v2926_v42  ;;  %v2934_v37 = vshll.u32 %v8579_v32, 16  ;;  %v3270_v3 = vcombine.low %v3262_v13, %v3269_v18 }
 0x192   :  { %v2724_v20 = vrot.slane %v2415_v28, %v7589_v11  ;;  %v2731_v1 = vrot.slane %v6456_v61, %v7589_v11  ;;  %v2937_v57 = vshrl.u32 %v8579_v32, 16  ;;  %v2942_v54 = vshll.u32 %v8607_v24, 16 }
 0x193   :  { %v2936_v41 = vsel %vm7650_vm15, %v2929_v4, %v2934_v37  ;;  %v2945_v34 = vshrl.u32 %v8607_v24, 16  ;;  %v2950_v42 = vshll.u32 %v8617_v9, 16  ;;  %7076 = vmatmul.mubr.msk.bf16.vlgmr.msra.gmra.mrb[28].mxu1 %vm3488_vm3, %v3270_v3  ;;  %v2953_v4 = vshrl.u32 %v8617_v9, 16 }
 0x194   :  { %v2732_v13 = vcombine.high %v2724_v20, %v2724_v20  ;;  %v2733_v18 = vcombine.high %v2731_v1, %v2731_v1  ;;  %v8753_v28 = vrot.slane %v2724_v20, %v7589_v11  ;;  %v8756_v61 = vrot.slane %v2731_v1, %v7589_v11  ;;  %7088 = vmatpush3.bf16.msra.mxu1 %v8383_v30 }
 0x195   :  { %v2944_v44 = vsel %vm7650_vm15, %v2937_v57, %v2942_v54  ;;  %v2952_v40 = vsel %vm7650_vm15, %v2945_v34, %v2950_v42  ;;  %v2958_v37 = vshll.u32 %v8699_v22, 16  ;;  %7089 = vmatprep.subr.bf16.mxu1 %v7404_v38  ;;  %v7405_v54 = vld [vmem:[%s9874_s3 + $0x10] sm:$0xff]   ;;  %v2961_v34 = vshrl.u32 %v8699_v22, 16 }
 0x196   :  { %9958 = vst [vmem:[#allocation14_spill] sm:$0xff] %v8753_v28  ;;  %v8766_v3 = vrot.slane %v2732_v13, %v7589_v11  ;;  %v8769_v20 = vrot.slane %v2733_v18, %v7589_v11  ;;  %v8773_v1 = vcombine.high %v8753_v28, %v8753_v28  ;;  %v2966_v42 = vshll.u32 %v2617_v45, 16 }
 0x197   :  { %v2960_v30 = vsel %vm7650_vm15, %v2953_v4, %v2958_v37  ;;  %v3271_v13 = vcombine.low %v2911_v29, %v2919_v8  ;;  %v3272_v21 = vcombine.low %v2928_v6, %v2936_v41  ;;  %v3273_v57 = vcombine.low %v2944_v44, %v2952_v40 }
 0x198   :  { %9959 = vst [vmem:[#allocation15_spill] sm:$0xff] %v8769_v20  ;;  %v8784_v18 = vcombine.high %v8766_v3, %v8766_v3  ;;  %v2968_v47 = vsel %vm7650_vm15, %v2961_v34, %v2966_v42  ;;  %v8792_v4 = vcombine.high %v8620_v63, %v8620_v63  ;;  %v8796_v45 = vcombine.high %v8637_v60, %v8637_v60 }
 0x199   :  { %v3281_v58 = vrot.slane %v3271_v13, %v7589_v11  ;;  %7090 = vmatpush3.bf16.msra.mxu1 %v7404_v38  ;;  %v3274_v29 = vcombine.low %v2960_v30, %v2968_v47  ;;  %v3288_v8 = vrot.slane %v3272_v21, %v7589_v11  ;;  %v3295_v6 = vrot.slane %v3273_v57, %v7589_v11  ;;  %v8814_v57 = vld [vmem:[%s9874_s3 + $0x38] sm:$0xff]  }
 0x19a   :  { %9960 = vst [vmem:[#allocation16_spill] sm:$0xff] %v8792_v4  ;;  %v2975_v41 = vshll.u32 %v8620_v63, 16  ;;  %7091 = vmatprep.subr.bf16.mxu1 %v7405_v54  ;;  %v2978_v44 = vshrl.u32 %v8620_v63, 16  ;;  %v2983_v40 = vshll.u32 %v8624_v26, 16  ;;  %v2986_v37 = vshrl.u32 %v8624_v26, 16  ;;  %9962 = vst [vmem:[#allocation17_spill] sm:$0xff] %v8814_v57 }
 0x19b   :  { %v2991_v34 = vshll.u32 %v8792_v4, 16  ;;  %v3302_v42 = vrot.slane %v3274_v29, %v7589_v11  ;;  %v3303_v13 = vcombine.low %v3281_v58, %v3288_v8  ;;  %v9961_v47 = vshrl.u32 %v8610_v48, 16 }
 0x19c   :  { %v2994_v38 = vshrl.u32 %v8792_v4, 16  ;;  %v2985_v30 = vsel %vm7650_vm15, %v2978_v44, %v2983_v40  ;;  %v2999_v58 = vshll.u32 %v8628_v56, 16  ;;  %v3002_v29 = vshrl.u32 %v8628_v56, 16 }
 0x19d   :  { %v2977_v21 = vsel %vm7650_vm15, %v9961_v47, %v2975_v41  ;;  %v2993_v17 = vsel %vm7650_vm15, %v2986_v37, %v2991_v34  ;;  %7092 = vmatpush3.bf16.msra.mxu1 %v7405_v54  ;;  %v3304_v8 = vcombine.low %v3295_v6, %v3302_v42  ;;  %v3311_v41 = vrot.slane %v3303_v13, %v7589_v11 }
 0x19e   :  { %v3007_v47 = vshll.u32 %v8637_v60, 16  ;;  %v3010_v4 = vshrl.u32 %v8637_v60, 16  ;;  %7384 = vmatprep.subr.msk.bf16.mxu1 %vm3507_vm2, %v8411_v5  ;;  %v3001_v44 = vsel %vm7650_vm15, %v2994_v38, %v2999_v58  ;;  %v3015_v40 = vshll.u32 %v8644_v33, 16 }
 0x19f   :  { %v3019_v37 = vshrl.u32 %v8796_v45, 16  ;;  %v3024_v34 = vshll.u32 %v8631_v7, 16  ;;  %v3318_v54 = vrot.slane %v3304_v8, %v7589_v11  ;;  %v3027_v42 = vshrl.u32 %v8631_v7, 16 }
 0x1a0   :  { %v3009_v6 = vsel %vm7650_vm15, %v3002_v29, %v3007_v47  ;;  %v3032_v13 = vshll.u32 %v8640_v46, 16  ;;  %v3017_v5 = vsel %vm7650_vm15, %v3010_v4, %v3015_v40  ;;  %v3320_v58 = vcombine.low %v2977_v21, %v2985_v30 }
 0x1a1   :  { %v3026_v38 = vsel %vm7650_vm15, %v3019_v37, %v3024_v34  ;;  %v3321_v33 = vcombine.low %v2993_v17, %v3001_v44  ;;  %7094 = vmatpush3.bf16.msra.mxu1 %v8426_v52  ;;  %v3319_v26 = vcombine.low %v3311_v41, %v3318_v54  ;;  %v3322_v55 = vcombine.low %v3009_v6, %v3017_v5 }
 0x1a2   :  { %v3034_v8 = vsel %vm7650_vm15, %v3027_v42, %v3032_v13  ;;  %v8846_v29 = vcombine.high %v8631_v7, %v8631_v7  ;;  %7107 = vmatprep.subr.bf16.mxu1 %v8814_v57  ;;  %v3330_v4 = vrot.slane %v3320_v58, %v7589_v11  ;;  %v8853_v17 = vcombine.high %v8640_v46, %v8640_v46 }
 0x1a3   :  { %v3323_v47 = vcombine.low %v3026_v38, %v3034_v8  ;;  %v3337_v40 = vrot.slane %v3321_v33, %v7589_v11  ;;  %7079 = vmatprep.mubr.msk.bf16.mxu1 %vm3488_vm3, %v3319_v26  ;;  %v3344_v52 = vrot.slane %v3322_v55, %v7589_v11  ;;  %v2713_v21 = vcombine.high %v8702_v36, %v8702_v36 }
 0x1a4   :  { %v8861_v30 = vcombine.high %v8705_v10, %v8705_v10  ;;  %v3035_v41 = vshrl.u32 %v8640_v46, 16  ;;  %v3040_v37 = vshll.u32 %v8846_v29, 16  ;;  %v3043_v34 = vshrl.u32 %v8846_v29, 16 }
 0x1a5   :  { %v3351_v44 = vrot.slane %v3323_v47, %v7589_v11  ;;  %v3352_v33 = vcombine.low %v3330_v4, %v3337_v40  ;;  %v3048_v26 = vshll.u32 %v8853_v17, 16  ;;  %v3051_v55 = vshrl.u32 %v8853_v17, 16 }
 0x1a6   :  { %9963 = vst [vmem:[#allocation18_spill] sm:$0xff] %v8861_v30  ;;  %v3056_v54 = vshll.u32 %v8702_v36, 16  ;;  %v3059_v6 = vshrl.u32 %v8702_v36, 16  ;;  %v3042_v5 = vsel %vm7650_vm15, %v3035_v41, %v3040_v37  ;;  %v3068_v38 = vshrl.u32 %v2713_v21, 16 }
 0x1a7   :  { %v3353_v42 = vcombine.low %v3344_v52, %v3351_v44  ;;  %v3360_v13 = vrot.slane %v3352_v33, %v7589_v11  ;;  %v3050_v58 = vsel %vm7650_vm15, %v3043_v34, %v3048_v26  ;;  %v9964_v47 = vshll.u32 %v8710_v35, 16 }
 0x1a8   :  { %v3058_v8 = vsel %vm7650_vm15, %v3051_v55, %v3056_v54  ;;  %v3073_v40 = vshll.u32 %v8722_v19, 16  ;;  %v3076_v44 = vshrl.u32 %v8722_v19, 16  ;;  %v3081_v41 = vshll.u32 %v8705_v10, 16 }
 0x1a9   :  { %v3066_v4 = vsel %vm7650_vm15, %v3059_v6, %v9964_v47  ;;  %v3367_v52 = vrot.slane %v3353_v42, %v7589_v11  ;;  %v3084_v21 = vshrl.u32 %v8705_v10, 16  ;;  %v3089_v37 = vshll.u32 %v8713_v50, 16 }
 0x1aa   :  { %v3075_v33 = vsel %vm7650_vm15, %v3068_v38, %v3073_v40  ;;  %v3092_v34 = vshrl.u32 %v8713_v50, 16  ;;  %v3097_v26 = vshll.u32 %v8861_v30, 16  ;;  %v3083_v54 = vsel %vm7650_vm15, %v3076_v44, %v3081_v41 }
 0x1ab   :  { %v3368_v55 = vcombine.low %v3360_v13, %v3367_v52  ;;  %v3369_v6 = vcombine.low %v3042_v5, %v3050_v58  ;;  %v3370_v42 = vcombine.low %v3058_v8, %v3066_v4  ;;  %v3091_v47 = vsel %vm7650_vm15, %v3084_v21, %v3089_v37 }
 0x1ac   :  { %v3099_v19 = vsel %vm7650_vm15, %v3092_v34, %v3097_v26  ;;  %v3371_v57 = vcombine.low %v3075_v33, %v3083_v54  ;;  %v8900_v38 = vcombine.high %v8713_v50, %v8713_v50  ;;  %v8907_v5 = vcombine.high %v8756_v61, %v8756_v61 }
 0x1ad   :  { %7080 = vmatmul.mubr.msk.bf16.gmra.mrb[32].mxu1 %vm3488_vm3, %v3368_v55  ;;  %v3372_v40 = vcombine.low %v3091_v47, %v3099_v19  ;;  %v3379_v13 = vrot.slane %v3369_v6, %v7589_v11  ;;  %v3386_v52 = vrot.slane %v3370_v42, %v7589_v11  ;;  %v2765_v8 = vcombine.high %v8769_v20, %v8769_v20 }
 0x1ae   :  { %9965 = vst [vmem:[#allocation19_spill] sm:$0xff] %v8900_v38  ;;  %v3393_v58 = vrot.slane %v3371_v57, %v7589_v11  ;;  %v3100_v4 = vshrl.u32 %v8861_v30, 16  ;;  %v3105_v44 = vshll.u32 %v8900_v38, 16  ;;  %v3108_v21 = vshrl.u32 %v8900_v38, 16 }
 0x1af   :  { %v3400_v41 = vrot.slane %v3372_v40, %v7589_v11  ;;  %v3401_v19 = vcombine.low %v3379_v13, %v3386_v52  ;;  %v3122_v33 = vshll.u32 %v8773_v1, 16  ;;  %v3125_v34 = vshrl.u32 %v8773_v1, 16 }
 0x1b0   :  { %v3107_v37 = vsel %vm7650_vm15, %v3100_v4, %v3105_v44  ;;  %v3130_v57 = vshll.u32 %v8784_v18, 16  ;;  %v3133_v26 = vshrl.u32 %v8784_v18, 16  ;;  %v9966_v6 = vshll.u32 %v8753_v28, 16 }
 0x1b1   :  { %v3402_v55 = vcombine.low %v3393_v58, %v3400_v41  ;;  %v3409_v54 = vrot.slane %v3401_v19, %v7589_v11  ;;  %v9967_v47 = vshrl.u32 %v8766_v3, 16  ;;  %v3138_v52 = vshll.u32 %v8756_v61, 16 }
 0x1b2   :  { %v3115_v42 = vsel %vm7650_vm15, %v3108_v21, %v9966_v6  ;;  %v3132_v13 = vsel %vm7650_vm15, %v3125_v34, %v3130_v57  ;;  %v3141_v4 = vshrl.u32 %v8756_v61, 16  ;;  %v3146_v58 = vshll.u32 %v8769_v20, 16 }
 0x1b3   :  { %v3124_v40 = vsel %vm7650_vm15, %v9967_v47, %v3122_v33  ;;  %v3416_v44 = vrot.slane %v3402_v55, %v7589_v11  ;;  %v3149_v41 = vshrl.u32 %v8769_v20, 16  ;;  %v3154_v19 = vshll.u32 %v8907_v5, 16 }
 0x1b4   :  { %v3157_v21 = vshrl.u32 %v8907_v5, 16  ;;  %v3140_v33 = vsel %vm7650_vm15, %v3133_v26, %v3138_v52  ;;  %v3148_v34 = vsel %vm7650_vm15, %v3141_v4, %v3146_v58  ;;  %v3162_v57 = vshll.u32 %v2765_v8, 16 }
 0x1b5   :  { %v3418_v6 = vcombine.low %v3107_v37, %v3115_v42  ;;  %v3417_v47 = vcombine.low %v3409_v54, %v3416_v44  ;;  %v3156_v38 = vsel %vm7650_vm15, %v3149_v41, %v3154_v19  ;;  %v3419_v28 = vcombine.low %v3124_v40, %v3132_v13 }
 0x1b6   :  { %v3420_v55 = vcombine.low %v3140_v33, %v3148_v34  ;;  %v3164_v30 = vsel %vm7650_vm15, %v3157_v21, %v3162_v57  ;;  %v3592_v20 = vcombine.low %v8418_v15, %v8429_v53  ;;  %v6522_v26 = vcombine.high %v8418_v15, %v8429_v53 }
 0x1b7   :  { %v3428_v62 = vrot.slane %v3418_v6, %v7589_v11  ;;  %7083 = vmatprep.mubr.msk.bf16.mxu1 %vm3488_vm3, %v3417_v47  ;;  %v3421_v8 = vcombine.low %v3156_v38, %v3164_v30  ;;  %v3435_v37 = vrot.slane %v3419_v28, %v7589_v11  ;;  %v3594_v42 = vcombine.low %v8421_v51, %v8432_v31 }
 0x1b8   :  { %v3442_v54 = vrot.slane %v3420_v55, %v7589_v11  ;;  %v3602_v40 = vrot.slane %v3592_v20, %v7589_v11  ;;  %v3609_v13 = vrot.slane %v6522_v26, %v7589_v11  ;;  %v3641_v15 = vcombine.low %v8489_v14, %v8502_v0 }
 0x1b9   :  { %v3449_v52 = vrot.slane %v3421_v8, %v7589_v11  ;;  %v3450_v30 = vcombine.low %v3428_v62, %v3435_v37  ;;  %v3616_v28 = vrot.slane %v3594_v42, %v7589_v11  ;;  %v3642_v38 = vcombine.low %v8507_v49, %v8478_v27 }
 0x1ba   :  { %v3623_v4 = vrot.slane %v3595_v39, %v7589_v11  ;;  %v3624_v58 = vcombine.low %v3602_v40, %v3609_v13  ;;  %v3651_v20 = vrot.slane %v3641_v15, %v7589_v11  ;;  %v6524_v62 = vcombine.high %v8539_v59, %v8549_v2 }
 0x1bb   :  { %v3451_v44 = vcombine.low %v3442_v54, %v3449_v52  ;;  %v3458_v41 = vrot.slane %v3450_v30, %v7589_v11  ;;  %v3658_v0 = vrot.slane %v3642_v38, %v7589_v11  ;;  %v3672_v49 = vrot.slane %v3644_v43, %v7589_v11 }
 0x1bc   :  { %v3625_v19 = vcombine.low %v3616_v28, %v3623_v4  ;;  %v3632_v21 = vrot.slane %v3624_v58, %v7589_v11  ;;  %v3691_v33 = vcombine.low %v8562_v16, %v8566_v12  ;;  %v3692_v6 = vcombine.low %v8579_v32, %v8607_v24 }
 0x1bd   :  { %v3465_v34 = vrot.slane %v3451_v44, %v7589_v11  ;;  %v3673_v57 = vcombine.low %v3651_v20, %v3658_v0  ;;  %v3693_v47 = vcombine.low %v8617_v9, %v8699_v22  ;;  %v3674_v26 = vcombine.low %v8531_v25, %v3672_v49 }
 0x1be   :  { %v3639_v55 = vrot.slane %v3625_v19, %v7589_v11  ;;  %v3700_v8 = vrot.slane %v6524_v62, %v7589_v11  ;;  %v3707_v37 = vrot.slane %v3691_v33, %v7589_v11  ;;  %v3714_v42 = vrot.slane %v3692_v6, %v7589_v11  ;;  %v7408_v6 = vld [vmem:[%s9874_s3 + $0x40] sm:$0xff]  }
 0x1bf   :  { %v3466_v54 = vcombine.low %v3458_v41, %v3465_v34  ;;  %v3681_v12 = vrot.slane %v3673_v57, %v7589_v11  ;;  %v3721_v39 = vrot.slane %v3693_v47, %v7589_v11  ;;  %v3688_v32 = vrot.slane %v3674_v26, %v7589_v11 }
 0x1c0   :  { %v3640_v40 = vcombine.low %v3632_v21, %v3639_v55  ;;  %v3722_v13 = vcombine.low %v3700_v8, %v3707_v37  ;;  %v3739_v22 = vcombine.low %v8610_v48, %v8620_v63  ;;  %v6525_v15 = vcombine.high %v8610_v48, %v8620_v63  ;;  %v9968_v8 = vld [vmem:[#allocation15_spill] sm:$0xff] }
 0x1c1   :  { %7084 = vmatmul.mubr.msk.bf16.gmra.mrb[36].mxu1 %vm3488_vm3, %v3466_v54  ;;  %v3723_v25 = vcombine.low %v3714_v42, %v3721_v39  ;;  %v3741_v52 = vcombine.low %v8628_v56, %v8637_v60  ;;  %v3742_v30 = vcombine.low %v8796_v45, %v8631_v7  ;;  %v3689_v28 = vcombine.low %v3681_v12, %v3688_v32 }
 0x1c2   :  { %7095 = vmatprep.mubr.msk.bf16.mxu1 %vm3488_vm3, %v3640_v40  ;;  %v3730_v38 = vrot.slane %v3722_v13, %v7589_v11  ;;  %v3749_v4 = vrot.slane %v3739_v22, %v7589_v11  ;;  %v3788_v58 = vcombine.low %v8640_v46, %v8846_v29  ;;  %v3756_v48 = vrot.slane %v6525_v15, %v7589_v11  ;;  %v9969_v13 = vld [vmem:[#allocation4_spill] sm:$0xff] }
 0x1c3   :  { %v3737_v43 = vrot.slane %v3723_v25, %v7589_v11  ;;  %v3763_v20 = vrot.slane %v3741_v52, %v7589_v11  ;;  %v3770_v44 = vrot.slane %v3742_v30, %v7589_v11  ;;  %v3789_v45 = vcombine.low %v8853_v17, %v8702_v36  ;;  %v7409_v52 = vld [vmem:[%s9874_s3 + $0x48] sm:$0xff]  }
 0x1c4   :  { %v6526_v41 = vcombine.high %v8702_v36, %v8710_v35  ;;  %v3791_v0 = vcombine.low %v8705_v10, %v8713_v50  ;;  %v3798_v62 = vrot.slane %v3788_v58, %v7589_v11  ;;  %v3771_v19 = vcombine.low %v3749_v4, %v3756_v48  ;;  %v9972_v4 = vld [vmem:[#allocation3_spill] sm:$0xff] }
 0x1c5   :  { %v3738_v29 = vcombine.low %v3730_v38, %v3737_v43  ;;  %v3772_v21 = vcombine.low %v3763_v20, %v3770_v44  ;;  %v6527_v49 = vcombine.high %v8705_v10, %v8713_v50  ;;  %v3805_v33 = vrot.slane %v3789_v45, %v7589_v11 }
 0x1c6   :  { %v3812_v34 = vrot.slane %v6526_v41, %v7589_v11  ;;  %v3819_v17 = vrot.slane %v3791_v0, %v7589_v11  ;;  %v3838_v57 = vcombine.low %v8766_v3, %v8773_v1  ;;  %v3779_v47 = vrot.slane %v3771_v19, %v7589_v11  ;;  %v9974_v19 = vld [vmem:[#allocation8_spill] sm:$0xff] }
 0x1c7   :  { %v3786_v55 = vrot.slane %v3772_v21, %v7589_v11  ;;  %v3839_v26 = vcombine.low %v8784_v18, %v8756_v61  ;;  %v3840_v37 = vcombine.low %v9968_v8, %v8907_v5  ;;  %v3820_v54 = vcombine.low %v3798_v62, %v3805_v33  ;;  %v9970_v18 = vld [vmem:[#allocation17_spill] sm:$0xff] }
 0x1c8   :  { %v3821_v12 = vcombine.low %v3812_v34, %v3819_v17  ;;  %v3847_v42 = vrot.slane %v6527_v49, %v7589_v11  ;;  %v3854_v1 = vrot.slane %v3838_v57, %v7589_v11  ;;  %v4017_v22 = vcombine.low %v8429_v53, %v9969_v13  ;;  %v9973_v62 = vld [vmem:[#allocation5_spill] sm:$0xff] }
 0x1c9   :  { %7096 = vmatmul.mubr.msk.bf16.vlgmr.msra.gmra.mrb[28].mxu1 %vm3488_vm3, %v3689_v28  ;;  %v3787_v39 = vcombine.low %v3779_v47, %v3786_v55  ;;  %v3861_v40 = vrot.slane %v3839_v26, %v7589_v11  ;;  %v3868_v32 = vrot.slane %v3840_v37, %v7589_v11  ;;  %v3828_v5 = vrot.slane %v3820_v54, %v7589_v11  ;;  %v9971_v28 = vld [vmem:[#allocation7_spill] sm:$0xff]  ;;  %v9977_v47 = vld [vmem:[#allocation9_spill] sm:$0xff]  ;;  %v9978_v55 = vld [vmem:[#allocation12_spill] sm:$0xff] }
 0x1ca   :  { %7108 = vmatpush3.bf16.msra.mxu1 %v9970_v18  ;;  %7099 = vmatprep.mubr.msk.bf16.mxu1 %vm3488_vm3, %v3738_v29  ;;  %v3835_v25 = vrot.slane %v3821_v12, %v7589_v11  ;;  %v3869_v15 = vcombine.low %v3847_v42, %v3854_v1  ;;  %v4018_v38 = vcombine.low %v9971_v28, %v8421_v51  ;;  %v9981_v18 = vld [vmem:[#allocation11_spill] sm:$0xff] }
 0x1cb   :  { %7109 = vmatprep.subr.bf16.mxu1 %v7408_v6  ;;  %v3870_v30 = vcombine.low %v3861_v40, %v3868_v32  ;;  %v4019_v53 = vcombine.low %v8432_v31, %v9972_v4  ;;  %v4020_v58 = vcombine.low %v8475_v23, %v8489_v14  ;;  %v4027_v20 = vrot.slane %v4017_v22, %v7589_v11  ;;  %v7410_v31 = vld [vmem:[%s9874_s3 + $0x50] ss:$0 sps:$4 sm:$0xff]   ;;  %v9979_v32 = vld [vmem:[#allocation10_spill] sm:$0xff] }
 0x1cc   :  { %v3836_v43 = vcombine.low %v3828_v5, %v3835_v25  ;;  %v3877_v48 = vrot.slane %v3869_v15, %v7589_v11  ;;  %v6545_v44 = vcombine.high %v8475_v23, %v8489_v14  ;;  %v4034_v41 = vrot.slane %v4018_v38, %v7589_v11  ;;  %v9975_v23 = vld [vmem:[#allocation6_spill] sm:$0xff] }
 0x1cd   :  { %v3884_v45 = vrot.slane %v3870_v30, %v7589_v11  ;;  %v4041_v51 = vrot.slane %v4019_v53, %v7589_v11  ;;  %v4048_v0 = vrot.slane %v4020_v58, %v7589_v11  ;;  %v4068_v29 = vcombine.low %v9973_v62, %v8539_v59  ;;  %v9982_v58 = vld [vmem:[#allocation13_spill] sm:$0xff] }
 0x1ce   :  { %7110 = vmatpush3.bf16.msra.mxu1 %v7408_v6  ;;  %v4069_v21 = vcombine.low %v8549_v2, %v9974_v19  ;;  %v9976_v14 = vcombine.low %v8478_v27, %v9975_v23  ;;  %v4049_v34 = vcombine.low %v4027_v20, %v4034_v41  ;;  %v4076_v57 = vrot.slane %v6545_v44, %v7589_v11  ;;  %v9984_v20 = vld [vmem:[#allocation18_spill] sm:$0xff]  ;;  %v9986_v41 = vld [vmem:[#allocation19_spill] sm:$0xff] }
 0x1cf   :  { %7111 = vmatprep.subr.bf16.mxu1 %v7409_v52  ;;  %v3885_v33 = vcombine.low %v3877_v48, %v3884_v45  ;;  %v4050_v17 = vcombine.low %v4041_v51, %v4048_v0  ;;  %v4115_v59 = vcombine.low %v9978_v55, %v9977_v47  ;;  %v4117_v2 = vcombine.low %v8607_v24, %v8617_v9  ;;  %v9985_v45 = vld [vmem:[#allocation14_spill] sm:$0xff] }
 0x1d0   :  { %v9073_v49 = vrot.slane %v9976_v14, %v7589_v11  ;;  %v4097_v6 = vrot.slane %v4069_v21, %v7589_v11  ;;  %v4090_v26 = vrot.slane %v4068_v29, %v7589_v11  ;;  %v6546_v37 = vcombine.high %v9977_v47, %v8562_v16 }
 0x1d1   :  { %7100 = vmatmul.mubr.msk.bf16.gmra.mrb[32].mxu1 %vm3488_vm3, %v3787_v39  ;;  %v4064_v27 = vrot.slane %v4050_v17, %v7589_v11  ;;  %v6547_v54 = vcombine.high %v8607_v24, %v8617_v9  ;;  %v4057_v12 = vrot.slane %v4049_v34, %v7589_v11  ;;  %v4351_v42 = vsel %vm3507_vm2, %v7410_v31, 0  ;;  %v9980_v9 = vld [vmem:[#allocation16_spill] sm:$0xff] }
 0x1d2   :  { %7103 = vmatprep.mubr.msk.bf16.mxu1 %vm3488_vm3, %v3836_v43  ;;  %7112 = vmatpush3.bf16.msra.mxu1 %v7409_v52  ;;  %v4099_v1 = vcombine.low %v4090_v26, %v4097_v6  ;;  %v4139_v39 = vrot.slane %v4117_v2, %v7589_v11  ;;  %v4164_v16 = vcombine.low %v8620_v63, %v9979_v32  ;;  %v9983_v48 = vmov 0.0   ;;  %v7418_v32 = vld [vmem:[%s9876_s5 + $0x10] sm:$0xff]  }
 0x1d3   :  { %7385 = vmatprep.subr.msk.bf16.mxu1 %vm3507_vm2, %v7410_v31  ;;  %v4146_v40 = vrot.slane %v6547_v54, %v7589_v11  ;;  %v4098_v13 = vcombine.low %v4076_v57, %v9073_v49  ;;  %v4125_v24 = vrot.slane %v4115_v59, %v7589_v11  ;;  %v4165_v22 = vcombine.low %v9980_v9, %v8628_v56  ;;  %v7422_v9 = vld [vmem:[%s9876_s5 + $0x28] sm:$0xff]  }
 0x1d4   :  { %v4166_v5 = vcombine.low %v8637_v60, %v9981_v18  ;;  %v4065_v25 = vcombine.low %v4057_v12, %v4064_v27  ;;  %v4132_v15 = vrot.slane %v6546_v37, %v7589_v11  ;;  %v4167_v52 = vcombine.low %v8631_v7, %v8640_v46 }
 0x1d5   :  { %v6548_v30 = vcombine.high %v8631_v7, %v8640_v46  ;;  %v4148_v63 = vcombine.low %v4139_v39, %v4146_v40  ;;  %v4174_v28 = vrot.slane %v4164_v16, %v7589_v11  ;;  %v4181_v38 = vrot.slane %v4165_v22, %v7589_v11  ;;  %v7416_v39 = vld [vmem:[%s9876_s5 + $0x8] sm:$0xff]   ;;  %v7417_v40 = vld [vmem:[%s9876_s5 + $0x50] sm:$0xff]   ;;  %v7419_v16 = vld [vmem:[%s9876_s5 + $0x18] sm:$0xff]  }
 0x1d6   :  { %7114 = vmatpush3.bf16.msra.mxu1 %v4351_v42  ;;  %v4188_v56 = vrot.slane %v4166_v5, %v7589_v11  ;;  %v4113_v4 = vrot.slane %v4099_v1, %v7589_v11  ;;  %v4195_v60 = vrot.slane %v4167_v52, %v7589_v11  ;;  %v4214_v53 = vcombine.low %v8702_v36, %v8710_v35  ;;  %v7413_v42 = vld [vmem:[%s9876_s5 + $0x40] sm:$0xff]  }
 0x1d7   :  { %v4215_v43 = vcombine.low %v9982_v58, %v8705_v10  ;;  %7143 = vmatprep.subr.bf16.mxu1 %v9983_v48  ;;  %v4147_v7 = vcombine.low %v4125_v24, %v4132_v15  ;;  %v4196_v46 = vcombine.low %v4174_v28, %v4181_v38  ;;  %v4216_v44 = vcombine.low %v8713_v50, %v9984_v20  ;;  %v7415_v1 = vld [vmem:[%s9876_s5] sm:$0xff]  }
 0x1d8   :  { %v4262_v51 = vcombine.low %v9986_v41, %v9985_v45  ;;  %v4197_v0 = vcombine.low %v4188_v56, %v4195_v60  ;;  %v4223_v31 = vrot.slane %v6548_v30, %v7589_v11  ;;  %v4230_v36 = vrot.slane %v4214_v53, %v7589_v11  ;;  %7132 = vmatpush3.bf16.msra.mxu0 %v7413_v42  ;;  %v7421_v24 = vld [vmem:[%s9876_s5 + $0x20] sm:$0xff]  }
 0x1d9   :  { %7104 = vmatmul.mubr.msk.bf16.gmra.mrb[36].mxu1 %vm3488_vm3, %v3885_v33  ;;  %v4237_v35 = vrot.slane %v4215_v43, %v7589_v11  ;;  %v4162_v10 = vrot.slane %v4148_v63, %v7589_v11  ;;  %v4244_v62 = vrot.slane %v4216_v44, %v7589_v11  ;;  %v6549_v50 = vcombine.high %v9985_v45, %v8766_v3  ;;  %v9196_v5 = vld [vmem:[%s9877_s4] ss:$0 sm:$0xff] }
 0x1da   :  { %7115 = vmatprep.mubr.msk.bf16.mxu1 %vm3488_vm3, %v4065_v25  ;;  %v4264_v29 = vcombine.low %v8756_v61, %v9968_v8  ;;  %v4204_v19 = vrot.slane %v4196_v46, %v7589_v11  ;;  %v4211_v21 = vrot.slane %v4197_v0, %v7589_v11  ;;  %v4245_v23 = vcombine.low %v4223_v31, %v4230_v36  ;;  %v9987_v58 = vld [vmem:[#allocation2_spill] sm:$0xff] }
 0x1db   :  { %v6550_v14 = vcombine.high %v8756_v61, %v9968_v8  ;;  %v4246_v49 = vcombine.low %v4237_v35, %v4244_v62  ;;  %v4272_v33 = vrot.slane %v4262_v51, %v7589_v11  ;;  %v4279_v34 = vrot.slane %v6549_v50, %v7589_v11  ;;  %7133 = vmatprep.subr.bf16.mxu0 %v9983_v48 }
 0x1dc   :  { %v4286_v17 = vrot.slane %v4264_v29, %v7589_v11  ;;  %v4106_v3 = vrot.slane %v4098_v13, %v7589_v11  ;;  %v4212_v57 = vcombine.low %v4204_v19, %v4211_v21  ;;  %v4155_v47 = vrot.slane %v4147_v7, %v7589_v11  ;;  %v7420_v13 = vld [vmem:[%s9876_s5 + $0x58] sm:$0xff]  }
 0x1dd   :  { %v4293_v6 = vrot.slane %v6550_v14, %v7589_v11  ;;  %v4253_v55 = vrot.slane %v4245_v23, %v7589_v11  ;;  %v4260_v59 = vrot.slane %v4246_v49, %v7589_v11  ;;  %v4294_v2 = vcombine.low %v4272_v33, %v4279_v34 }
 0x1de   :  { %v4114_v61 = vcombine.low %v4106_v3, %v4113_v4  ;;  %v4163_v27 = vcombine.low %v4155_v47, %v4162_v10  ;;  %v7502_v22 = vmov 1983009808  }
 0x1df   :  { %v4295_v8 = vcombine.low %v4286_v17, %v4293_v6  ;;  %v4261_v26 = vcombine.low %v4253_v55, %v4260_v59  ;;  %v4302_v37 = vrot.slane %v4294_v2, %v7589_v11  ;;  %v4491_v18 = vunpack.c.l.s4 %v7502_v22 }
 0x1e1   :  { %7116 = vmatmul.mubr.msk.bf16.vlgmr.msra.gmra.mrb[28].mxu1 %vm3488_vm3, %v4114_v61  ;;  %v4309_v54 = vrot.slane %v4295_v8, %v7589_v11  ;;  %v7414_v11 = vld [vmem:[%s9876_s5 + $0x48] sm:$0xff]   ;;  %v4492_v30 = vunpack.c.0.s8 %v4491_v18 }
 0x1e2   :  { %7119 = vmatprep.mubr.msk.bf16.mxu1 %vm3488_vm3, %v4163_v27  ;;  %7134 = vmatpush3.bf16.msra.mxu0 %v7414_v11 }
 0x1e3   :  { %v4310_v12 = vcombine.low %v4302_v37, %v4309_v54  ;;  %7135 = vmatprep.subr.bf16.mxu0 %v9983_v48  ;;  %7144 = vmatpush3.bf16.msra.mxu1 %v7415_v1  ;;  %v9203_v43 = vsub.s32 %v4492_v30, %v9987_v58 }
 0x1e4   :  { %7145 = vmatprep.subr.bf16.mxu1 %v9983_v48 }
 0x1e6   :  { %7136 = vmatpush3.bf16.msra.mxu0 %v7417_v40 }
 0x1e7   :  { %7146 = vmatpush3.bf16.msra.mxu1 %v7416_v39  ;;  %7137 = vmatprep.subr.bf16.mxu0 %v9983_v48 }
 0x1e8   :  { %7147 = vmatprep.subr.bf16.mxu1 %v9983_v48 }
 0x1e9   :  { %7120 = vmatmul.mubr.msk.bf16.gmra.mrb[32].mxu1 %vm3488_vm3, %v4212_v57 }
 0x1ea   :  { %7123 = vmatprep.mubr.msk.bf16.mxu1 %vm3488_vm3, %v4261_v26  ;;  %7138 = vmatpush3.bf16.msra.mxu0 %v7420_v13 }
 0x1eb   :  { %7148 = vmatpush3.bf16.msra.mxu1 %v7418_v32  ;;  %7159 = vmatprep.subr.bf16.mxu0 %v9983_v48 }
 0x1ec   :  { %7149 = vmatprep.subr.bf16.mxu1 %v9983_v48 }
 0x1ef   :  { %7150 = vmatpush3.bf16.msra.mxu1 %v7419_v16 }
 0x1f0   :  { %7151 = vmatprep.subr.bf16.mxu1 %v9983_v48 }
 0x1f1   :  { %7124 = vmatmul.mubr.msk.bf16.gmra.mrb[36].mxu1 %vm3488_vm3, %v4310_v12 }
 0x1f2   :  { %7155 = vmatprep.mubr.msk.bf16.mxu1 %vm7501_vm0, %v9983_v48 }
 0x1f3   :  { %7152 = vmatpush3.bf16.msra.mxu1 %v7421_v24 }
 0x1f4   :  { %7153 = vmatprep.subr.bf16.mxu1 %v9983_v48 }
 0x1f7   :  { %7154 = vmatpush3.bf16.msra.mxu1 %v7422_v9 }
 0x1f8   :  { %7175 = vmatprep.subr.bf16.mxu1 %v9983_v48 }
 0x2b4   :  { %v7117_v25 = vpop.f32.mrb[28].mxu1 }
 0x2b5   :  { %v4455_v15 = vadd.f32 %v7117_v25, %v9196_v5  ;;  %v4387_v52 = vpop.f32.mrb[29].mxu1 }
 0x2b6   :  { %v4453_v63 = vadd.f32 %v9196_v5, %v4387_v52  ;;  %v7118_v28 = vpop.f32.mrb[30].mxu1 }
 0x2b7   :  { %v4456_v38 = vadd.f32 %v7118_v28, %v9196_v5  ;;  %v4390_v56 = vpop.f32.mrb[31].mxu1  ;;  %v4467_v60 = vmax.f32 %v4455_v15, 0.0 }
 0x2b8   :  { %v4454_v4 = vadd.f32 %v9196_v5, %v4390_v56  ;;  %v4465_v7 = vmax.f32 %v4453_v63, 0.0 }
 0x2b9   :  { %v4468_v53 = vmax.f32 %v4456_v38, 0.0 }
 0x2ba   :  { %v4466_v46 = vmax.f32 %v4454_v4, 0.0 }
 0x2bb   :  { %v4478_v20 = vpack.c.bf16 %v4468_v53, %v4467_v60  ;;  %v6563_v44 = vpack.c.bf16 %v4468_v53, %v4468_v53 }
 0x2bc   :  { %v4477_v45 = vpack.c.bf16 %v4466_v46, %v4465_v7  ;;  %v6562_v41 = vpack.c.bf16 %v4466_v46, %v4466_v46  ;;  %v7121_v51 = vpop.f32.mrb[32].mxu1 }
 0x2bd   :  { %v4513_v0 = vrot.slane %v4478_v20, %v9203_v43  ;;  %v4520_v31 = vrot.slane %v6563_v44, %v9203_v43  ;;  %v4403_v36 = vpop.f32.mrb[33].mxu1  ;;  %v9210_v62 = vadd.f32 %v7121_v51, %v9196_v5 }
 0x2be   :  { %v4496_v35 = vrot.slane %v4477_v45, %v9203_v43  ;;  %v4503_v10 = vrot.slane %v6562_v41, %v9203_v43  ;;  %v9212_v50 = vpop.f32.mrb[34].mxu1  ;;  %v9225_v61 = vadd.f32 %v9196_v5, %v4403_v36 }
 0x2bf   :  { %v4521_v29 = vcombine.high %v4513_v0, %v4513_v0  ;;  %v4522_v19 = vcombine.high %v4520_v31, %v4520_v31  ;;  %v4636_v21 = vrot.slane %v4520_v31, %v9203_v43  ;;  %v5118_v23 = vrot.slane %v4513_v0, %v9203_v43  ;;  %v9216_v14 = vpop.f32.mrb[35].mxu1 }
 0x2c0   :  { %v4504_v49 = vcombine.high %v4496_v35, %v4496_v35  ;;  %v4505_v33 = vcombine.high %v4503_v10, %v4503_v10  ;;  %v4622_v34 = vrot.slane %v4496_v35, %v9203_v43  ;;  %v5607_v17 = vrot.slane %v4503_v10, %v9203_v43 }
 0x2c1   :  { %v4674_v3 = vunpack.c.l.b16 %v4636_v21  ;;  %v5125_v57 = vrot.slane %v4522_v19, %v9203_v43  ;;  %v5162_v6 = vunpack.c.l.b16 %v5118_v23  ;;  %v5614_v47 = vrot.slane %v4521_v29, %v9203_v43 }
 0x2c2   :  { %v4629_v55 = vrot.slane %v4505_v33, %v9203_v43  ;;  %v4672_v59 = vunpack.c.l.b16 %v4622_v34  ;;  %v5111_v2 = vrot.slane %v4504_v49, %v9203_v43  ;;  %v5657_v37 = vunpack.c.l.b16 %v5607_v17 }
 0x2c3   :  { %v4683_v8 = vrot.slane %v4674_v3, 7  ;;  %v4784_v27 = vrot.slane %v4674_v3, 6  ;;  %v5163_v26 = vunpack.c.l.b16 %v5125_v57  ;;  %v5000_v54 = vrot.slane %v4674_v3, 1 }
 0x2c4   :  { %v5169_v12 = vrot.slane %v5162_v6, 7  ;;  %v5386_v42 = vrot.slane %v5162_v6, 1  ;;  %v5658_v11 = vunpack.c.l.b16 %v5614_v47  ;;  %v7125_v1 = vpop.f32.mrb[36].mxu1  ;;  %v5494_v32 = vrot.slane %v5162_v6, 2 }
 0x2c5   :  { %v5171_v39 = vrot.slane %v5163_v26, 6  ;;  %v5279_v40 = vrot.slane %v5163_v26, 7  ;;  %v4673_v16 = vunpack.c.l.b16 %v4629_v55  ;;  %v4419_v13 = vpop.f32.mrb[37].mxu1  ;;  %v4680_v18 = vrot.slane %v4672_v59, 1 }
 0x2c6   :  { %v5665_v24 = vrot.slane %v5658_v11, 7  ;;  %v5882_v9 = vrot.slane %v5658_v11, 1  ;;  %v5990_v22 = vrot.slane %v5658_v11, 2  ;;  %v7126_v25 = vpop.f32.mrb[38].mxu1  ;;  %v4889_v52 = vrot.slane %v4672_v59, 2 }
 0x2c7   :  { %v4782_v15 = vrot.slane %v4673_v16, 7  ;;  %v4890_v30 = vrot.slane %v4673_v16, 1  ;;  %v4997_v63 = vrot.slane %v4672_v59, 3  ;;  %v4422_v28 = vpop.f32.mrb[39].mxu1  ;;  %v4682_v38 = vsel %vm4681_vm4, %v4673_v16, %v4680_v18 }
 0x2c8   :  { %v4998_v56 = vrot.slane %v4673_v16, 2  ;;  %v5161_v4 = vunpack.c.l.b16 %v5111_v2  ;;  %v9229_v60 = vsel %vm4681_vm4, %v5665_v24, %v5657_v37  ;;  %v9232_v53 = vsel %vm4684_vm5, %v4683_v8, %v4682_v38 }
 0x2c9   :  { %v4783_v58 = vsel %vm4681_vm4, %v4782_v15, %v4672_v59  ;;  %v4891_v7 = vsel %vm4681_vm4, %v4890_v30, %v4889_v52  ;;  %v5773_v46 = vrot.slane %v5657_v37, 1  ;;  %v5496_v35 = vrot.slane %v5163_v26, 1 }
 0x2ca   :  { %v9237_v20 = vsel %vm4684_vm5, %v4784_v27, %v4783_v58  ;;  %v9240_v44 = vsel %vm4684_vm5, %v4674_v3, %v4891_v7  ;;  %v4999_v45 = vsel %vm4681_vm4, %v4998_v56, %v4997_v63  ;;  %v5170_v41 = vsel %vm4681_vm4, %v5169_v12, %v5161_v4 }
 0x2cb   :  { %v9245_v51 = vsel %vm4684_vm5, %v5171_v39, %v5170_v41  ;;  %v5277_v0 = vrot.slane %v5161_v4, 1  ;;  %v5385_v31 = vrot.slane %v5161_v4, 2  ;;  %v5493_v36 = vrot.slane %v5161_v4, 3 }
 0x2cc   :  { %v9248_v10 = vsel %vm4681_vm4, %v5658_v11, %v5773_v46  ;;  %v5881_v29 = vrot.slane %v5657_v37, 2  ;;  %v5989_v19 = vrot.slane %v5657_v37, 3  ;;  %v4471_v49 = vmax.f32 %v9210_v62, 0.0 }
 0x2cd   :  { %v5278_v21 = vsel %vm4681_vm4, %v5162_v6, %v5277_v0  ;;  %v5387_v23 = vsel %vm4681_vm4, %v5386_v42, %v5385_v31  ;;  %v4460_v33 = vadd.f32 %v9212_v50, %v9196_v5  ;;  %v4458_v17 = vadd.f32 %v9196_v5, %v9216_v14 }
 0x2ce   :  { %v9256_v34 = vsel %vm4681_vm4, %v5990_v22, %v5989_v19  ;;  %v5001_v3 = vsel %vm4684_vm5, %v5000_v54, %v4999_v45  ;;  %v5280_v57 = vsel %vm4684_vm5, %v5279_v40, %v5278_v21  ;;  %v5388_v6 = vsel %vm4684_vm5, %v5163_v26, %v5387_v23 }
 0x2cf   :  { %v4472_v47 = vmax.f32 %v4460_v33, 0.0  ;;  %v5495_v55 = vsel %vm4681_vm4, %v5494_v32, %v5493_v36  ;;  %v9265_v62 = vsel %vm4681_vm4, %v5882_v9, %v5881_v29  ;;  %v4469_v50 = vmax.f32 %v9225_v61, 0.0 }
 0x2d0   :  { %v4470_v59 = vmax.f32 %v4458_v17, 0.0  ;;  %v5497_v2 = vsel %vm4684_vm5, %v5496_v35, %v5495_v55  ;;  %v4463_v11 = vadd.f32 %v7125_v1, %v9196_v5  ;;  %v9275_v39 = vadd.f32 %v9196_v5, %v4419_v13 }
 0x2d1   :  { %v4480_v8 = vpack.c.bf16 %v4472_v47, %v4471_v49  ;;  %v6565_v27 = vpack.c.bf16 %v4472_v47, %v4472_v47  ;;  %v4464_v1 = vadd.f32 %v7126_v25, %v9196_v5  ;;  %v4462_v13 = vadd.f32 %v9196_v5, %v4422_v28 }
 0x2d2   :  { %v4479_v14 = vpack.c.bf16 %v4470_v59, %v4469_v50  ;;  %v6564_v37 = vpack.c.bf16 %v4470_v59, %v4470_v59  ;;  %v4475_v7 = vmax.f32 %v4463_v11, 0.0  ;;  %v4473_v25 = vmax.f32 %v9275_v39, 0.0 }
 0x2d3   :  { %v4547_v54 = vrot.slane %v4480_v8, %v9203_v43  ;;  %v4554_v12 = vrot.slane %v6565_v27, %v9203_v43  ;;  %v4476_v45 = vmax.f32 %v4464_v1, 0.0  ;;  %v4474_v5 = vmax.f32 %v4462_v13, 0.0 }
 0x2d4   :  { %v4530_v26 = vrot.slane %v4479_v14, %v9203_v43  ;;  %v4537_v42 = vrot.slane %v6564_v37, %v9203_v43 }
 0x2d5   :  { %v4555_v61 = vcombine.high %v4547_v54, %v4547_v54  ;;  %v4556_v40 = vcombine.high %v4554_v12, %v4554_v12  ;;  %v4650_v32 = vrot.slane %v4547_v54, %v9203_v43  ;;  %v5635_v16 = vrot.slane %v4554_v12, %v9203_v43 }
 0x2d6   :  { %v4538_v24 = vcombine.high %v4530_v26, %v4530_v26  ;;  %v4539_v9 = vcombine.high %v4537_v42, %v4537_v42  ;;  %v5132_v22 = vrot.slane %v4537_v42, %v9203_v43  ;;  %v5621_v18 = vrot.slane %v4530_v26, %v9203_v43 }
 0x2d7   :  { %v4657_v15 = vrot.slane %v4556_v40, %v9203_v43  ;;  %v5139_v52 = vrot.slane %v4555_v61, %v9203_v43  ;;  %v9285_v30 = vunpack.c.l.b16 %v4650_v32  ;;  %v9293_v46 = vunpack.c.l.b16 %v5635_v16 }
 0x2d8   :  { %v5628_v63 = vrot.slane %v4539_v9, %v9203_v43  ;;  %v4643_v38 = vrot.slane %v4538_v24, %v9203_v43  ;;  %v5164_v56 = vunpack.c.l.b16 %v5132_v22  ;;  %v5659_v31 = vunpack.c.l.b16 %v5621_v18 }
 0x2d9   :  { %v9289_v4 = vunpack.c.l.b16 %v4657_v15  ;;  %v9291_v58 = vunpack.c.l.b16 %v5139_v52  ;;  %v4689_v28 = vrot.slane %v9285_v30, 5  ;;  %v4788_v41 = vrot.slane %v9285_v30, 4 }
 0x2da   :  { %v4895_v36 = vrot.slane %v9285_v30, 6  ;;  %v5003_v35 = vrot.slane %v9285_v30, 7  ;;  %v4675_v29 = vunpack.c.l.b16 %v4643_v38  ;;  %v5173_v19 = vrot.slane %v5164_v56, 5 }
 0x2db   :  { %v5499_v0 = vrot.slane %v9291_v58, 7  ;;  %v4692_v21 = vrot.slane %v9289_v4, 4  ;;  %v5281_v23 = vrot.slane %v5164_v56, 6  ;;  %v5389_v49 = vrot.slane %v5164_v56, 7 }
 0x2dc   :  { %v5498_v33 = vsel %vm4687_vm6, %v5164_v56, %v5497_v2  ;;  %v4686_v17 = vrot.slane %v4675_v29, 6  ;;  %v4786_v47 = vrot.slane %v4675_v29, 5  ;;  %v5002_v55 = vsel %vm4687_vm6, %v4675_v29, %v5001_v3 }
 0x2dd   :  { %v9304_v50 = vunpack.c.l.b16 %v5628_v63  ;;  %v9308_v59 = vsel %vm4687_vm6, %v5173_v19, %v9245_v51  ;;  %v9311_v8 = vsel %vm4687_vm6, %v5281_v23, %v5280_v57  ;;  %v9314_v27 = vsel %vm4687_vm6, %v5389_v49, %v5388_v6 }
 0x2de   :  { %v9317_v14 = vsel %vm4690_vm7, %v5499_v0, %v5498_v33  ;;  %v4790_v2 = vrot.slane %v9289_v4, 3  ;;  %v4688_v3 = vsel %vm4687_vm6, %v4686_v17, %v9232_v53  ;;  %v4787_v37 = vsel %vm4687_vm6, %v4786_v47, %v9237_v20 }
 0x2df   :  { %v5667_v54 = vrot.slane %v5659_v31, 6  ;;  %v4691_v51 = vsel %vm4690_vm7, %v4689_v28, %v4688_v3  ;;  %v4789_v57 = vsel %vm4690_vm7, %v4788_v41, %v4787_v37  ;;  %v4893_v12 = vrot.slane %v4675_v29, 7 }
 0x2e0   :  { %v5775_v26 = vrot.slane %v5659_v31, 7  ;;  %v5884_v42 = vsel %vm4684_vm5, %v5659_v31, %v9265_v62  ;;  %v5885_v11 = vrot.slane %v9304_v50, 7  ;;  %v5992_v53 = vrot.slane %v5659_v31, 1 }
 0x2e1   :  { %v9328_v6 = vsel %vm4684_vm5, %v5667_v54, %v9229_v60  ;;  %v4482_v39 = vpack.c.bf16 %v4476_v45, %v4475_v7  ;;  %v6567_v61 = vpack.c.bf16 %v4476_v45, %v4476_v45  ;;  %v4481_v40 = vpack.c.bf16 %v4474_v5, %v4473_v25 }
 0x2e2   :  { %v9335_v20 = vsel %vm4684_vm5, %v5775_v26, %v9248_v10  ;;  %v9338_v32 = vsel %vm4687_vm6, %v5885_v11, %v5884_v42  ;;  %v5993_v60 = vsel %vm4684_vm5, %v5992_v53, %v9256_v34  ;;  %v6566_v16 = vpack.c.bf16 %v4474_v5, %v4474_v5 }
 0x2e3   :  { %v4694_v24 = vsel %vm4693_vm8, %v4692_v21, %v4691_v51  ;;  %v9345_v62 = vsel %vm4687_vm6, %v9304_v50, %v5993_v60  ;;  %v4581_v9 = vrot.slane %v4482_v39, %v9203_v43  ;;  %v4588_v10 = vrot.slane %v6567_v61, %v9203_v43 }
 0x2e4   :  { %v4564_v22 = vrot.slane %v4481_v40, %v9203_v43  ;;  %v4571_v18 = vrot.slane %v6566_v16, %v9203_v43  ;;  %v4791_v15 = vsel %vm4693_vm8, %v4790_v2, %v4789_v57  ;;  %v4894_v34 = vsel %vm4687_vm6, %v4893_v12, %v9240_v44 }
 0x2e5   :  { %v5004_v52 = vsel %vm4690_vm7, %v5003_v35, %v5002_v55  ;;  %v4589_v1 = vcombine.high %v4581_v9, %v4581_v9  ;;  %v4590_v13 = vcombine.high %v4588_v10, %v4588_v10  ;;  %v5160_v63 = vrot.slane %v4588_v10, %v9203_v43 }
 0x2e6   :  { %v5649_v38 = vrot.slane %v4581_v9, %v9203_v43  ;;  %v5671_v56 = vrot.slane %v9293_v46, 4  ;;  %v4572_v7 = vcombine.high %v4564_v22, %v4564_v22  ;;  %v4573_v25 = vcombine.high %v4571_v18, %v4571_v18 }
 0x2e7   :  { %v4664_v45 = vrot.slane %v4571_v18, %v9203_v43  ;;  %v5779_v5 = vrot.slane %v9293_v46, 5  ;;  %v4671_v28 = vrot.slane %v4589_v1, %v9203_v43  ;;  %v5656_v44 = vrot.slane %v4590_v13, %v9203_v43 }
 0x2e8   :  { %v5146_v41 = vrot.slane %v4564_v22, %v9203_v43  ;;  %v4897_v0 = vrot.slane %v9289_v4, 5  ;;  %v9364_v31 = vunpack.c.l.b16 %v5160_v63  ;;  %v5642_v29 = vrot.slane %v4572_v7, %v9203_v43 }
 0x2e9   :  { %v4678_v35 = vunpack.c.l.b16 %v4664_v45  ;;  %v5005_v19 = vrot.slane %v9289_v4, 6  ;;  %v5175_v21 = vrot.slane %v9291_v58, 4  ;;  %v4679_v23 = vunpack.c.l.b16 %v4671_v28 }
 0x2ea   :  { %v5153_v49 = vrot.slane %v4573_v25, %v9203_v43  ;;  %v5283_v33 = vrot.slane %v9291_v58, 5  ;;  %v5391_v17 = vrot.slane %v9291_v58, 6  ;;  %v5887_v47 = vrot.slane %v9293_v46, 6  ;;  %v7427_v58 = vld [vmem:[%s9876_s5 + $0x70] sm:$0xff]  }
 0x2eb   :  { %v5995_v55 = vrot.slane %v9293_v46, 7  ;;  %v5669_v2 = vrot.slane %v9304_v50, 5  ;;  %v5777_v3 = vrot.slane %v9304_v50, 6  ;;  %v9376_v37 = vunpack.c.l.b16 %v5649_v38  ;;  %v7424_v38 = vld [vmem:[%s9876_s5 + $0x90] sm:$0xff]  }
 0x2ec   :  { %v9378_v4 = vunpack.c.l.b16 %v5146_v41  ;;  %v5181_v54 = vrot.slane %v9364_v31, 1  ;;  %v5289_v43 = vrot.slane %v9364_v31, 2  ;;  %v4695_v51 = vrot.slane %v4678_v35, 3 }
 0x2ed   :  { %v4792_v57 = vrot.slane %v4678_v35, 2  ;;  %v4698_v12 = vrot.slane %v4679_v23, 2  ;;  %v4794_v26 = vrot.slane %v4679_v23, 1  ;;  %v5397_v42 = vrot.slane %v9364_v31, 3 }
 0x2ee   :  { %v9383_v11 = vunpack.c.l.b16 %v5153_v49  ;;  %v5505_v53 = vrot.slane %v9364_v31, 4  ;;  %v9386_v39 = vunpack.c.l.b16 %v5656_v44  ;;  %v4697_v61 = vsel %vm4696_vm9, %v4695_v51, %v4694_v24 }
 0x2ef   :  { %v4793_v40 = vsel %vm4696_vm9, %v4792_v57, %v4791_v15  ;;  %v4899_v60 = vrot.slane %v4678_v35, 4  ;;  %v5007_v16 = vrot.slane %v4678_v35, 5  ;;  %v5177_v9 = vrot.slane %v9378_v4, 3  ;;  %v7423_v15 = vld [vmem:[%s9876_s5 + $0x60] sm:$0xff]  }
 0x2f0   :  { %v5285_v10 = vrot.slane %v9378_v4, 4  ;;  %v5179_v22 = vrot.slane %v9383_v11, 2  ;;  %v5287_v18 = vrot.slane %v9383_v11, 3  ;;  %v5393_v1 = vrot.slane %v9378_v4, 5 }
 0x2f1   :  { %v9395_v13 = vunpack.c.l.b16 %v5642_v29  ;;  %v4700_v63 = vsel %vm4699_vm10, %v4698_v12, %v4697_v61  ;;  %v4795_v24 = vsel %vm4699_vm10, %v4794_v26, %v4793_v40  ;;  %v4896_v7 = vsel %vm4690_vm7, %v4895_v36, %v4894_v34 }
 0x2f2   :  { %v4901_v25 = vrot.slane %v4679_v23, 3  ;;  %v4701_v45 = vpack.c.b16 %v4700_v63, %v4700_v63  ;;  %v4796_v28 = vpack.c.b16 %v4795_v24, %v4795_v24  ;;  %v4898_v44 = vsel %vm4693_vm8, %v4897_v0, %v4896_v7 }
 0x2f3   :  { %v5006_v41 = vsel %vm4693_vm8, %v5005_v19, %v5004_v52  ;;  %v4900_v35 = vsel %vm4696_vm9, %v4899_v60, %v4898_v44  ;;  %v5009_v49 = vrot.slane %v4679_v23, 4  ;;  %v5176_v51 = vsel %vm4690_vm7, %v5175_v21, %v9308_v59  ;;  %v7425_v59 = vld [vmem:[%s9876_s5 + $0x68] sm:$0xff]   ;;  %v7426_v19 = vld [vmem:[%s9876_s5 + $0x98] sm:$0xff]  }
 0x2f4   :  { %v5008_v29 = vsel %vm4696_vm9, %v5007_v16, %v5006_v41  ;;  %v5501_v57 = vrot.slane %v9378_v4, 6  ;;  %7140 = vmatmul.mubr.msk.bf16.vlgmr.msra.gmra.mrb[56].mxu0 %vm4738_vm11, %v4701_v45  ;;  %7156 = vmatmul.mubr.msk.bf16.vlgmr.msra.gmra.mrb[40].mxu1 %vm4738_vm11, %v4796_v28  ;;  %v9418_v30 = vsel %vm4699_vm10, %v4901_v25, %v4900_v35  ;;  %v5178_v36 = vsel %vm4693_vm8, %v5177_v9, %v5176_v51  ;;  %v7431_v45 = vld [vmem:[%s9876_s5 + $0x80] sm:$0xff]   ;;  %v7432_v28 = vld [vmem:[%s9876_s5 + $0xb0] sm:$0xff]   ;;  %v7434_v41 = vld [vmem:[%s9876_s5 + $0xb8] sm:$0xff]  }
 0x2f5   :  { %v5284_v34 = vsel %vm4690_vm7, %v5283_v33, %v9311_v8  ;;  %v5395_v52 = vrot.slane %v9383_v11, 4  ;;  %v5503_v0 = vrot.slane %v9383_v11, 5  ;;  %7160 = vmatpush3.bf16.msra.mxu0 %v7423_v15  ;;  %7176 = vmatpush3.bf16.msra.mxu1 %v7424_v38  ;;  %v9432_v21 = vsel %vm4699_vm10, %v5009_v49, %v5008_v29  ;;  %v7435_v35 = vld [vmem:[%s9876_s5 + $0xc0] sm:$0xff]   ;;  %v7436_v29 = vld [vmem:[%s9876_s5 + $0xf0] sm:$0xff]  }
 0x2f6   :  { %v5180_v23 = vsel %vm4696_vm9, %v5179_v22, %v5178_v36  ;;  %v5675_v8 = vrot.slane %v9376_v37, 2  ;;  %v5783_v33 = vrot.slane %v9376_v37, 3  ;;  %7161 = vmatprep.subr.bf16.mxu0 %v9983_v48  ;;  %7177 = vmatprep.subr.bf16.mxu1 %v9983_v48  ;;  %v5286_v12 = vsel %vm4693_vm8, %v5285_v10, %v5284_v34  ;;  %v7439_v36 = vld [vmem:[%s9876_s5 + $0xd0] sm:$0xff]   ;;  %v7440_v34 = vld [vmem:[%s9876_s5 + $0x100] sm:$0xff]  }
 0x2f7   :  { %v9440_v4 = vsel %vm4699_vm10, %v5181_v54, %v5180_v23  ;;  %v5891_v26 = vrot.slane %v9376_v37, 4  ;;  %v5673_v11 = vrot.slane %v9395_v13, 3  ;;  %7171 = vmatprep.mubr.msk.bf16.mxu0 %vm7501_vm0, %v9983_v48  ;;  %7187 = vmatprep.mubr.msk.bf16.mxu1 %vm7501_vm0, %v9983_v48  ;;  %v5288_v61 = vsel %vm4696_vm9, %v5287_v18, %v5286_v12  ;;  %v7446_v23 = vld [vmem:[%s9876_s5 + $0x118] sm:$0xff]  }
 0x2f8   :  { %v5392_v54 = vsel %vm4690_vm7, %v5391_v17, %v9314_v27  ;;  %v9455_v40 = vsel %vm4699_vm10, %v5289_v43, %v5288_v61  ;;  %v5502_v16 = vsel %vm4693_vm8, %v5501_v57, %v9317_v14  ;;  %v5670_v9 = vsel %vm4687_vm6, %v5669_v2, %v9328_v6  ;;  %v7428_v27 = vld [vmem:[%s9876_s5 + $0xa0] sm:$0xff]   ;;  %v7437_v57 = vld [vmem:[%s9876_s5 + $0xc8] sm:$0xff]   ;;  %v7451_v61 = vld [vmem:[%s9876_s5 + $0x130] sm:$0xff]  }
 0x2f9   :  { %v5394_v60 = vsel %vm4693_vm8, %v5393_v1, %v5392_v54  ;;  %v5781_v10 = vrot.slane %v9395_v13, 4  ;;  %v5889_v22 = vrot.slane %v9395_v13, 5  ;;  %7162 = vmatpush3.bf16.msra.mxu0 %v7425_v59  ;;  %7178 = vmatpush3.bf16.msra.mxu1 %v7426_v19  ;;  %v5504_v17 = vsel %vm4696_vm9, %v5503_v0, %v5502_v16  ;;  %v7442_v0 = vld [vmem:[%s9876_s5 + $0x108] sm:$0xff]   ;;  %v7443_v59 = vld [vmem:[%s9876_s5 + $0xe0] sm:$0xff]   ;;  %v7444_v19 = vld [vmem:[%s9876_s5 + $0x110] sm:$0xff]  }
 0x2fa   :  { %v5396_v14 = vsel %vm4696_vm9, %v5395_v52, %v5394_v60  ;;  %v5997_v6 = vrot.slane %v9395_v13, 6  ;;  %7163 = vmatprep.subr.bf16.mxu0 %v9983_v48  ;;  %7179 = vmatprep.subr.bf16.mxu1 %v9983_v48  ;;  %v9485_v43 = vsel %vm4699_vm10, %v5505_v53, %v5504_v17  ;;  %v5672_v18 = vsel %vm4690_vm7, %v5671_v56, %v5670_v9  ;;  %v7441_v52 = vld [vmem:[%s9876_s5 + $0xd8] sm:$0xff]   ;;  %v7452_v54 = vld [vmem:[%s9876_s5 + $0x160] sm:$0xff]   ;;  %v7454_v60 = vld [vmem:[%s9876_s5 + $0x168] sm:$0xff]  }
 0x2fb   :  { %v9480_v2 = vsel %vm4699_vm10, %v5397_v42, %v5396_v14  ;;  %v5674_v1 = vsel %vm4693_vm8, %v5673_v11, %v5672_v18  ;;  %v5677_v13 = vrot.slane %v9386_v39, 1  ;;  %v5778_v63 = vsel %vm4687_vm6, %v5777_v3, %v9335_v20  ;;  %v7429_v20 = vld [vmem:[%s9876_s5 + $0x78] sm:$0xff]   ;;  %v7449_v11 = vld [vmem:[%s9876_s5 + $0x128] sm:$0xff]   ;;  %v7455_v16 = vld [vmem:[%s9876_s5 + $0x140] sm:$0xff]  }
 0x2fc   :  { %v5785_v42 = vrot.slane %v9386_v39, 2  ;;  %v5676_v31 = vsel %vm4696_vm9, %v5675_v8, %v5674_v1  ;;  %v5780_v53 = vsel %vm4690_vm7, %v5779_v5, %v5778_v63  ;;  %v5888_v56 = vsel %vm4690_vm7, %v5887_v47, %v9338_v32  ;;  %v7430_v5 = vld [vmem:[%s9876_s5 + $0xa8] sm:$0xff]   ;;  %v7447_v8 = vld [vmem:[%s9876_s5 + $0x120] sm:$0xff]   ;;  %v7456_v9 = vld [vmem:[%s9876_s5 + $0x170] sm:$0xff]  }
 0x2fd   :  { %v5996_v50 = vsel %vm4690_vm7, %v5995_v55, %v9345_v62  ;;  %7164 = vmatpush3.bf16.msra.mxu0 %v7427_v58  ;;  %7180 = vmatpush3.bf16.msra.mxu1 %v7428_v27  ;;  %v9516_v3 = vsel %vm4699_vm10, %v5677_v13, %v5676_v31  ;;  %v5782_v32 = vsel %vm4693_vm8, %v5781_v10, %v5780_v53  ;;  %v5893_v46 = vrot.slane %v9386_v39, 3  ;;  %v7457_v10 = vld [vmem:[%s9876_s5 + $0x148] sm:$0xff]   ;;  %v7459_v58 = vld [vmem:[%s9876_s5 + $0x180] sm:$0xff]   ;;  %v7460_v27 = vld [vmem:[%s9876_s5 + $0x1b0] sm:$0xff]  }
 0x2fe   :  { %v5890_v47 = vsel %vm4693_vm8, %v5889_v22, %v5888_v56  ;;  %v5999_v62 = vrot.slane %v9376_v37, 5  ;;  %7165 = vmatprep.subr.bf16.mxu0 %v9983_v48  ;;  %7181 = vmatprep.subr.bf16.mxu1 %v9983_v48  ;;  %v5784_v55 = vsel %vm4696_vm9, %v5783_v33, %v5782_v32  ;;  %v5998_v7 = vsel %vm4693_vm8, %v5997_v6, %v5996_v50  ;;  %v7448_v33 = vld [vmem:[%s9876_s5 + $0x150] sm:$0xff]   ;;  %v7458_v22 = vld [vmem:[%s9876_s5 + $0x178] sm:$0xff]   ;;  %v7461_v6 = vld [vmem:[%s9876_s5 + $0x188] sm:$0xff]  }
 0x2ff   :  { %v5892_v24 = vsel %vm4696_vm9, %v5891_v26, %v5890_v47  ;;  %v9527_v15 = vsel %vm4699_vm10, %v5785_v42, %v5784_v55  ;;  %v6001_v25 = vrot.slane %v9386_v39, 4  ;;  %v7433_v39 = vld [vmem:[%s9876_s5 + $0x88] sm:$0xff]   ;;  %v4903_v49 = vpack.c.b16 %v9418_v30, %v9418_v30  ;;  %v7438_v30 = vld [vmem:[%s9876_s5 + $0xf8] sm:$0xff]   ;;  %v7464_v18 = vld [vmem:[%s9876_s5 + $0x1c0] sm:$0xff]  }
 0x300   :  { %v9530_v38 = vsel %vm4699_vm10, %v5893_v46, %v5892_v24  ;;  %v6000_v37 = vsel %vm4696_vm9, %v5999_v62, %v5998_v7  ;;  %v5011_v51 = vpack.c.b16 %v9432_v21, %v9432_v21  ;;  %v7445_v21 = vld [vmem:[%s9876_s5 + $0xe8] sm:$0xff]   ;;  %v5183_v12 = vpack.c.b16 %v9440_v4, %v9440_v4  ;;  %v7450_v4 = vld [vmem:[%s9876_s5 + $0x158] sm:$0xff]   ;;  %v7467_v63 = vld [vmem:[%s9876_s5 + $0x1a0] sm:$0xff]  }
 0x301   :  { %7166 = vmatpush3.bf16.msra.mxu0 %v7429_v20  ;;  %7182 = vmatpush3.bf16.msra.mxu1 %v7430_v5  ;;  %v9542_v44 = vsel %vm4699_vm10, %v6001_v25, %v6000_v37  ;;  %v5291_v26 = vpack.c.b16 %v9455_v40, %v9455_v40  ;;  %v7453_v40 = vld [vmem:[%s9876_s5 + $0x138] sm:$0xff]   ;;  %v5399_v14 = vpack.c.b16 %v9480_v2, %v9480_v2  ;;  %v7466_v13 = vld [vmem:[%s9876_s5 + $0x1c8] sm:$0xff]   ;;  %v7468_v42 = vld [vmem:[%s9876_s5 + $0x1d0] sm:$0xff]  }
 0x302   :  { %7167 = vmatprep.subr.bf16.mxu0 %v9983_v48  ;;  %7183 = vmatprep.subr.bf16.mxu1 %v9983_v48  ;;  %v5507_v17 = vpack.c.b16 %v9485_v43, %v9485_v43  ;;  %v7462_v2 = vld [vmem:[%s9876_s5 + $0x1b8] sm:$0xff]   ;;  %v7463_v43 = vld [vmem:[%s9876_s5 + $0x190] sm:$0xff]   ;;  %v7469_v31 = vld [vmem:[%s9876_s5 + $0x1a8] sm:$0xff]   ;;  %v5679_v20 = vpack.c.b16 %v9516_v3, %v9516_v3  ;;  %v5787_v5 = vpack.c.b16 %v9527_v15, %v9527_v15 }
 0x303   :  { %v7465_v1 = vld [vmem:[%s9876_s5 + $0x198] sm:$0xff]   ;;  %v7471_v56 = vld [vmem:[%s9876_s5 + $0x1e0] sm:$0xff]   ;;  %v7472_v50 = vld [vmem:[%s9876_s5 + $0x210] sm:$0xff]   ;;  %v5895_v37 = vpack.c.b16 %v9530_v38, %v9530_v38 }
 0x304   :  { %v7470_v53 = vld [vmem:[%s9876_s5 + $0x1d8] sm:$0xff]   ;;  %v7473_v32 = vld [vmem:[%s9876_s5 + $0x1e8] sm:$0xff]   ;;  %v7475_v47 = vld [vmem:[%s9876_s5 + $0x1f0] sm:$0xff]  }
 0x305   :  { %7168 = vmatpush3.bf16.msra.mxu0 %v7431_v45  ;;  %7184 = vmatpush3.bf16.msra.mxu1 %v7432_v28  ;;  %v7474_v3 = vld [vmem:[%s9876_s5 + $0x218] sm:$0xff]   ;;  %v7476_v46 = vld [vmem:[%s9876_s5 + $0x220] sm:$0xff]   ;;  %v7478_v55 = vld [vmem:[%s9876_s5 + $0x228] sm:$0xff]   ;;  %v6003_v45 = vpack.c.b16 %v9542_v44, %v9542_v44 }
 0x306   :  { %7169 = vmatprep.subr.bf16.mxu0 %v9983_v48  ;;  %7185 = vmatprep.subr.bf16.mxu1 %v9983_v48  ;;  %v7477_v62 = vld [vmem:[%s9876_s5 + $0x1f8] sm:$0xff]   ;;  %v7479_v24 = vld [vmem:[%s9876_s5 + $0x200] sm:$0xff]   ;;  %v7480_v15 = vld [vmem:[%s9876_s5 + $0x230] sm:$0xff]  }
 0x307   :  { %v7481_v7 = vld [vmem:[%s9876_s5 + $0x208] sm:$0xff]   ;;  %v7482_v25 = vld [vmem:[%s9876_s5 + $0x238] sm:$0xff]   ;;  %v7483_v38 = vld [vmem:[%s9878_s7] sm:$0xff]  }
 0x308   :  { %v7484_v28 = vld [vmem:[%s9878_s7 + $0x8] sm:$0xff]   ;;  %v7485_v44 = vld [vmem:[%s9878_s7 + $0x10] sm:$0xff]  }
 0x309   :  { %7170 = vmatpush3.bf16.msra.mxu0 %v7433_v39  ;;  %7186 = vmatpush3.bf16.msra.mxu1 %v7434_v41  ;;  %v7486_v39 = vld [vmem:[%s9878_s7 + $0x18] sm:$0xff]   ;;  %v7487_v41 = vld [vmem:[%s9878_s7 + $0x20] sm:$0xff]  }
 0x30a   :  { %7191 = vmatprep.subr.bf16.mxu0 %v9983_v48  ;;  %7207 = vmatprep.subr.bf16.mxu1 %v9983_v48 }
 0x30c   :  { %7172 = vmatmul.mubr.msk.bf16.vlgmr.msra.gmra.mrb[60].mxu0 %vm4738_vm11, %v4903_v49  ;;  %7188 = vmatmul.mubr.msk.bf16.vlgmr.msra.gmra.mrb[44].mxu1 %vm4738_vm11, %v5011_v51 }
 0x30d   :  { %7192 = vmatpush3.bf16.msra.mxu0 %v7435_v35  ;;  %7208 = vmatpush3.bf16.msra.mxu1 %v7436_v29 }
 0x30e   :  { %7193 = vmatprep.subr.bf16.mxu0 %v9983_v48  ;;  %7209 = vmatprep.subr.bf16.mxu1 %v9983_v48 }
 0x30f   :  { %7203 = vmatprep.mubr.msk.bf16.mxu0 %vm7501_vm0, %v9983_v48  ;;  %7219 = vmatprep.mubr.msk.bf16.mxu1 %vm7501_vm0, %v9983_v48 }
 0x311   :  { %7194 = vmatpush3.bf16.msra.mxu0 %v7437_v57  ;;  %7210 = vmatpush3.bf16.msra.mxu1 %v7438_v30  ;;  %v7488_v30 = vld [vmem:[%s9878_s7 + $0x28] sm:$0xff]  }
 0x312   :  { %7195 = vmatprep.subr.bf16.mxu0 %v9983_v48  ;;  %7211 = vmatprep.subr.bf16.mxu1 %v9983_v48 }
 0x315   :  { %7196 = vmatpush3.bf16.msra.mxu0 %v7439_v36  ;;  %7212 = vmatpush3.bf16.msra.mxu1 %v7440_v34 }
 0x316   :  { %7197 = vmatprep.subr.bf16.mxu0 %v9983_v48  ;;  %7213 = vmatprep.subr.bf16.mxu1 %v9983_v48 }
 0x319   :  { %7198 = vmatpush3.bf16.msra.mxu0 %v7441_v52  ;;  %7214 = vmatpush3.bf16.msra.mxu1 %v7442_v0 }
 0x31a   :  { %7199 = vmatprep.subr.bf16.mxu0 %v9983_v48  ;;  %7215 = vmatprep.subr.bf16.mxu1 %v9983_v48 }
 0x31d   :  { %7200 = vmatpush3.bf16.msra.mxu0 %v7443_v59  ;;  %7216 = vmatpush3.bf16.msra.mxu1 %v7444_v19  ;;  %v7489_v59 = vld [vmem:[%s9878_s7 + $0x30] sm:$0xff]   ;;  %v7491_v19 = vld [vmem:[%s9879_s9] sm:$0xff]  }
 0x31e   :  { %7201 = vmatprep.subr.bf16.mxu0 %v9983_v48  ;;  %7217 = vmatprep.subr.bf16.mxu1 %v9983_v48 }
 0x321   :  { %7202 = vmatpush3.bf16.msra.mxu0 %v7445_v21  ;;  %7218 = vmatpush3.bf16.msra.mxu1 %v7446_v23  ;;  %v7492_v21 = vld [vmem:[%s9879_s9 + $0x8] sm:$0xff]   ;;  %v7490_v23 = vld [vmem:[%s9878_s7 + $0x38] sm:$0xff]  }
 0x322   :  { %7223 = vmatprep.subr.bf16.mxu0 %v9983_v48  ;;  %7239 = vmatprep.subr.bf16.mxu1 %v9983_v48 }
 0x324   :  { %7204 = vmatmul.mubr.msk.bf16.vlgmr.msra.gmra.mrb[64].mxu0 %vm4738_vm11, %v5183_v12  ;;  %7220 = vmatmul.mubr.msk.bf16.vlgmr.msra.gmra.mrb[48].mxu1 %vm4738_vm11, %v5291_v26  ;;  %v7495_v12 = vld [vmem:[%s9879_s9 + $0x20] sm:$0xff]   ;;  %v7496_v26 = vld [vmem:[%s9879_s9 + $0x28] sm:$0xff]  }
 0x325   :  { %7224 = vmatpush3.bf16.msra.mxu0 %v7447_v8  ;;  %7240 = vmatpush3.bf16.msra.mxu1 %v7448_v33  ;;  %v7493_v8 = vld [vmem:[%s9879_s9 + $0x10] sm:$0xff]   ;;  %v7494_v33 = vld [vmem:[%s9879_s9 + $0x18] sm:$0xff]  }
 0x326   :  { %7225 = vmatprep.subr.bf16.mxu0 %v9983_v48  ;;  %7241 = vmatprep.subr.bf16.mxu1 %v9983_v48 }
 0x327   :  { %7235 = vmatprep.mubr.msk.bf16.mxu0 %vm7501_vm0, %v9983_v48  ;;  %7251 = vmatprep.mubr.msk.bf16.mxu1 %vm7501_vm0, %v9983_v48 }
 0x329   :  { %7226 = vmatpush3.bf16.msra.mxu0 %v7449_v11  ;;  %7242 = vmatpush3.bf16.msra.mxu1 %v7450_v4 }
 0x32a   :  { %7227 = vmatprep.subr.bf16.mxu0 %v9983_v48  ;;  %7243 = vmatprep.subr.bf16.mxu1 %v9983_v48 }
 0x32d   :  { %7228 = vmatpush3.bf16.msra.mxu0 %v7451_v61  ;;  %7244 = vmatpush3.bf16.msra.mxu1 %v7452_v54 }
 0x32e   :  { %7229 = vmatprep.subr.bf16.mxu0 %v9983_v48  ;;  %7245 = vmatprep.subr.bf16.mxu1 %v9983_v48 }
 0x331   :  { %7230 = vmatpush3.bf16.msra.mxu0 %v7453_v40  ;;  %7246 = vmatpush3.bf16.msra.mxu1 %v7454_v60 }
 0x332   :  { %7231 = vmatprep.subr.bf16.mxu0 %v9983_v48  ;;  %7247 = vmatprep.subr.bf16.mxu1 %v9983_v48 }
 0x335   :  { %7232 = vmatpush3.bf16.msra.mxu0 %v7455_v16  ;;  %7248 = vmatpush3.bf16.msra.mxu1 %v7456_v9 }
 0x336   :  { %7233 = vmatprep.subr.bf16.mxu0 %v9983_v48  ;;  %7249 = vmatprep.subr.bf16.mxu1 %v9983_v48 }
 0x339   :  { %7234 = vmatpush3.bf16.msra.mxu0 %v7457_v10  ;;  %7250 = vmatpush3.bf16.msra.mxu1 %v7458_v22 }
 0x33a   :  { %7255 = vmatprep.subr.bf16.mxu0 %v9983_v48  ;;  %7271 = vmatprep.subr.bf16.mxu1 %v9983_v48 }
 0x33c   :  { %7236 = vmatmul.mubr.msk.bf16.vlgmr.msra.gmra.mrb[68].mxu0 %vm4738_vm11, %v5399_v14  ;;  %7252 = vmatmul.mubr.msk.bf16.vlgmr.msra.gmra.mrb[52].mxu1 %vm4738_vm11, %v5507_v17 }
 0x33d   :  { %7256 = vmatpush3.bf16.msra.mxu0 %v7459_v58  ;;  %7272 = vmatpush3.bf16.msra.mxu1 %v7460_v27 }
 0x33e   :  { %7257 = vmatprep.subr.bf16.mxu0 %v9983_v48  ;;  %7273 = vmatprep.subr.bf16.mxu1 %v9983_v48 }
 0x33f   :  { %7267 = vmatprep.mubr.msk.bf16.mxu0 %vm7501_vm0, %v9983_v48  ;;  %7283 = vmatprep.mubr.msk.bf16.mxu1 %vm7501_vm0, %v9983_v48 }
 0x341   :  { %7258 = vmatpush3.bf16.msra.mxu0 %v7461_v6  ;;  %7274 = vmatpush3.bf16.msra.mxu1 %v7462_v2 }
 0x342   :  { %7259 = vmatprep.subr.bf16.mxu0 %v9983_v48  ;;  %7275 = vmatprep.subr.bf16.mxu1 %v9983_v48 }
 0x345   :  { %7260 = vmatpush3.bf16.msra.mxu0 %v7463_v43  ;;  %7276 = vmatpush3.bf16.msra.mxu1 %v7464_v18 }
 0x346   :  { %7261 = vmatprep.subr.bf16.mxu0 %v9983_v48  ;;  %7277 = vmatprep.subr.bf16.mxu1 %v9983_v48 }
 0x349   :  { %7262 = vmatpush3.bf16.msra.mxu0 %v7465_v1  ;;  %7278 = vmatpush3.bf16.msra.mxu1 %v7466_v13 }
 0x34a   :  { %7263 = vmatprep.subr.bf16.mxu0 %v9983_v48  ;;  %7279 = vmatprep.subr.bf16.mxu1 %v9983_v48 }
 0x34d   :  { %7264 = vmatpush3.bf16.msra.mxu0 %v7467_v63  ;;  %7280 = vmatpush3.bf16.msra.mxu1 %v7468_v42 }
 0x34e   :  { %7265 = vmatprep.subr.bf16.mxu0 %v9983_v48  ;;  %7281 = vmatprep.subr.bf16.mxu1 %v9983_v48 }
 0x351   :  { %7266 = vmatpush3.bf16.msra.mxu0 %v7469_v31  ;;  %7282 = vmatpush3.bf16.msra.mxu1 %v7470_v53 }
 0x352   :  { %7287 = vmatprep.subr.bf16.mxu0 %v9983_v48  ;;  %7303 = vmatprep.subr.bf16.mxu1 %v9983_v48 }
 0x354   :  { %7268 = vmatmul.mubr.msk.bf16.vlgmr.msra.gmra.mrb[72].mxu0 %vm4738_vm11, %v5679_v20  ;;  %7284 = vmatmul.mubr.msk.bf16.vlgmr.msra.gmra.mrb[56].mxu1 %vm4738_vm11, %v5787_v5 }
 0x355   :  { %7288 = vmatpush3.bf16.msra.mxu0 %v7471_v56  ;;  %7304 = vmatpush3.bf16.msra.mxu1 %v7472_v50 }
 0x356   :  { %7289 = vmatprep.subr.bf16.mxu0 %v9983_v48  ;;  %7305 = vmatprep.subr.bf16.mxu1 %v9983_v48 }
 0x357   :  { %7299 = vmatprep.mubr.msk.bf16.mxu0 %vm7501_vm0, %v9983_v48  ;;  %7315 = vmatprep.mubr.msk.bf16.mxu1 %vm7501_vm0, %v9983_v48 }
 0x359   :  { %7290 = vmatpush3.bf16.msra.mxu0 %v7473_v32  ;;  %7306 = vmatpush3.bf16.msra.mxu1 %v7474_v3 }
 0x35a   :  { %7291 = vmatprep.subr.bf16.mxu0 %v9983_v48  ;;  %7307 = vmatprep.subr.bf16.mxu1 %v9983_v48 }
 0x35d   :  { %7292 = vmatpush3.bf16.msra.mxu0 %v7475_v47  ;;  %7308 = vmatpush3.bf16.msra.mxu1 %v7476_v46 }
 0x35e   :  { %7293 = vmatprep.subr.bf16.mxu0 %v9983_v48  ;;  %7309 = vmatprep.subr.bf16.mxu1 %v9983_v48 }
 0x361   :  { %7294 = vmatpush3.bf16.msra.mxu0 %v7477_v62  ;;  %7310 = vmatpush3.bf16.msra.mxu1 %v7478_v55 }
 0x362   :  { %7295 = vmatprep.subr.bf16.mxu0 %v9983_v48  ;;  %7311 = vmatprep.subr.bf16.mxu1 %v9983_v48 }
 0x365   :  { %7296 = vmatpush3.bf16.msra.mxu0 %v7479_v24  ;;  %7312 = vmatpush3.bf16.msra.mxu1 %v7480_v15 }
 0x366   :  { %7297 = vmatprep.subr.bf16.mxu0 %v9983_v48  ;;  %7313 = vmatprep.subr.bf16.mxu1 %v9983_v48 }
 0x369   :  { %7298 = vmatpush3.bf16.msra.mxu0 %v7481_v7  ;;  %7314 = vmatpush3.bf16.msra.mxu1 %v7482_v25 }
 0x36a   :  { %7319 = vmatprep.subr.bf16.mxu0 %v9983_v48  ;;  %7339 = vmatprep.subr.bf16.mxu1 %v9983_v48 }
 0x36c   :  { %7300 = vmatmul.mubr.msk.bf16.vlgmr.msra.gmra.mrb[76].mxu0 %vm4738_vm11, %v5895_v37  ;;  %7316 = vmatmul.mubr.msk.bf16.vlgmr.msra.gmra.mrb[60].mxu1 %vm4738_vm11, %v6003_v45 }
 0x36d   :  { %7335 = vmatprep.mubr.msk.bf16.mxu0 %vm7501_vm0, %v9983_v48  ;;  %7355 = vmatprep.mubr.msk.bf16.mxu1 %vm7501_vm0, %v9983_v48 }
 0x36e   :  { %7320 = vmatpush3.bf16.msra.mxu0 %v7483_v38  ;;  %7340 = vmatpush3.bf16.msra.mxu1 %v7491_v19  ;;  %v6785_v19 = vld [vmem:[%s9881_s8] ss:$0 sm:$0xff] }
 0x36f   :  { %7321 = vmatprep.subr.bf16.mxu0 %v9983_v48  ;;  %7341 = vmatprep.subr.bf16.mxu1 %v9983_v48 }
 0x372   :  { %7322 = vmatpush3.bf16.msra.mxu0 %v7484_v28  ;;  %7342 = vmatpush3.bf16.msra.mxu1 %v7492_v21 }
 0x373   :  { %7323 = vmatprep.subr.bf16.mxu0 %v9983_v48  ;;  %7343 = vmatprep.subr.bf16.mxu1 %v9983_v48 }
 0x376   :  { %7324 = vmatpush3.bf16.msra.mxu0 %v7485_v44  ;;  %7344 = vmatpush3.bf16.msra.mxu1 %v7493_v8 }
 0x377   :  { %7325 = vmatprep.subr.bf16.mxu0 %v9983_v48  ;;  %7345 = vmatprep.subr.bf16.mxu1 %v9983_v48 }
 0x37a   :  { %7326 = vmatpush3.bf16.msra.mxu0 %v7486_v39  ;;  %7346 = vmatpush3.bf16.msra.mxu1 %v7494_v33 }
 0x37b   :  { %7327 = vmatprep.subr.bf16.mxu0 %v9983_v48  ;;  %7347 = vmatprep.subr.bf16.mxu1 %v9983_v48 }
 0x37e   :  { %7328 = vmatpush3.bf16.msra.mxu0 %v7487_v41  ;;  %7348 = vmatpush3.bf16.msra.mxu1 %v7495_v12 }
 0x37f   :  { %7329 = vmatprep.subr.bf16.mxu0 %v9983_v48  ;;  %7349 = vmatprep.subr.bf16.mxu1 %v9983_v48 }
 0x382   :  { %7330 = vmatpush3.bf16.msra.mxu0 %v7488_v30  ;;  %7350 = vmatpush3.bf16.msra.mxu1 %v7496_v26 }
 0x383   :  { %7331 = vmatprep.subr.bf16.mxu0 %v9983_v48  ;;  %7351 = vmatprep.subr.bf16.mxu1 %v9983_v48 }
 0x386   :  { %7332 = vmatpush3.bf16.msra.mxu0 %v7489_v59  ;;  %v7498_v59 = vld [vmem:[%s9879_s9 + $0x38] sm:$0xff]  }
 0x387   :  { %7333 = vmatprep.subr.bf16.mxu0 %v9983_v48 }
 0x38a   :  { %7334 = vmatpush3.bf16.msra.mxu0 %v7490_v23 }
 0x3c7   :  { %v4776_v35 = vpop.f32.mrb[56].mxu0  ;;  %v4870_v29 = vpop.f32.mrb[40].mxu1 }
 0x3c8   :  { %v4871_v49 = vadd.f32 %v4870_v29, %v4776_v35  ;;  %v7141_v51 = vpop.f32.mrb[57].mxu0  ;;  %v7157_v57 = vpop.f32.mrb[41].mxu1  ;;  %v6784_v35 = vld [vmem:[%s9880_s6] ss:$0 sm:$0xff] }
 0x3c9   :  { %v4779_v36 = vpop.f32.mrb[58].mxu0  ;;  %v4873_v34 = vpop.f32.mrb[42].mxu1 }
 0x3ca   :  { %v7142_v52 = vpop.f32.mrb[59].mxu0  ;;  %v7158_v0 = vpop.f32.mrb[43].mxu1 }
 0x3cb   :  { %v7497_v0 = vld [vmem:[%s9879_s9 + $0x30] sm:$0xff]  }
 0x3cc   :  { %7352 = vmatpush3.bf16.msra.mxu1 %v7497_v0 }
 0x3cd   :  { %7353 = vmatprep.subr.bf16.mxu1 %v9983_v48 }
 0x3d0   :  { %7354 = vmatpush3.bf16.msra.mxu1 %v7498_v59 }
 0x3df   :  { %v4977_v11 = vpop.f32.mrb[60].mxu0  ;;  %v5085_v4 = vpop.f32.mrb[44].mxu1 }
 0x3e0   :  { %v4983_v61 = vadd.f32 %v4977_v11, %v4871_v49  ;;  %v7173_v54 = vpop.f32.mrb[61].mxu0  ;;  %v7189_v40 = vpop.f32.mrb[45].mxu1 }
 0x3e1   :  { %v4980_v60 = vpop.f32.mrb[62].mxu0  ;;  %v5088_v16 = vpop.f32.mrb[46].mxu1 }
 0x3e2   :  { %v5091_v9 = vadd.f32 %v5085_v4, %v4983_v61  ;;  %v7174_v10 = vpop.f32.mrb[63].mxu0  ;;  %v7190_v22 = vpop.f32.mrb[47].mxu1  ;;  %v6794_v4 = vld [vmem:[%s9882_s10] ss:$0 sm:$0xff] }
 0x3f7   :  { %v5257_v58 = vpop.f32.mrb[64].mxu0  ;;  %v5365_v27 = vpop.f32.mrb[48].mxu1 }
 0x3f8   :  { %v5263_v14 = vadd.f32 %v5257_v58, %v5091_v9  ;;  %v7205_v17 = vpop.f32.mrb[65].mxu0  ;;  %v7221_v6 = vpop.f32.mrb[49].mxu1 }
 0x3f9   :  { %v5260_v2 = vpop.f32.mrb[66].mxu0  ;;  %v5368_v43 = vpop.f32.mrb[50].mxu1 }
 0x3fa   :  { %v5371_v18 = vadd.f32 %v5365_v27, %v5263_v14  ;;  %v7206_v1 = vpop.f32.mrb[67].mxu0  ;;  %v7222_v13 = vpop.f32.mrb[51].mxu1 }
 0x40f   :  { %v5473_v63 = vpop.f32.mrb[68].mxu0  ;;  %v5581_v42 = vpop.f32.mrb[52].mxu1 }
 0x410   :  { %v5479_v31 = vadd.f32 %v5473_v63, %v5371_v18  ;;  %v7237_v53 = vpop.f32.mrb[69].mxu0  ;;  %v7253_v56 = vpop.f32.mrb[53].mxu1 }
 0x411   :  { %v5476_v50 = vpop.f32.mrb[70].mxu0  ;;  %v5584_v20 = vpop.f32.mrb[54].mxu1 }
 0x412   :  { %v5587_v5 = vadd.f32 %v5581_v42, %v5479_v31  ;;  %v7238_v32 = vpop.f32.mrb[71].mxu0  ;;  %v7254_v3 = vpop.f32.mrb[55].mxu1 }
 0x427   :  { %v5753_v47 = vpop.f32.mrb[72].mxu0  ;;  %v5861_v46 = vpop.f32.mrb[56].mxu1 }
 0x428   :  { %v5759_v62 = vadd.f32 %v5753_v47, %v5587_v5  ;;  %v7269_v55 = vpop.f32.mrb[73].mxu0  ;;  %v7285_v24 = vpop.f32.mrb[57].mxu1 }
 0x429   :  { %v5756_v15 = vpop.f32.mrb[74].mxu0  ;;  %v5864_v7 = vpop.f32.mrb[58].mxu1 }
 0x42a   :  { %v5867_v25 = vadd.f32 %v5861_v46, %v5759_v62  ;;  %v7270_v37 = vpop.f32.mrb[75].mxu0  ;;  %v7286_v45 = vpop.f32.mrb[59].mxu1 }
 0x43f   :  { %v5969_v38 = vpop.f32.mrb[76].mxu0  ;;  %v6077_v28 = vpop.f32.mrb[60].mxu1 }
 0x440   :  { %v5975_v44 = vadd.f32 %v5969_v38, %v5867_v25  ;;  %v7301_v39 = vpop.f32.mrb[77].mxu0  ;;  %v7317_v41 = vpop.f32.mrb[61].mxu1 }
 0x441   :  { %v5972_v29 = vpop.f32.mrb[78].mxu0  ;;  %v6080_v49 = vpop.f32.mrb[62].mxu1 }
 0x442   :  { %v6083_v51 = vadd.f32 %v6077_v28, %v5975_v44  ;;  %v7302_v57 = vpop.f32.mrb[79].mxu0  ;;  %v7318_v30 = vpop.f32.mrb[63].mxu1 }
 0x444   :  { %v6091_v36 = vadd.f32 %v6784_v35, %v6083_v51 }
 0x446   :  { %v6092_v34 = vmax.f32 %v6091_v36, 0.0 }
 0x448   :  { %v6093_v52 = vpack.c.bf16 %v6092_v34, %v6092_v34 }
 0x44a   :  { %7336 = vmatmul.mubr.bf16.vlgmr.msra.gmra.mrb[80].mxu0 %v6093_v52 }
 0x51d   :  { %v6199_v21 = vpop.f32.mrb[80].mxu0 }
 0x51e   :  { %v6200_v23 = vadd.f32 %v6785_v19, %v6199_v21  ;;  %v7337_v8 = vpop.f32.mrb[81].mxu0 }
 0x51f   :  { %v6202_v33 = vpop.f32.mrb[82].mxu0 }
 0x520   :  { %v6205_v12 = vmax.f32 %v6200_v23, 0.0  ;;  %v7338_v26 = vpop.f32.mrb[83].mxu0 }
 0x522   :  { %v6206_v11 = vpack.c.bf16 %v6205_v12, %v6205_v12 }
 0x524   :  { %7356 = vmatmul.mubr.bf16.vlgmr.msra.gmra.mrb[64].mxu1 %v6206_v11 }
 0x5f7   :  { %v6312_v61 = vpop.f32.mrb[64].mxu1 }
 0x5f8   :  { %v6313_v54 = vadd.f32 %v6794_v4, %v6312_v61  ;;  %v7357_v48 = vpop.f32.mrb[65].mxu1 }
 0x5f9   :  { %v6315_v40 = vpop.f32.mrb[66].mxu1 }
 0x5fa   :  { %6318 = vst [vmem:[%s9883_s11] sm:$0xff] %v6313_v54  ;;  %v7358_v60 = vpop.f32.mrb[67].mxu1 }

</bundles_post_ra>
